<compile_context>
chip_gen: v7x
topology: tpu7x:2x2x1
jax: 0.10.0
libtpu: 0.0.40
codegen_flags: <defaults>
</compile_context>

<pallas_src>
import functools
import math

import jax
import jax.numpy as jnp
from jax.experimental import pallas as pl
from jax.experimental.pallas import tpu as pltpu


_TM = 256            # row tile
_TN = 256            # output-feature tile (only used when N > _TN)
_TK = 1024           # reduction tile (only used when K > _TK)
_VMEM_LIMIT = 32 * 1024 * 1024   # fits v7x's 64 MiB physical VMEM with headroom


def _round_up(x, m):
    return (x + m - 1) // m * m


# ----------------------------- Pallas kernels -----------------------------

def _matmul_kernel(*refs, act, has_bias):
    """Tiled (x @ w [+ b]) [+ ReLU]; f32 accumulator, bf16 MXU inputs."""
    if has_bias:
        x_ref, w_ref, b_ref, o_ref, acc_ref = refs
    else:
        x_ref, w_ref, o_ref, acc_ref = refs
        b_ref = None

    @pl.when(pl.program_id(2) == 0)
    def _():
        acc_ref[...] = jnp.zeros_like(acc_ref)

    acc_ref[...] += jnp.dot(x_ref[...], w_ref[...],
                            preferred_element_type=jnp.float32)

    @pl.when(pl.program_id(2) == pl.num_programs(2) - 1)
    def _():
        y = acc_ref[...]
        if has_bias:
            y = y + b_ref[...]
        if act == "relu":
            y = jnp.maximum(y, 0.0)
        o_ref[...] = y.astype(o_ref.dtype)


def matmul_bias_act(x, w, b=None, act="none"):
    """(x @ w [+ b]) with optional ReLU.  x:[M,K] f32, w:[K,N] f32, b:[N] f32."""
    M, K = x.shape
    N = w.shape[1]
    tm = _TM if M > _TM else _round_up(M, 8)
    Mp = _round_up(M, tm)
    tn, Np = (_TN, _round_up(N, _TN)) if N > _TN else (N, N)
    tk, Kp = (_TK, _round_up(K, _TK)) if K > _TK else (K, K)

    xb = x.astype(jnp.bfloat16)
    wb = w.astype(jnp.bfloat16)
    if (Mp, Kp) != (M, K):
        xb = jnp.pad(xb, ((0, Mp - M), (0, Kp - K)))
    if (Kp, Np) != (K, N):
        wb = jnp.pad(wb, ((0, Kp - K), (0, Np - N)))

    has_bias = b is not None
    args = [xb, wb]
    in_specs = [
        pl.BlockSpec((tm, tk), lambda i, j, k: (i, k)),
        pl.BlockSpec((tk, tn), lambda i, j, k: (k, j)),
    ]
    if has_bias:
        bp = b.astype(jnp.float32).reshape(1, N)
        if Np != N:
            bp = jnp.pad(bp, ((0, 0), (0, Np - N)))
        args.append(bp)
        in_specs.append(pl.BlockSpec((1, tn), lambda i, j, k: (0, j)))

    out = pl.pallas_call(
        functools.partial(_matmul_kernel, act=act, has_bias=has_bias),
        out_shape=jax.ShapeDtypeStruct((Mp, Np), jnp.float32),
        grid=(Mp // tm, Np // tn, Kp // tk),
        in_specs=in_specs,
        out_specs=pl.BlockSpec((tm, tn), lambda i, j, k: (i, j)),
        scratch_shapes=[pltpu.VMEM((tm, tn), jnp.float32)],
        compiler_params=pltpu.CompilerParams(
            dimension_semantics=("parallel", "parallel", "arbitrary"),
            vmem_limit_bytes=_VMEM_LIMIT),
    )(*args)
    if (Mp, Np) != (M, N):
        out = out[:M, :N]
    return out


def _glu_kernel(x_ref, wa_ref, wb_ref, ba_ref, bb_ref, o_ref, acca_ref, accb_ref):
    """Fused 1x1 conv + GLU: (x@wa+ba) * sigmoid(x@wb+bb); x tile read once."""
    @pl.when(pl.program_id(1) == 0)
    def _():
        acca_ref[...] = jnp.zeros_like(acca_ref)
        accb_ref[...] = jnp.zeros_like(accb_ref)

    x = x_ref[...]
    acca_ref[...] += jnp.dot(x, wa_ref[...], preferred_element_type=jnp.float32)
    accb_ref[...] += jnp.dot(x, wb_ref[...], preferred_element_type=jnp.float32)

    @pl.when(pl.program_id(1) == pl.num_programs(1) - 1)
    def _():
        a = acca_ref[...] + ba_ref[...]
        g = accb_ref[...] + bb_ref[...]
        o_ref[...] = (a * jax.nn.sigmoid(g)).astype(o_ref.dtype)


def matmul_glu(x, wa, ba, wb, bb):
    """GLU(dim=channels) fused with its 1x1 conv.  x:[M,C], wa/wb:[C,N]."""
    M, C = x.shape
    N = wa.shape[1]
    tm = _TM if M > _TM else _round_up(M, 8)
    Mp = _round_up(M, tm)
    tk, Kp = (_TK, _round_up(C, _TK)) if C > _TK else (C, C)

    xb = x.astype(jnp.bfloat16)
    wab = wa.astype(jnp.bfloat16)
    wbb = wb.astype(jnp.bfloat16)
    if (Mp, Kp) != (M, C):
        xb = jnp.pad(xb, ((0, Mp - M), (0, Kp - C)))
    if Kp != C:
        wab = jnp.pad(wab, ((0, Kp - C), (0, 0)))
        wbb = jnp.pad(wbb, ((0, Kp - C), (0, 0)))
    bap = ba.astype(jnp.float32).reshape(1, N)
    bbp = bb.astype(jnp.float32).reshape(1, N)

    out = pl.pallas_call(
        _glu_kernel,
        out_shape=jax.ShapeDtypeStruct((Mp, N), jnp.float32),
        grid=(Mp // tm, Kp // tk),
        in_specs=[
            pl.BlockSpec((tm, tk), lambda i, k: (i, k)),
            pl.BlockSpec((tk, N), lambda i, k: (k, 0)),
            pl.BlockSpec((tk, N), lambda i, k: (k, 0)),
            pl.BlockSpec((1, N), lambda i, k: (0, 0)),
            pl.BlockSpec((1, N), lambda i, k: (0, 0)),
        ],
        out_specs=pl.BlockSpec((tm, N), lambda i, k: (i, 0)),
        scratch_shapes=[pltpu.VMEM((tm, N), jnp.float32),
                        pltpu.VMEM((tm, N), jnp.float32)],
        compiler_params=pltpu.CompilerParams(
            dimension_semantics=("parallel", "arbitrary"),
            vmem_limit_bytes=_VMEM_LIMIT),
    )(xb, wab, wbb, bap, bbp)
    if Mp != M:
        out = out[:M]
    return out


def _layernorm_kernel(*refs, eps, has_res):
    """Row-tiled LayerNorm, optionally fusing a residual add: LN(x [+ res])."""
    if has_res:
        x_ref, r_ref, g_ref, b_ref, o_ref = refs
    else:
        x_ref, g_ref, b_ref, o_ref = refs
    x = x_ref[...].astype(jnp.float32)
    if has_res:
        x = x + r_ref[...].astype(jnp.float32)
    mu = jnp.mean(x, axis=-1, keepdims=True)
    var = jnp.mean(jnp.square(x - mu), axis=-1, keepdims=True)
    y = (x - mu) * jax.lax.rsqrt(var + eps)
    o_ref[...] = (y * g_ref[...] + b_ref[...]).astype(o_ref.dtype)


def layernorm(x, g, b, residual=None, eps=1e-5):
    M, Dm = x.shape
    tm = _TM if M > _TM else _round_up(M, 8)
    Mp = _round_up(M, tm)
    has_res = residual is not None
    xs = [x, residual] if has_res else [x]
    if Mp != M:
        xs = [jnp.pad(t, ((0, Mp - M), (0, 0))) for t in xs]
    gp = g.astype(jnp.float32).reshape(1, Dm)
    bp = b.astype(jnp.float32).reshape(1, Dm)
    in_specs = [pl.BlockSpec((tm, Dm), lambda i: (i, 0)) for _ in xs]
    in_specs += [pl.BlockSpec((1, Dm), lambda i: (0, 0))] * 2
    out = pl.pallas_call(
        functools.partial(_layernorm_kernel, eps=eps, has_res=has_res),
        out_shape=jax.ShapeDtypeStruct((Mp, Dm), jnp.float32),
        grid=(Mp // tm,),
        in_specs=in_specs,
        out_specs=pl.BlockSpec((tm, Dm), lambda i: (i, 0)),
        compiler_params=pltpu.CompilerParams(
            dimension_semantics=("parallel",),
            vmem_limit_bytes=_VMEM_LIMIT),
    )(*xs, gp, bp)
    if Mp != M:
        out = out[:M]
    return out


def _flash_attn_kernel(q_ref, k_ref, v_ref, o_ref, m_sc, l_sc, acc_sc,
                       *, scale, tq, tk):
    """Flash-attention style causal attention with online softmax."""
    qi = pl.program_id(1)
    ki = pl.program_id(2)

    @pl.when(ki == 0)
    def _():
        m_sc[...] = jnp.full_like(m_sc, -jnp.inf)
        l_sc[...] = jnp.zeros_like(l_sc)
        acc_sc[...] = jnp.zeros_like(acc_sc)

    # Skip KV tiles that are entirely above the causal diagonal.
    @pl.when(ki * tk <= qi * tq + (tq - 1))
    def _():
        q = q_ref[0]                      # [tq, dk] bf16
        k = k_ref[0]                      # [tk, dk] bf16
        v = v_ref[0]                      # [tk, dk] bf16
        s = jax.lax.dot_general(q, k, (((1,), (1,)), ((), ())),
                                preferred_element_type=jnp.float32) * scale
        row = qi * tq + jax.lax.broadcasted_iota(jnp.int32, (tq, tk), 0)
        col = ki * tk + jax.lax.broadcasted_iota(jnp.int32, (tq, tk), 1)
        # causal mask: keep col <= row (also masks the zero-padded KV tail)
        s = jnp.where(col <= row, s, -1e9)
        m_prev = m_sc[...]
        m_new = jnp.maximum(m_prev, jnp.max(s, axis=-1, keepdims=True))
        alpha = jnp.exp(m_prev - m_new)
        p = jnp.exp(s - m_new)
        l_sc[...] = alpha * l_sc[...] + jnp.sum(p, axis=-1, keepdims=True)
        acc_sc[...] = alpha * acc_sc[...] + jnp.dot(
            p.astype(v.dtype), v, preferred_element_type=jnp.float32)
        m_sc[...] = m_new

    @pl.when(ki == pl.num_programs(2) - 1)
    def _():
        inv_l = pl.reciprocal(l_sc[...], approx=True)
        o_ref[0] = (acc_sc[...] * inv_l).astype(o_ref.dtype)


def causal_attention(q, k, v, scale):
    """q,k,v: [B*H, T, dk] f32 -> causal softmax(q k^T / sqrt(dk)) v, f32."""
    BH, T, dk = q.shape
    blk = 128 if T > 128 else _round_up(T, 8)
    Tp = _round_up(T, blk)
    qb, kb, vb = (t.astype(jnp.bfloat16) for t in (q, k, v))
    if Tp != T:
        pad = ((0, 0), (0, Tp - T), (0, 0))
        qb, kb, vb = (jnp.pad(t, pad) for t in (qb, kb, vb))

    out = pl.pallas_call(
        functools.partial(_flash_attn_kernel, scale=scale, tq=blk, tk=blk),
        out_shape=jax.ShapeDtypeStruct((BH, Tp, dk), jnp.float32),
        grid=(BH, Tp // blk, Tp // blk),
        in_specs=[
            pl.BlockSpec((1, blk, dk), lambda b, i, j: (b, i, 0)),
            pl.BlockSpec((1, blk, dk), lambda b, i, j: (b, j, 0)),
            pl.BlockSpec((1, blk, dk), lambda b, i, j: (b, j, 0)),
        ],
        out_specs=pl.BlockSpec((1, blk, dk), lambda b, i, j: (b, i, 0)),
        scratch_shapes=[pltpu.VMEM((blk, 1), jnp.float32),
                        pltpu.VMEM((blk, 1), jnp.float32),
                        pltpu.VMEM((blk, dk), jnp.float32)],
        compiler_params=pltpu.CompilerParams(
            dimension_semantics=("parallel", "parallel", "arbitrary"),
            vmem_limit_bytes=_VMEM_LIMIT),
    )(qb, kb, vb)
    if Tp != T:
        out = out[:, :T, :]
    return out


# ------------------------- parameter initialization -------------------------

def _weight_scale(w, b):
    # CleanunetNetwork.weight_scaling_init: divide by sqrt(10 * std(weight))
    s = jnp.sqrt(10.0 * jnp.std(w, ddof=1))
    return w / s, b / s


def init_conv1d(key, cin, cout, k):
    kw, kb = jax.random.split(key)
    bound = 1.0 / math.sqrt(cin * k)
    w = jax.random.uniform(kw, (cout, cin, k), jnp.float32, -bound, bound)
    b = jax.random.uniform(kb, (cout,), jnp.float32, -bound, bound)
    return _weight_scale(w, b)


def init_convtranspose1d(key, cin, cout, k):
    kw, kb = jax.random.split(key)
    bound = 1.0 / math.sqrt(cout * k)
    w = jax.random.uniform(kw, (cin, cout, k), jnp.float32, -bound, bound)
    b = jax.random.uniform(kb, (cout,), jnp.float32, -bound, bound)
    return _weight_scale(w, b)


def init_linear(key, din, dout, bias=True):
    kw, kb = jax.random.split(key)
    bound = 1.0 / math.sqrt(din)
    w = jax.random.uniform(kw, (din, dout), jnp.float32, -bound, bound)  # [in, out]
    if not bias:
        return w
    b = jax.random.uniform(kb, (dout,), jnp.float32, -bound, bound)
    return w, b


def init_params(key, cfg):
    ki = iter(jax.random.split(key, 512))
    ci, co = cfg["channels_input"], cfg["channels_output"]
    ch, maxh = cfg["channels_H"], cfg["max_H"]
    K = cfg["kernel_size"]
    enc, dec = [], []
    for i in range(cfg["encoder_n_layers"]):
        cw, cb = init_conv1d(next(ki), ci, ch, K)          # [Ch, Cin, K]
        gw, gb = init_conv1d(next(ki), ch, 2 * ch, 1)      # [2Ch, Ch, 1]
        enc.append({
            "conv_w": cw.reshape(ch, ci * K).T,            # [Cin*K, Ch]
            "conv_b": cb,
            "glu_wa": gw[:ch, :, 0].T, "glu_ba": gb[:ch],
            "glu_wb": gw[ch:, :, 0].T, "glu_bb": gb[ch:],
        })
        ci = ch
        dgw, dgb = init_conv1d(next(ki), ch, 2 * ch, 1)
        tw, tb = init_convtranspose1d(next(ki), ch, co, K)  # [C, Cout, K]
        dec.insert(0, {
            "glu_wa": dgw[:ch, :, 0].T, "glu_ba": dgb[:ch],
            "glu_wb": dgw[ch:, :, 0].T, "glu_bb": dgb[ch:],
            "tconv_w": tw.reshape(ch, co * K),              # [C, Cout*K]
            "tconv_b": tb,
        })
        co = ch
        ch = min(ch * 2, maxh)

    dm, di = cfg["tsfm_d_model"], cfg["tsfm_d_inner"]
    H = cfg["tsfm_n_head"]
    dk = dm // H
    c1w, c1b = init_conv1d(next(ki), co, dm, 1)
    c2w, c2b = init_conv1d(next(ki), dm, co, 1)
    layers = []
    for _ in range(cfg["tsfm_n_layers"]):
        wq = init_linear(next(ki), dm, H * dk, bias=False)
        wk = init_linear(next(ki), dm, H * dk, bias=False)
        wv = init_linear(next(ki), dm, H * dk, bias=False)
        wo = init_linear(next(ki), H * dk, dm, bias=False)
        w1, b1 = init_linear(next(ki), dm, di)
        w2, b2 = init_linear(next(ki), di, dm)
        layers.append({
            "wqkv": jnp.concatenate([wq, wk, wv], axis=1),  # fused QKV [Dm, 3Dm]
            "wo": wo,
            "ln1_g": jnp.ones((dm,), jnp.float32), "ln1_b": jnp.zeros((dm,), jnp.float32),
            "w1": w1, "b1": b1, "w2": w2, "b2": b2,
            "ln2_g": jnp.ones((dm,), jnp.float32), "ln2_b": jnp.zeros((dm,), jnp.float32),
        })
    tsfm = {"ln_g": jnp.ones((dm,), jnp.float32), "ln_b": jnp.zeros((dm,), jnp.float32),
            "layers": layers}
    return {"encoder": enc, "decoder": dec,
            "conv1_w": c1w[:, :, 0].T, "conv1_b": c1b,
            "conv2_w": c2w[:, :, 0].T, "conv2_b": c2b,
            "tsfm": tsfm}


# ------------------------------- model blocks -------------------------------

def padded_length(L, D, K, S):
    for _ in range(D):
        L = 1 if L < K else 1 + math.ceil((L - K) / S)
    for _ in range(D):
        L = (L - 1) * S + K
    return int(L)


def conv1x1(x, w, b, act="none"):
    # x: [B, Cin, T]; w: [Cin, Cout]; b: [Cout]
    B, Cin, T = x.shape
    Cout = w.shape[1]
    xf = x.transpose(0, 2, 1).reshape(B * T, Cin)
    y = matmul_bias_act(xf, w, b, act=act)
    return y.reshape(B, T, Cout).transpose(0, 2, 1)


def encoder_block(x, p, K, S):
    # Conv1d(Cin, Ch, K, S) -> ReLU -> Conv1d(Ch, 2Ch, 1) -> GLU(dim=channels)
    B, Cin, Lin = x.shape
    Ch = p["conv_w"].shape[1]
    Lout = (Lin - K) // S + 1
    if K % S == 0:
        # frame-based im2col: contiguous slices only (no strided gather).
        m = K // S
        n_frames = Lout + m - 1
        xt = x[:, :, : n_frames * S].reshape(B, Cin, n_frames, S)
        pg = jnp.stack([xt[:, :, j:j + Lout, :] for j in range(m)], axis=3)
        patches = pg.transpose(0, 2, 1, 3, 4).reshape(B * Lout, Cin * K)
    else:
        cols = [x[:, :, k: k + S * (Lout - 1) + 1: S] for k in range(K)]
        patches = jnp.stack(cols, axis=3).transpose(0, 2, 1, 3).reshape(B * Lout, Cin * K)
    y = matmul_bias_act(patches, p["conv_w"], p["conv_b"], act="relu")   # [B*Lout, Ch]
    z = matmul_glu(y, p["glu_wa"], p["glu_ba"], p["glu_wb"], p["glu_bb"])
    return z.reshape(B, Lout, Ch).transpose(0, 2, 1)


def decoder_block(x, p, K, S, final):
    # Conv1d(C, 2C, 1) -> GLU -> ConvTranspose1d(C, Cout, K, S) [-> ReLU unless final]
    B, C, T = x.shape
    xf = x.transpose(0, 2, 1).reshape(B * T, C)
    z = matmul_glu(xf, p["glu_wa"], p["glu_ba"], p["glu_wb"], p["glu_bb"])  # [B*T, C]
    wt, bt = p["tconv_w"], p["tconv_b"]                                     # [C, Cout*K], [Cout]
    Cout = wt.shape[1] // K
    zz = matmul_bias_act(z, wt)                    # no zero-bias DMA; bias added below
    zz = zz.reshape(B, T, Cout, K)
    Lout = (T - 1) * S + K
    if K % S == 0:
        # fused overlap-add: m contiguous pads + adds instead of K strided scatters
        m = K // S
        zr = zz.reshape(B, T, Cout, m, S).transpose(0, 2, 1, 3, 4)  # [B,Cout,T,m,S]
        out = sum(jnp.pad(zr[:, :, :, j, :], ((0, 0), (0, 0), (j, m - 1 - j), (0, 0)))
                  for j in range(m)).reshape(B, Cout, Lout)
    else:
        out = jnp.zeros((B, Cout, Lout), zz.dtype)
        for k in range(K):
            out = out.at[:, :, k: k + S * (T - 1) + 1: S].add(
                zz[:, :, :, k].transpose(0, 2, 1))
    out = out + bt[None, :, None]
    if not final:
        out = jnp.maximum(out, 0.0)
    return out


def transformer_encoder(x, p, n_head):
    # CleanunetTransformerEncoder: n_position=0 (identity pos-enc), dropout=0,
    # input LayerNorm, post-LN encoder layers (causal MHA + FFN).
    B, T, Dm = x.shape
    dk = Dm // n_head
    xf = layernorm(x.reshape(B * T, Dm), p["ln_g"], p["ln_b"])
    for lyr in p["layers"]:
        # --- multi-head causal self attention (fused QKV projection) ---
        res = xf
        qkv = matmul_bias_act(xf, lyr["wqkv"])             # [B*T, 3*Dm], no bias
        q, k, v = jnp.split(qkv, 3, axis=-1)

        def split_heads(t):
            return t.reshape(B, T, n_head, dk).transpose(0, 2, 1, 3).reshape(B * n_head, T, dk)

        o = causal_attention(split_heads(q), split_heads(k), split_heads(v),
                             1.0 / math.sqrt(dk))
        o = o.reshape(B, n_head, T, dk).transpose(0, 2, 1, 3).reshape(B * T, n_head * dk)
        o = matmul_bias_act(o, lyr["wo"])                  # no bias
        xf = layernorm(o, lyr["ln1_g"], lyr["ln1_b"], residual=res)   # LN(res + attn)
        # --- position-wise feed forward ---
        res = xf
        h = matmul_bias_act(xf, lyr["w1"], lyr["b1"], act="relu")
        y = matmul_bias_act(h, lyr["w2"], lyr["b2"])
        xf = layernorm(y, lyr["ln2_g"], lyr["ln2_b"], residual=res)   # LN(res + ffn)
    return xf.reshape(B, T, Dm)


def cleanunet_forward(params, cfg, noisy_audio):
    if noisy_audio.ndim == 2:
        noisy_audio = noisy_audio[:, None, :]
    B, C, L = noisy_audio.shape
    K, S, D = cfg["kernel_size"], cfg["stride"], cfg["encoder_n_layers"]

    std = jnp.std(noisy_audio, axis=2, keepdims=True, ddof=1)   # torch.std is unbiased
    std = jnp.mean(std, axis=1, keepdims=True) + 1e-3
    x = noisy_audio / std

    Lp = padded_length(L, D, K, S)
    x = jnp.pad(x, ((0, 0), (0, 0), (0, Lp - L)))

    skips = []
    for p in params["encoder"]:
        x = encoder_block(x, p, K, S)
        skips.append(x)
    skips = skips[::-1]

    # transformer bottleneck
    x = conv1x1(x, params["conv1_w"], params["conv1_b"])
    h = jnp.transpose(x, (0, 2, 1))
    h = transformer_encoder(h, params["tsfm"], cfg["tsfm_n_head"])
    x = jnp.transpose(h, (0, 2, 1))
    x = conv1x1(x, params["conv2_w"], params["conv2_b"])

    n_dec = len(params["decoder"])
    for i, p in enumerate(params["decoder"]):
        skip = skips[i]
        x = x + skip[:, :, : x.shape[-1]]
        x = decoder_block(x, p, K, S, final=(i == n_dec - 1))

    x = x[:, :, :L] * std
    return x


# ----------------------------------- main -----------------------------------

if __name__ == "__main__":
    # Small config consistent with the module's constructor (scaled-down defaults).
    cfg = dict(channels_input=1, channels_output=1, channels_H=8, max_H=16,
               encoder_n_layers=3, kernel_size=4, stride=2,
               tsfm_n_layers=2, tsfm_n_head=4, tsfm_d_model=32, tsfm_d_inner=64)
    root = jax.random.PRNGKey(0)
    kp, kx = jax.random.split(root)
    params = init_params(kp, cfg)
    noisy = jax.random.normal(kx, (2, 1, 61), jnp.float32)   # (B, C, L)

    fwd = jax.jit(lambda p, a: cleanunet_forward(p, cfg, a))
    out = jax.block_until_ready(fwd(params, noisy))

    assert out.shape == (2, 1, 61), out.shape
    assert bool(jnp.all(jnp.isfinite(out)))
    print("KERNEL_OK")
</pallas_src>

<mosaic_0001>
module attributes {stable_mosaic.version = 11 : i64} {
  func.func @_matmul_kernel(%arg0: i32, %arg1: i32, %arg2: i32, %arg3: memref<64x4xbf16, #tpu.memory_space<vmem>>, %arg4: memref<4x8xbf16, #tpu.memory_space<vmem>>, %arg5: memref<1x8xf32, #tpu.memory_space<vmem>>, %arg6: memref<64x8xf32, #tpu.memory_space<vmem>>, %arg7: memref<64x8xf32, #tpu.memory_space<vmem>>) attributes {dimension_semantics = [#tpu.dimension_semantics<parallel>, #tpu.dimension_semantics<parallel>, #tpu.dimension_semantics<arbitrary>], iteration_bounds = array<i64: 1, 1, 1>, scalar_prefetch = 0 : i64, scratch_operands = 1 : i64, tpu.core_type = #tpu.core_type<tc>, window_params = [{transform_indices = @transform_0, window_bounds = array<i64: 64, 4>}, {transform_indices = @transform_1, window_bounds = array<i64: 4, 8>}, {transform_indices = @transform_2, window_bounds = array<i64: 1, 8>}, {transform_indices = @transform_3, window_bounds = array<i64: 64, 8>}]} {
    %c0_i32 = arith.constant 0 : i32
    %0 = arith.cmpi eq, %arg2, %c0_i32 : i32
    %1 = arith.extui %0 : i1 to i32
    %c0_i32_0 = arith.constant 0 : i32
    %2 = arith.cmpi ne, %1, %c0_i32_0 : i32
    scf.if %2 {
      %cst_10 = arith.constant 0.000000e+00 : f32
      %12 = vector.broadcast %cst_10 : f32 to vector<64x8xf32>
      %c0_11 = arith.constant 0 : index
      %c0_12 = arith.constant 0 : index
      %13 = vector.load %arg7[%c0_11, %c0_12] : memref<64x8xf32, #tpu.memory_space<vmem>>, vector<64x8xf32>
      tpu.vector_store %arg7[%c0_11, %c0_12], %12 {strides = array<i32>} : memref<64x8xf32, #tpu.memory_space<vmem>>, vector<64x8xf32>,
    } else {
    }
    %c0 = arith.constant 0 : index
    %c0_1 = arith.constant 0 : index
    %3 = vector.load %arg7[%c0, %c0_1] : memref<64x8xf32, #tpu.memory_space<vmem>>, vector<64x8xf32>
    %c0_2 = arith.constant 0 : index
    %c0_3 = arith.constant 0 : index
    %4 = vector.load %arg3[%c0_2, %c0_3] : memref<64x4xbf16, #tpu.memory_space<vmem>>, vector<64x4xbf16>
    %c0_4 = arith.constant 0 : index
    %c0_5 = arith.constant 0 : index
    %5 = vector.load %arg4[%c0_4, %c0_5] : memref<4x8xbf16, #tpu.memory_space<vmem>>, vector<4x8xbf16>
    %cst = arith.constant dense<0.000000e+00> : vector<64x8xf32>
    %6 = tpu.matmul %4, %5, %cst {dimension_numbers = #tpu.dot_dimension_numbers<[1], [0], [0], [1], [0, 0, 1, 1], [], []>} : vector<64x4xbf16>, vector<4x8xbf16>, vector<64x8xf32> -> vector<64x8xf32>
    %7 = arith.addf %3, %6 : vector<64x8xf32>
    %c0_6 = arith.constant 0 : index
    %c0_7 = arith.constant 0 : index
    %8 = vector.load %arg7[%c0_6, %c0_7] : memref<64x8xf32, #tpu.memory_space<vmem>>, vector<64x8xf32>
    tpu.vector_store %arg7[%c0_6, %c0_7], %7 {strides = array<i32>} : memref<64x8xf32, #tpu.memory_space<vmem>>, vector<64x8xf32>,
    %c0_i32_8 = arith.constant 0 : i32
    %9 = arith.cmpi eq, %arg2, %c0_i32_8 : i32
    %10 = arith.extui %9 : i1 to i32
    %c0_i32_9 = arith.constant 0 : i32
    %11 = arith.cmpi ne, %10, %c0_i32_9 : i32
    scf.if %11 {
      %c0_10 = arith.constant 0 : index
      %c0_11 = arith.constant 0 : index
      %12 = vector.load %arg7[%c0_10, %c0_11] : memref<64x8xf32, #tpu.memory_space<vmem>>, vector<64x8xf32>
      %c0_12 = arith.constant 0 : index
      %c0_13 = arith.constant 0 : index
      %13 = vector.load %arg5[%c0_12, %c0_13] : memref<1x8xf32, #tpu.memory_space<vmem>>, vector<1x8xf32>
      %14 = vector.broadcast %13 : vector<1x8xf32> to vector<64x8xf32>
      %15 = arith.addf %12, %14 : vector<64x8xf32>
      %cst_14 = arith.constant 0.000000e+00 : f32
      %16 = vector.broadcast %cst_14 : f32 to vector<64x8xf32>
      %17 = arith.maximumf %15, %16 : vector<64x8xf32>
      %c0_15 = arith.constant 0 : index
      %c0_16 = arith.constant 0 : index
      %18 = vector.load %arg6[%c0_15, %c0_16] : memref<64x8xf32, #tpu.memory_space<vmem>>, vector<64x8xf32>
      tpu.vector_store %arg6[%c0_15, %c0_16], %17 {strides = array<i32>} : memref<64x8xf32, #tpu.memory_space<vmem>>, vector<64x8xf32>,
    } else {
    }
    return
  }
  func.func @transform_0(%arg0: i32, %arg1: i32, %arg2: i32) -> (i32, i32) {
    %c0_i32 = arith.constant 0 : i32
    return %arg0, %arg2 : i32, i32
  }
  func.func @transform_1(%arg0: i32, %arg1: i32, %arg2: i32) -> (i32, i32) {
    %c0_i32 = arith.constant 0 : i32
    return %arg2, %arg1 : i32, i32
  }
  func.func @transform_2(%arg0: i32, %arg1: i32, %arg2: i32) -> (i32, i32) {
    %c0_i32 = arith.constant 0 : i32
    %c0_i32_0 = arith.constant 0 : i32
    return %c0_i32, %arg1 : i32, i32
  }
  func.func @transform_3(%arg0: i32, %arg1: i32, %arg2: i32) -> (i32, i32) {
    %c0_i32 = arith.constant 0 : i32
    return %arg0, %arg1 : i32, i32
  }
}

module attributes {stable_mosaic.version = 11 : i64} {
  func.func @_glu_kernel(%arg0: i32, %arg1: i32, %arg2: memref<64x8xbf16, #tpu.memory_space<vmem>>, %arg3: memref<8x8xbf16, #tpu.memory_space<vmem>>, %arg4: memref<8x8xbf16, #tpu.memory_space<vmem>>, %arg5: memref<1x8xf32, #tpu.memory_space<vmem>>, %arg6: memref<1x8xf32, #tpu.memory_space<vmem>>, %arg7: memref<64x8xf32, #tpu.memory_space<vmem>>, %arg8: memref<64x8xf32, #tpu.memory_space<vmem>>, %arg9: memref<64x8xf32, #tpu.memory_space<vmem>>) attributes {dimension_semantics = [#tpu.dimension_semantics<parallel>, #tpu.dimension_semantics<arbitrary>], iteration_bounds = array<i64: 1, 1>, scalar_prefetch = 0 : i64, scratch_operands = 2 : i64, tpu.core_type = #tpu.core_type<tc>, window_params = [{transform_indices = @transform_0, window_bounds = array<i64: 64, 8>}, {transform_indices = @transform_1, window_bounds = array<i64: 8, 8>}, {transform_indices = @transform_2, window_bounds = array<i64: 8, 8>}, {pipeline_mode = #tpu.pipeline_mode<synchronous>, transform_indices = @transform_3, window_bounds = array<i64: 1, 8>}, {pipeline_mode = #tpu.pipeline_mode<synchronous>, transform_indices = @transform_4, window_bounds = array<i64: 1, 8>}, {transform_indices = @transform_5, window_bounds = array<i64: 64, 8>}]} {
    %c0_i32 = arith.constant 0 : i32
    %0 = arith.cmpi eq, %arg1, %c0_i32 : i32
    %1 = arith.extui %0 : i1 to i32
    %c0_i32_0 = arith.constant 0 : i32
    %2 = arith.cmpi ne, %1, %c0_i32_0 : i32
    scf.if %2 {
      %cst_17 = arith.constant 0.000000e+00 : f32
      %17 = vector.broadcast %cst_17 : f32 to vector<64x8xf32>
      %c0_18 = arith.constant 0 : index
      %c0_19 = arith.constant 0 : index
      %18 = vector.load %arg8[%c0_18, %c0_19] : memref<64x8xf32, #tpu.memory_space<vmem>>, vector<64x8xf32>
      tpu.vector_store %arg8[%c0_18, %c0_19], %17 {strides = array<i32>} : memref<64x8xf32, #tpu.memory_space<vmem>>, vector<64x8xf32>,
      %cst_20 = arith.constant 0.000000e+00 : f32
      %19 = vector.broadcast %cst_20 : f32 to vector<64x8xf32>
      %c0_21 = arith.constant 0 : index
      %c0_22 = arith.constant 0 : index
      %20 = vector.load %arg9[%c0_21, %c0_22] : memref<64x8xf32, #tpu.memory_space<vmem>>, vector<64x8xf32>
      tpu.vector_store %arg9[%c0_21, %c0_22], %19 {strides = array<i32>} : memref<64x8xf32, #tpu.memory_space<vmem>>, vector<64x8xf32>,
    } else {
    }
    %c0 = arith.constant 0 : index
    %c0_1 = arith.constant 0 : index
    %3 = vector.load %arg2[%c0, %c0_1] : memref<64x8xbf16, #tpu.memory_space<vmem>>, vector<64x8xbf16>
    %c0_2 = arith.constant 0 : index
    %c0_3 = arith.constant 0 : index
    %4 = vector.load %arg8[%c0_2, %c0_3] : memref<64x8xf32, #tpu.memory_space<vmem>>, vector<64x8xf32>
    %c0_4 = arith.constant 0 : index
    %c0_5 = arith.constant 0 : index
    %5 = vector.load %arg3[%c0_4, %c0_5] : memref<8x8xbf16, #tpu.memory_space<vmem>>, vector<8x8xbf16>
    %cst = arith.constant dense<0.000000e+00> : vector<64x8xf32>
    %6 = tpu.matmul %3, %5, %cst {dimension_numbers = #tpu.dot_dimension_numbers<[1], [0], [0], [1], [0, 0, 1, 1], [], []>} : vector<64x8xbf16>, vector<8x8xbf16>, vector<64x8xf32> -> vector<64x8xf32>
    %7 = arith.addf %4, %6 : vector<64x8xf32>
    %c0_6 = arith.constant 0 : index
    %c0_7 = arith.constant 0 : index
    %8 = vector.load %arg8[%c0_6, %c0_7] : memref<64x8xf32, #tpu.memory_space<vmem>>, vector<64x8xf32>
    tpu.vector_store %arg8[%c0_6, %c0_7], %7 {strides = array<i32>} : memref<64x8xf32, #tpu.memory_space<vmem>>, vector<64x8xf32>,
    %c0_8 = arith.constant 0 : index
    %c0_9 = arith.constant 0 : index
    %9 = vector.load %arg9[%c0_8, %c0_9] : memref<64x8xf32, #tpu.memory_space<vmem>>, vector<64x8xf32>
    %c0_10 = arith.constant 0 : index
    %c0_11 = arith.constant 0 : index
    %10 = vector.load %arg4[%c0_10, %c0_11] : memref<8x8xbf16, #tpu.memory_space<vmem>>, vector<8x8xbf16>
    %cst_12 = arith.constant dense<0.000000e+00> : vector<64x8xf32>
    %11 = tpu.matmul %3, %10, %cst_12 {dimension_numbers = #tpu.dot_dimension_numbers<[1], [0], [0], [1], [0, 0, 1, 1], [], []>} : vector<64x8xbf16>, vector<8x8xbf16>, vector<64x8xf32> -> vector<64x8xf32>
    %12 = arith.addf %9, %11 : vector<64x8xf32>
    %c0_13 = arith.constant 0 : index
    %c0_14 = arith.constant 0 : index
    %13 = vector.load %arg9[%c0_13, %c0_14] : memref<64x8xf32, #tpu.memory_space<vmem>>, vector<64x8xf32>
    tpu.vector_store %arg9[%c0_13, %c0_14], %12 {strides = array<i32>} : memref<64x8xf32, #tpu.memory_space<vmem>>, vector<64x8xf32>,
    %c0_i32_15 = arith.constant 0 : i32
    %14 = arith.cmpi eq, %arg1, %c0_i32_15 : i32
    %15 = arith.extui %14 : i1 to i32
    %c0_i32_16 = arith.constant 0 : i32
    %16 = arith.cmpi ne, %15, %c0_i32_16 : i32
    scf.if %16 {
      %c0_17 = arith.constant 0 : index
      %c0_18 = arith.constant 0 : index
      %17 = vector.load %arg8[%c0_17, %c0_18] : memref<64x8xf32, #tpu.memory_space<vmem>>, vector<64x8xf32>
      %c0_19 = arith.constant 0 : index
      %c0_20 = arith.constant 0 : index
      %18 = vector.load %arg5[%c0_19, %c0_20] : memref<1x8xf32, #tpu.memory_space<vmem>>, vector<1x8xf32>
      %19 = vector.broadcast %18 : vector<1x8xf32> to vector<64x8xf32>
      %20 = arith.addf %17, %19 : vector<64x8xf32>
      %c0_21 = arith.constant 0 : index
      %c0_22 = arith.constant 0 : index
      %21 = vector.load %arg9[%c0_21, %c0_22] : memref<64x8xf32, #tpu.memory_space<vmem>>, vector<64x8xf32>
      %c0_23 = arith.constant 0 : index
      %c0_24 = arith.constant 0 : index
      %22 = vector.load %arg6[%c0_23, %c0_24] : memref<1x8xf32, #tpu.memory_space<vmem>>, vector<1x8xf32>
      %23 = vector.broadcast %22 : vector<1x8xf32> to vector<64x8xf32>
      %24 = arith.addf %21, %23 : vector<64x8xf32>
      %25 = arith.negf %24 : vector<64x8xf32>
      %26 = math.exp %25 : vector<64x8xf32>
      %cst_25 = arith.constant 1.000000e+00 : f32
      %27 = vector.broadcast %cst_25 : f32 to vector<64x8xf32>
      %28 = arith.addf %27, %26 : vector<64x8xf32>
      %29 = arith.divf %27, %28 : vector<64x8xf32>
      %30 = arith.mulf %20, %29 : vector<64x8xf32>
      %c0_26 = arith.constant 0 : index
      %c0_27 = arith.constant 0 : index
      %31 = vector.load %arg7[%c0_26, %c0_27] : memref<64x8xf32, #tpu.memory_space<vmem>>, vector<64x8xf32>
      tpu.vector_store %arg7[%c0_26, %c0_27], %30 {strides = array<i32>} : memref<64x8xf32, #tpu.memory_space<vmem>>, vector<64x8xf32>,
    } else {
    }
    return
  }
  func.func @transform_0(%arg0: i32, %arg1: i32) -> (i32, i32) {
    %c0_i32 = arith.constant 0 : i32
    return %arg0, %arg1 : i32, i32
  }
  func.func @transform_1(%arg0: i32, %arg1: i32) -> (i32, i32) {
    %c0_i32 = arith.constant 0 : i32
    %c0_i32_0 = arith.constant 0 : i32
    return %arg1, %c0_i32 : i32, i32
  }
  func.func @transform_2(%arg0: i32, %arg1: i32) -> (i32, i32) {
    %c0_i32 = arith.constant 0 : i32
    %c0_i32_0 = arith.constant 0 : i32
    return %arg1, %c0_i32 : i32, i32
  }
  func.func @transform_3(%arg0: i32, %arg1: i32) -> (i32, i32) {
    %c0_i32 = arith.constant 0 : i32
    %c0_i32_0 = arith.constant 0 : i32
    %c0_i32_1 = arith.constant 0 : i32
    return %c0_i32, %c0_i32_0 : i32, i32
  }
  func.func @transform_4(%arg0: i32, %arg1: i32) -> (i32, i32) {
    %c0_i32 = arith.constant 0 : i32
    %c0_i32_0 = arith.constant 0 : i32
    %c0_i32_1 = arith.constant 0 : i32
    return %c0_i32, %c0_i32_0 : i32, i32
  }
  func.func @transform_5(%arg0: i32, %arg1: i32) -> (i32, i32) {
    %c0_i32 = arith.constant 0 : i32
    %c0_i32_0 = arith.constant 0 : i32
    return %arg0, %c0_i32 : i32, i32
  }
}

module attributes {stable_mosaic.version = 11 : i64} {
  func.func @_matmul_kernel(%arg0: i32, %arg1: i32, %arg2: i32, %arg3: memref<32x32xbf16, #tpu.memory_space<vmem>>, %arg4: memref<32x16xbf16, #tpu.memory_space<vmem>>, %arg5: memref<1x16xf32, #tpu.memory_space<vmem>>, %arg6: memref<32x16xf32, #tpu.memory_space<vmem>>, %arg7: memref<32x16xf32, #tpu.memory_space<vmem>>) attributes {dimension_semantics = [#tpu.dimension_semantics<parallel>, #tpu.dimension_semantics<parallel>, #tpu.dimension_semantics<arbitrary>], iteration_bounds = array<i64: 1, 1, 1>, scalar_prefetch = 0 : i64, scratch_operands = 1 : i64, tpu.core_type = #tpu.core_type<tc>, window_params = [{transform_indices = @transform_0, window_bounds = array<i64: 32, 32>}, {transform_indices = @transform_1, window_bounds = array<i64: 32, 16>}, {transform_indices = @transform_2, window_bounds = array<i64: 1, 16>}, {transform_indices = @transform_3, window_bounds = array<i64: 32, 16>}]} {
    %c0_i32 = arith.constant 0 : i32
    %0 = arith.cmpi eq, %arg2, %c0_i32 : i32
    %1 = arith.extui %0 : i1 to i32
    %c0_i32_0 = arith.constant 0 : i32
    %2 = arith.cmpi ne, %1, %c0_i32_0 : i32
    scf.if %2 {
      %cst_10 = arith.constant 0.000000e+00 : f32
      %12 = vector.broadcast %cst_10 : f32 to vector<32x16xf32>
      %c0_11 = arith.constant 0 : index
      %c0_12 = arith.constant 0 : index
      %13 = vector.load %arg7[%c0_11, %c0_12] : memref<32x16xf32, #tpu.memory_space<vmem>>, vector<32x16xf32>
      tpu.vector_store %arg7[%c0_11, %c0_12], %12 {strides = array<i32>} : memref<32x16xf32, #tpu.memory_space<vmem>>, vector<32x16xf32>,
    } else {
    }
    %c0 = arith.constant 0 : index
    %c0_1 = arith.constant 0 : index
    %3 = vector.load %arg7[%c0, %c0_1] : memref<32x16xf32, #tpu.memory_space<vmem>>, vector<32x16xf32>
    %c0_2 = arith.constant 0 : index
    %c0_3 = arith.constant 0 : index
    %4 = vector.load %arg3[%c0_2, %c0_3] : memref<32x32xbf16, #tpu.memory_space<vmem>>, vector<32x32xbf16>
    %c0_4 = arith.constant 0 : index
    %c0_5 = arith.constant 0 : index
    %5 = vector.load %arg4[%c0_4, %c0_5] : memref<32x16xbf16, #tpu.memory_space<vmem>>, vector<32x16xbf16>
    %cst = arith.constant dense<0.000000e+00> : vector<32x16xf32>
    %6 = tpu.matmul %4, %5, %cst {dimension_numbers = #tpu.dot_dimension_numbers<[1], [0], [0], [1], [0, 0, 1, 1], [], []>} : vector<32x32xbf16>, vector<32x16xbf16>, vector<32x16xf32> -> vector<32x16xf32>
    %7 = arith.addf %3, %6 : vector<32x16xf32>
    %c0_6 = arith.constant 0 : index
    %c0_7 = arith.constant 0 : index
    %8 = vector.load %arg7[%c0_6, %c0_7] : memref<32x16xf32, #tpu.memory_space<vmem>>, vector<32x16xf32>
    tpu.vector_store %arg7[%c0_6, %c0_7], %7 {strides = array<i32>} : memref<32x16xf32, #tpu.memory_space<vmem>>, vector<32x16xf32>,
    %c0_i32_8 = arith.constant 0 : i32
    %9 = arith.cmpi eq, %arg2, %c0_i32_8 : i32
    %10 = arith.extui %9 : i1 to i32
    %c0_i32_9 = arith.constant 0 : i32
    %11 = arith.cmpi ne, %10, %c0_i32_9 : i32
    scf.if %11 {
      %c0_10 = arith.constant 0 : index
      %c0_11 = arith.constant 0 : index
      %12 = vector.load %arg7[%c0_10, %c0_11] : memref<32x16xf32, #tpu.memory_space<vmem>>, vector<32x16xf32>
      %c0_12 = arith.constant 0 : index
      %c0_13 = arith.constant 0 : index
      %13 = vector.load %arg5[%c0_12, %c0_13] : memref<1x16xf32, #tpu.memory_space<vmem>>, vector<1x16xf32>
      %14 = vector.broadcast %13 : vector<1x16xf32> to vector<32x16xf32>
      %15 = arith.addf %12, %14 : vector<32x16xf32>
      %cst_14 = arith.constant 0.000000e+00 : f32
      %16 = vector.broadcast %cst_14 : f32 to vector<32x16xf32>
      %17 = arith.maximumf %15, %16 : vector<32x16xf32>
      %c0_15 = arith.constant 0 : index
      %c0_16 = arith.constant 0 : index
      %18 = vector.load %arg6[%c0_15, %c0_16] : memref<32x16xf32, #tpu.memory_space<vmem>>, vector<32x16xf32>
      tpu.vector_store %arg6[%c0_15, %c0_16], %17 {strides = array<i32>} : memref<32x16xf32, #tpu.memory_space<vmem>>, vector<32x16xf32>,
    } else {
    }
    return
  }
  func.func @transform_0(%arg0: i32, %arg1: i32, %arg2: i32) -> (i32, i32) {
    %c0_i32 = arith.constant 0 : i32
    return %arg0, %arg2 : i32, i32
  }
  func.func @transform_1(%arg0: i32, %arg1: i32, %arg2: i32) -> (i32, i32) {
    %c0_i32 = arith.constant 0 : i32
    return %arg2, %arg1 : i32, i32
  }
  func.func @transform_2(%arg0: i32, %arg1: i32, %arg2: i32) -> (i32, i32) {
    %c0_i32 = arith.constant 0 : i32
    %c0_i32_0 = arith.constant 0 : i32
    return %c0_i32, %arg1 : i32, i32
  }
  func.func @transform_3(%arg0: i32, %arg1: i32, %arg2: i32) -> (i32, i32) {
    %c0_i32 = arith.constant 0 : i32
    return %arg0, %arg1 : i32, i32
  }
}

module attributes {stable_mosaic.version = 11 : i64} {
  func.func @_glu_kernel(%arg0: i32, %arg1: i32, %arg2: memref<32x16xbf16, #tpu.memory_space<vmem>>, %arg3: memref<16x16xbf16, #tpu.memory_space<vmem>>, %arg4: memref<16x16xbf16, #tpu.memory_space<vmem>>, %arg5: memref<1x16xf32, #tpu.memory_space<vmem>>, %arg6: memref<1x16xf32, #tpu.memory_space<vmem>>, %arg7: memref<32x16xf32, #tpu.memory_space<vmem>>, %arg8: memref<32x16xf32, #tpu.memory_space<vmem>>, %arg9: memref<32x16xf32, #tpu.memory_space<vmem>>) attributes {dimension_semantics = [#tpu.dimension_semantics<parallel>, #tpu.dimension_semantics<arbitrary>], iteration_bounds = array<i64: 1, 1>, scalar_prefetch = 0 : i64, scratch_operands = 2 : i64, tpu.core_type = #tpu.core_type<tc>, window_params = [{transform_indices = @transform_0, window_bounds = array<i64: 32, 16>}, {transform_indices = @transform_1, window_bounds = array<i64: 16, 16>}, {transform_indices = @transform_2, window_bounds = array<i64: 16, 16>}, {pipeline_mode = #tpu.pipeline_mode<synchronous>, transform_indices = @transform_3, window_bounds = array<i64: 1, 16>}, {pipeline_mode = #tpu.pipeline_mode<synchronous>, transform_indices = @transform_4, window_bounds = array<i64: 1, 16>}, {transform_indices = @transform_5, window_bounds = array<i64: 32, 16>}]} {
    %c0_i32 = arith.constant 0 : i32
    %0 = arith.cmpi eq, %arg1, %c0_i32 : i32
    %1 = arith.extui %0 : i1 to i32
    %c0_i32_0 = arith.constant 0 : i32
    %2 = arith.cmpi ne, %1, %c0_i32_0 : i32
    scf.if %2 {
      %cst_17 = arith.constant 0.000000e+00 : f32
      %17 = vector.broadcast %cst_17 : f32 to vector<32x16xf32>
      %c0_18 = arith.constant 0 : index
      %c0_19 = arith.constant 0 : index
      %18 = vector.load %arg8[%c0_18, %c0_19] : memref<32x16xf32, #tpu.memory_space<vmem>>, vector<32x16xf32>
      tpu.vector_store %arg8[%c0_18, %c0_19], %17 {strides = array<i32>} : memref<32x16xf32, #tpu.memory_space<vmem>>, vector<32x16xf32>,
      %cst_20 = arith.constant 0.000000e+00 : f32
      %19 = vector.broadcast %cst_20 : f32 to vector<32x16xf32>
      %c0_21 = arith.constant 0 : index
      %c0_22 = arith.constant 0 : index
      %20 = vector.load %arg9[%c0_21, %c0_22] : memref<32x16xf32, #tpu.memory_space<vmem>>, vector<32x16xf32>
      tpu.vector_store %arg9[%c0_21, %c0_22], %19 {strides = array<i32>} : memref<32x16xf32, #tpu.memory_space<vmem>>, vector<32x16xf32>,
    } else {
    }
    %c0 = arith.constant 0 : index
    %c0_1 = arith.constant 0 : index
    %3 = vector.load %arg2[%c0, %c0_1] : memref<32x16xbf16, #tpu.memory_space<vmem>>, vector<32x16xbf16>
    %c0_2 = arith.constant 0 : index
    %c0_3 = arith.constant 0 : index
    %4 = vector.load %arg8[%c0_2, %c0_3] : memref<32x16xf32, #tpu.memory_space<vmem>>, vector<32x16xf32>
    %c0_4 = arith.constant 0 : index
    %c0_5 = arith.constant 0 : index
    %5 = vector.load %arg3[%c0_4, %c0_5] : memref<16x16xbf16, #tpu.memory_space<vmem>>, vector<16x16xbf16>
    %cst = arith.constant dense<0.000000e+00> : vector<32x16xf32>
    %6 = tpu.matmul %3, %5, %cst {dimension_numbers = #tpu.dot_dimension_numbers<[1], [0], [0], [1], [0, 0, 1, 1], [], []>} : vector<32x16xbf16>, vector<16x16xbf16>, vector<32x16xf32> -> vector<32x16xf32>
    %7 = arith.addf %4, %6 : vector<32x16xf32>
    %c0_6 = arith.constant 0 : index
    %c0_7 = arith.constant 0 : index
    %8 = vector.load %arg8[%c0_6, %c0_7] : memref<32x16xf32, #tpu.memory_space<vmem>>, vector<32x16xf32>
    tpu.vector_store %arg8[%c0_6, %c0_7], %7 {strides = array<i32>} : memref<32x16xf32, #tpu.memory_space<vmem>>, vector<32x16xf32>,
    %c0_8 = arith.constant 0 : index
    %c0_9 = arith.constant 0 : index
    %9 = vector.load %arg9[%c0_8, %c0_9] : memref<32x16xf32, #tpu.memory_space<vmem>>, vector<32x16xf32>
    %c0_10 = arith.constant 0 : index
    %c0_11 = arith.constant 0 : index
    %10 = vector.load %arg4[%c0_10, %c0_11] : memref<16x16xbf16, #tpu.memory_space<vmem>>, vector<16x16xbf16>
    %cst_12 = arith.constant dense<0.000000e+00> : vector<32x16xf32>
    %11 = tpu.matmul %3, %10, %cst_12 {dimension_numbers = #tpu.dot_dimension_numbers<[1], [0], [0], [1], [0, 0, 1, 1], [], []>} : vector<32x16xbf16>, vector<16x16xbf16>, vector<32x16xf32> -> vector<32x16xf32>
    %12 = arith.addf %9, %11 : vector<32x16xf32>
    %c0_13 = arith.constant 0 : index
    %c0_14 = arith.constant 0 : index
    %13 = vector.load %arg9[%c0_13, %c0_14] : memref<32x16xf32, #tpu.memory_space<vmem>>, vector<32x16xf32>
    tpu.vector_store %arg9[%c0_13, %c0_14], %12 {strides = array<i32>} : memref<32x16xf32, #tpu.memory_space<vmem>>, vector<32x16xf32>,
    %c0_i32_15 = arith.constant 0 : i32
    %14 = arith.cmpi eq, %arg1, %c0_i32_15 : i32
    %15 = arith.extui %14 : i1 to i32
    %c0_i32_16 = arith.constant 0 : i32
    %16 = arith.cmpi ne, %15, %c0_i32_16 : i32
    scf.if %16 {
      %c0_17 = arith.constant 0 : index
      %c0_18 = arith.constant 0 : index
      %17 = vector.load %arg8[%c0_17, %c0_18] : memref<32x16xf32, #tpu.memory_space<vmem>>, vector<32x16xf32>
      %c0_19 = arith.constant 0 : index
      %c0_20 = arith.constant 0 : index
      %18 = vector.load %arg5[%c0_19, %c0_20] : memref<1x16xf32, #tpu.memory_space<vmem>>, vector<1x16xf32>
      %19 = vector.broadcast %18 : vector<1x16xf32> to vector<32x16xf32>
      %20 = arith.addf %17, %19 : vector<32x16xf32>
      %c0_21 = arith.constant 0 : index
      %c0_22 = arith.constant 0 : index
      %21 = vector.load %arg9[%c0_21, %c0_22] : memref<32x16xf32, #tpu.memory_space<vmem>>, vector<32x16xf32>
      %c0_23 = arith.constant 0 : index
      %c0_24 = arith.constant 0 : index
      %22 = vector.load %arg6[%c0_23, %c0_24] : memref<1x16xf32, #tpu.memory_space<vmem>>, vector<1x16xf32>
      %23 = vector.broadcast %22 : vector<1x16xf32> to vector<32x16xf32>
      %24 = arith.addf %21, %23 : vector<32x16xf32>
      %25 = arith.negf %24 : vector<32x16xf32>
      %26 = math.exp %25 : vector<32x16xf32>
      %cst_25 = arith.constant 1.000000e+00 : f32
      %27 = vector.broadcast %cst_25 : f32 to vector<32x16xf32>
      %28 = arith.addf %27, %26 : vector<32x16xf32>
      %29 = arith.divf %27, %28 : vector<32x16xf32>
      %30 = arith.mulf %20, %29 : vector<32x16xf32>
      %c0_26 = arith.constant 0 : index
      %c0_27 = arith.constant 0 : index
      %31 = vector.load %arg7[%c0_26, %c0_27] : memref<32x16xf32, #tpu.memory_space<vmem>>, vector<32x16xf32>
      tpu.vector_store %arg7[%c0_26, %c0_27], %30 {strides = array<i32>} : memref<32x16xf32, #tpu.memory_space<vmem>>, vector<32x16xf32>,
    } else {
    }
    return
  }
  func.func @transform_0(%arg0: i32, %arg1: i32) -> (i32, i32) {
    %c0_i32 = arith.constant 0 : i32
    return %arg0, %arg1 : i32, i32
  }
  func.func @transform_1(%arg0: i32, %arg1: i32) -> (i32, i32) {
    %c0_i32 = arith.constant 0 : i32
    %c0_i32_0 = arith.constant 0 : i32
    return %arg1, %c0_i32 : i32, i32
  }
  func.func @transform_2(%arg0: i32, %arg1: i32) -> (i32, i32) {
    %c0_i32 = arith.constant 0 : i32
    %c0_i32_0 = arith.constant 0 : i32
    return %arg1, %c0_i32 : i32, i32
  }
  func.func @transform_3(%arg0: i32, %arg1: i32) -> (i32, i32) {
    %c0_i32 = arith.constant 0 : i32
    %c0_i32_0 = arith.constant 0 : i32
    %c0_i32_1 = arith.constant 0 : i32
    return %c0_i32, %c0_i32_0 : i32, i32
  }
  func.func @transform_4(%arg0: i32, %arg1: i32) -> (i32, i32) {
    %c0_i32 = arith.constant 0 : i32
    %c0_i32_0 = arith.constant 0 : i32
    %c0_i32_1 = arith.constant 0 : i32
    return %c0_i32, %c0_i32_0 : i32, i32
  }
  func.func @transform_5(%arg0: i32, %arg1: i32) -> (i32, i32) {
    %c0_i32 = arith.constant 0 : i32
    %c0_i32_0 = arith.constant 0 : i32
    return %arg0, %c0_i32 : i32, i32
  }
}

module attributes {stable_mosaic.version = 11 : i64} {
  func.func @_matmul_kernel(%arg0: i32, %arg1: i32, %arg2: i32, %arg3: memref<16x64xbf16, #tpu.memory_space<vmem>>, %arg4: memref<64x16xbf16, #tpu.memory_space<vmem>>, %arg5: memref<1x16xf32, #tpu.memory_space<vmem>>, %arg6: memref<16x16xf32, #tpu.memory_space<vmem>>, %arg7: memref<16x16xf32, #tpu.memory_space<vmem>>) attributes {dimension_semantics = [#tpu.dimension_semantics<parallel>, #tpu.dimension_semantics<parallel>, #tpu.dimension_semantics<arbitrary>], iteration_bounds = array<i64: 1, 1, 1>, scalar_prefetch = 0 : i64, scratch_operands = 1 : i64, tpu.core_type = #tpu.core_type<tc>, window_params = [{transform_indices = @transform_0, window_bounds = array<i64: 16, 64>}, {transform_indices = @transform_1, window_bounds = array<i64: 64, 16>}, {transform_indices = @transform_2, window_bounds = array<i64: 1, 16>}, {transform_indices = @transform_3, window_bounds = array<i64: 16, 16>}]} {
    %c0_i32 = arith.constant 0 : i32
    %0 = arith.cmpi eq, %arg2, %c0_i32 : i32
    %1 = arith.extui %0 : i1 to i32
    %c0_i32_0 = arith.constant 0 : i32
    %2 = arith.cmpi ne, %1, %c0_i32_0 : i32
    scf.if %2 {
      %cst_10 = arith.constant 0.000000e+00 : f32
      %12 = vector.broadcast %cst_10 : f32 to vector<16x16xf32>
      %c0_11 = arith.constant 0 : index
      %c0_12 = arith.constant 0 : index
      %13 = vector.load %arg7[%c0_11, %c0_12] : memref<16x16xf32, #tpu.memory_space<vmem>>, vector<16x16xf32>
      tpu.vector_store %arg7[%c0_11, %c0_12], %12 {strides = array<i32>} : memref<16x16xf32, #tpu.memory_space<vmem>>, vector<16x16xf32>,
    } else {
    }
    %c0 = arith.constant 0 : index
    %c0_1 = arith.constant 0 : index
    %3 = vector.load %arg7[%c0, %c0_1] : memref<16x16xf32, #tpu.memory_space<vmem>>, vector<16x16xf32>
    %c0_2 = arith.constant 0 : index
    %c0_3 = arith.constant 0 : index
    %4 = vector.load %arg3[%c0_2, %c0_3] : memref<16x64xbf16, #tpu.memory_space<vmem>>, vector<16x64xbf16>
    %c0_4 = arith.constant 0 : index
    %c0_5 = arith.constant 0 : index
    %5 = vector.load %arg4[%c0_4, %c0_5] : memref<64x16xbf16, #tpu.memory_space<vmem>>, vector<64x16xbf16>
    %cst = arith.constant dense<0.000000e+00> : vector<16x16xf32>
    %6 = tpu.matmul %4, %5, %cst {dimension_numbers = #tpu.dot_dimension_numbers<[1], [0], [0], [1], [0, 0, 1, 1], [], []>} : vector<16x64xbf16>, vector<64x16xbf16>, vector<16x16xf32> -> vector<16x16xf32>
    %7 = arith.addf %3, %6 : vector<16x16xf32>
    %c0_6 = arith.constant 0 : index
    %c0_7 = arith.constant 0 : index
    %8 = vector.load %arg7[%c0_6, %c0_7] : memref<16x16xf32, #tpu.memory_space<vmem>>, vector<16x16xf32>
    tpu.vector_store %arg7[%c0_6, %c0_7], %7 {strides = array<i32>} : memref<16x16xf32, #tpu.memory_space<vmem>>, vector<16x16xf32>,
    %c0_i32_8 = arith.constant 0 : i32
    %9 = arith.cmpi eq, %arg2, %c0_i32_8 : i32
    %10 = arith.extui %9 : i1 to i32
    %c0_i32_9 = arith.constant 0 : i32
    %11 = arith.cmpi ne, %10, %c0_i32_9 : i32
    scf.if %11 {
      %c0_10 = arith.constant 0 : index
      %c0_11 = arith.constant 0 : index
      %12 = vector.load %arg7[%c0_10, %c0_11] : memref<16x16xf32, #tpu.memory_space<vmem>>, vector<16x16xf32>
      %c0_12 = arith.constant 0 : index
      %c0_13 = arith.constant 0 : index
      %13 = vector.load %arg5[%c0_12, %c0_13] : memref<1x16xf32, #tpu.memory_space<vmem>>, vector<1x16xf32>
      %14 = vector.broadcast %13 : vector<1x16xf32> to vector<16x16xf32>
      %15 = arith.addf %12, %14 : vector<16x16xf32>
      %cst_14 = arith.constant 0.000000e+00 : f32
      %16 = vector.broadcast %cst_14 : f32 to vector<16x16xf32>
      %17 = arith.maximumf %15, %16 : vector<16x16xf32>
      %c0_15 = arith.constant 0 : index
      %c0_16 = arith.constant 0 : index
      %18 = vector.load %arg6[%c0_15, %c0_16] : memref<16x16xf32, #tpu.memory_space<vmem>>, vector<16x16xf32>
      tpu.vector_store %arg6[%c0_15, %c0_16], %17 {strides = array<i32>} : memref<16x16xf32, #tpu.memory_space<vmem>>, vector<16x16xf32>,
    } else {
    }
    return
  }
  func.func @transform_0(%arg0: i32, %arg1: i32, %arg2: i32) -> (i32, i32) {
    %c0_i32 = arith.constant 0 : i32
    return %arg0, %arg2 : i32, i32
  }
  func.func @transform_1(%arg0: i32, %arg1: i32, %arg2: i32) -> (i32, i32) {
    %c0_i32 = arith.constant 0 : i32
    return %arg2, %arg1 : i32, i32
  }
  func.func @transform_2(%arg0: i32, %arg1: i32, %arg2: i32) -> (i32, i32) {
    %c0_i32 = arith.constant 0 : i32
    %c0_i32_0 = arith.constant 0 : i32
    return %c0_i32, %arg1 : i32, i32
  }
  func.func @transform_3(%arg0: i32, %arg1: i32, %arg2: i32) -> (i32, i32) {
    %c0_i32 = arith.constant 0 : i32
    return %arg0, %arg1 : i32, i32
  }
}

module attributes {stable_mosaic.version = 11 : i64} {
  func.func @_glu_kernel(%arg0: i32, %arg1: i32, %arg2: memref<16x16xbf16, #tpu.memory_space<vmem>>, %arg3: memref<16x16xbf16, #tpu.memory_space<vmem>>, %arg4: memref<16x16xbf16, #tpu.memory_space<vmem>>, %arg5: memref<1x16xf32, #tpu.memory_space<vmem>>, %arg6: memref<1x16xf32, #tpu.memory_space<vmem>>, %arg7: memref<16x16xf32, #tpu.memory_space<vmem>>, %arg8: memref<16x16xf32, #tpu.memory_space<vmem>>, %arg9: memref<16x16xf32, #tpu.memory_space<vmem>>) attributes {dimension_semantics = [#tpu.dimension_semantics<parallel>, #tpu.dimension_semantics<arbitrary>], iteration_bounds = array<i64: 1, 1>, scalar_prefetch = 0 : i64, scratch_operands = 2 : i64, tpu.core_type = #tpu.core_type<tc>, window_params = [{transform_indices = @transform_0, window_bounds = array<i64: 16, 16>}, {transform_indices = @transform_1, window_bounds = array<i64: 16, 16>}, {transform_indices = @transform_2, window_bounds = array<i64: 16, 16>}, {pipeline_mode = #tpu.pipeline_mode<synchronous>, transform_indices = @transform_3, window_bounds = array<i64: 1, 16>}, {pipeline_mode = #tpu.pipeline_mode<synchronous>, transform_indices = @transform_4, window_bounds = array<i64: 1, 16>}, {transform_indices = @transform_5, window_bounds = array<i64: 16, 16>}]} {
    %c0_i32 = arith.constant 0 : i32
    %0 = arith.cmpi eq, %arg1, %c0_i32 : i32
    %1 = arith.extui %0 : i1 to i32
    %c0_i32_0 = arith.constant 0 : i32
    %2 = arith.cmpi ne, %1, %c0_i32_0 : i32
    scf.if %2 {
      %cst_17 = arith.constant 0.000000e+00 : f32
      %17 = vector.broadcast %cst_17 : f32 to vector<16x16xf32>
      %c0_18 = arith.constant 0 : index
      %c0_19 = arith.constant 0 : index
      %18 = vector.load %arg8[%c0_18, %c0_19] : memref<16x16xf32, #tpu.memory_space<vmem>>, vector<16x16xf32>
      tpu.vector_store %arg8[%c0_18, %c0_19], %17 {strides = array<i32>} : memref<16x16xf32, #tpu.memory_space<vmem>>, vector<16x16xf32>,
      %cst_20 = arith.constant 0.000000e+00 : f32
      %19 = vector.broadcast %cst_20 : f32 to vector<16x16xf32>
      %c0_21 = arith.constant 0 : index
      %c0_22 = arith.constant 0 : index
      %20 = vector.load %arg9[%c0_21, %c0_22] : memref<16x16xf32, #tpu.memory_space<vmem>>, vector<16x16xf32>
      tpu.vector_store %arg9[%c0_21, %c0_22], %19 {strides = array<i32>} : memref<16x16xf32, #tpu.memory_space<vmem>>, vector<16x16xf32>,
    } else {
    }
    %c0 = arith.constant 0 : index
    %c0_1 = arith.constant 0 : index
    %3 = vector.load %arg2[%c0, %c0_1] : memref<16x16xbf16, #tpu.memory_space<vmem>>, vector<16x16xbf16>
    %c0_2 = arith.constant 0 : index
    %c0_3 = arith.constant 0 : index
    %4 = vector.load %arg8[%c0_2, %c0_3] : memref<16x16xf32, #tpu.memory_space<vmem>>, vector<16x16xf32>
    %c0_4 = arith.constant 0 : index
    %c0_5 = arith.constant 0 : index
    %5 = vector.load %arg3[%c0_4, %c0_5] : memref<16x16xbf16, #tpu.memory_space<vmem>>, vector<16x16xbf16>
    %cst = arith.constant dense<0.000000e+00> : vector<16x16xf32>
    %6 = tpu.matmul %3, %5, %cst {dimension_numbers = #tpu.dot_dimension_numbers<[1], [0], [0], [1], [0, 0, 1, 1], [], []>} : vector<16x16xbf16>, vector<16x16xbf16>, vector<16x16xf32> -> vector<16x16xf32>
    %7 = arith.addf %4, %6 : vector<16x16xf32>
    %c0_6 = arith.constant 0 : index
    %c0_7 = arith.constant 0 : index
    %8 = vector.load %arg8[%c0_6, %c0_7] : memref<16x16xf32, #tpu.memory_space<vmem>>, vector<16x16xf32>
    tpu.vector_store %arg8[%c0_6, %c0_7], %7 {strides = array<i32>} : memref<16x16xf32, #tpu.memory_space<vmem>>, vector<16x16xf32>,
    %c0_8 = arith.constant 0 : index
    %c0_9 = arith.constant 0 : index
    %9 = vector.load %arg9[%c0_8, %c0_9] : memref<16x16xf32, #tpu.memory_space<vmem>>, vector<16x16xf32>
    %c0_10 = arith.constant 0 : index
    %c0_11 = arith.constant 0 : index
    %10 = vector.load %arg4[%c0_10, %c0_11] : memref<16x16xbf16, #tpu.memory_space<vmem>>, vector<16x16xbf16>
    %cst_12 = arith.constant dense<0.000000e+00> : vector<16x16xf32>
    %11 = tpu.matmul %3, %10, %cst_12 {dimension_numbers = #tpu.dot_dimension_numbers<[1], [0], [0], [1], [0, 0, 1, 1], [], []>} : vector<16x16xbf16>, vector<16x16xbf16>, vector<16x16xf32> -> vector<16x16xf32>
    %12 = arith.addf %9, %11 : vector<16x16xf32>
    %c0_13 = arith.constant 0 : index
    %c0_14 = arith.constant 0 : index
    %13 = vector.load %arg9[%c0_13, %c0_14] : memref<16x16xf32, #tpu.memory_space<vmem>>, vector<16x16xf32>
    tpu.vector_store %arg9[%c0_13, %c0_14], %12 {strides = array<i32>} : memref<16x16xf32, #tpu.memory_space<vmem>>, vector<16x16xf32>,
    %c0_i32_15 = arith.constant 0 : i32
    %14 = arith.cmpi eq, %arg1, %c0_i32_15 : i32
    %15 = arith.extui %14 : i1 to i32
    %c0_i32_16 = arith.constant 0 : i32
    %16 = arith.cmpi ne, %15, %c0_i32_16 : i32
    scf.if %16 {
      %c0_17 = arith.constant 0 : index
      %c0_18 = arith.constant 0 : index
      %17 = vector.load %arg8[%c0_17, %c0_18] : memref<16x16xf32, #tpu.memory_space<vmem>>, vector<16x16xf32>
      %c0_19 = arith.constant 0 : index
      %c0_20 = arith.constant 0 : index
      %18 = vector.load %arg5[%c0_19, %c0_20] : memref<1x16xf32, #tpu.memory_space<vmem>>, vector<1x16xf32>
      %19 = vector.broadcast %18 : vector<1x16xf32> to vector<16x16xf32>
      %20 = arith.addf %17, %19 : vector<16x16xf32>
      %c0_21 = arith.constant 0 : index
      %c0_22 = arith.constant 0 : index
      %21 = vector.load %arg9[%c0_21, %c0_22] : memref<16x16xf32, #tpu.memory_space<vmem>>, vector<16x16xf32>
      %c0_23 = arith.constant 0 : index
      %c0_24 = arith.constant 0 : index
      %22 = vector.load %arg6[%c0_23, %c0_24] : memref<1x16xf32, #tpu.memory_space<vmem>>, vector<1x16xf32>
      %23 = vector.broadcast %22 : vector<1x16xf32> to vector<16x16xf32>
      %24 = arith.addf %21, %23 : vector<16x16xf32>
      %25 = arith.negf %24 : vector<16x16xf32>
      %26 = math.exp %25 : vector<16x16xf32>
      %cst_25 = arith.constant 1.000000e+00 : f32
      %27 = vector.broadcast %cst_25 : f32 to vector<16x16xf32>
      %28 = arith.addf %27, %26 : vector<16x16xf32>
      %29 = arith.divf %27, %28 : vector<16x16xf32>
      %30 = arith.mulf %20, %29 : vector<16x16xf32>
      %c0_26 = arith.constant 0 : index
      %c0_27 = arith.constant 0 : index
      %31 = vector.load %arg7[%c0_26, %c0_27] : memref<16x16xf32, #tpu.memory_space<vmem>>, vector<16x16xf32>
      tpu.vector_store %arg7[%c0_26, %c0_27], %30 {strides = array<i32>} : memref<16x16xf32, #tpu.memory_space<vmem>>, vector<16x16xf32>,
    } else {
    }
    return
  }
  func.func @transform_0(%arg0: i32, %arg1: i32) -> (i32, i32) {
    %c0_i32 = arith.constant 0 : i32
    return %arg0, %arg1 : i32, i32
  }
  func.func @transform_1(%arg0: i32, %arg1: i32) -> (i32, i32) {
    %c0_i32 = arith.constant 0 : i32
    %c0_i32_0 = arith.constant 0 : i32
    return %arg1, %c0_i32 : i32, i32
  }
  func.func @transform_2(%arg0: i32, %arg1: i32) -> (i32, i32) {
    %c0_i32 = arith.constant 0 : i32
    %c0_i32_0 = arith.constant 0 : i32
    return %arg1, %c0_i32 : i32, i32
  }
  func.func @transform_3(%arg0: i32, %arg1: i32) -> (i32, i32) {
    %c0_i32 = arith.constant 0 : i32
    %c0_i32_0 = arith.constant 0 : i32
    %c0_i32_1 = arith.constant 0 : i32
    return %c0_i32, %c0_i32_0 : i32, i32
  }
  func.func @transform_4(%arg0: i32, %arg1: i32) -> (i32, i32) {
    %c0_i32 = arith.constant 0 : i32
    %c0_i32_0 = arith.constant 0 : i32
    %c0_i32_1 = arith.constant 0 : i32
    return %c0_i32, %c0_i32_0 : i32, i32
  }
  func.func @transform_5(%arg0: i32, %arg1: i32) -> (i32, i32) {
    %c0_i32 = arith.constant 0 : i32
    %c0_i32_0 = arith.constant 0 : i32
    return %arg0, %c0_i32 : i32, i32
  }
}

module attributes {stable_mosaic.version = 11 : i64} {
  func.func @_matmul_kernel(%arg0: i32, %arg1: i32, %arg2: i32, %arg3: memref<16x16xbf16, #tpu.memory_space<vmem>>, %arg4: memref<16x32xbf16, #tpu.memory_space<vmem>>, %arg5: memref<1x32xf32, #tpu.memory_space<vmem>>, %arg6: memref<16x32xf32, #tpu.memory_space<vmem>>, %arg7: memref<16x32xf32, #tpu.memory_space<vmem>>) attributes {dimension_semantics = [#tpu.dimension_semantics<parallel>, #tpu.dimension_semantics<parallel>, #tpu.dimension_semantics<arbitrary>], iteration_bounds = array<i64: 1, 1, 1>, scalar_prefetch = 0 : i64, scratch_operands = 1 : i64, tpu.core_type = #tpu.core_type<tc>, window_params = [{transform_indices = @transform_0, window_bounds = array<i64: 16, 16>}, {transform_indices = @transform_1, window_bounds = array<i64: 16, 32>}, {transform_indices = @transform_2, window_bounds = array<i64: 1, 32>}, {transform_indices = @transform_3, window_bounds = array<i64: 16, 32>}]} {
    %c0_i32 = arith.constant 0 : i32
    %0 = arith.cmpi eq, %arg2, %c0_i32 : i32
    %1 = arith.extui %0 : i1 to i32
    %c0_i32_0 = arith.constant 0 : i32
    %2 = arith.cmpi ne, %1, %c0_i32_0 : i32
    scf.if %2 {
      %cst_10 = arith.constant 0.000000e+00 : f32
      %12 = vector.broadcast %cst_10 : f32 to vector<16x32xf32>
      %c0_11 = arith.constant 0 : index
      %c0_12 = arith.constant 0 : index
      %13 = vector.load %arg7[%c0_11, %c0_12] : memref<16x32xf32, #tpu.memory_space<vmem>>, vector<16x32xf32>
      tpu.vector_store %arg7[%c0_11, %c0_12], %12 {strides = array<i32>} : memref<16x32xf32, #tpu.memory_space<vmem>>, vector<16x32xf32>,
    } else {
    }
    %c0 = arith.constant 0 : index
    %c0_1 = arith.constant 0 : index
    %3 = vector.load %arg7[%c0, %c0_1] : memref<16x32xf32, #tpu.memory_space<vmem>>, vector<16x32xf32>
    %c0_2 = arith.constant 0 : index
    %c0_3 = arith.constant 0 : index
    %4 = vector.load %arg3[%c0_2, %c0_3] : memref<16x16xbf16, #tpu.memory_space<vmem>>, vector<16x16xbf16>
    %c0_4 = arith.constant 0 : index
    %c0_5 = arith.constant 0 : index
    %5 = vector.load %arg4[%c0_4, %c0_5] : memref<16x32xbf16, #tpu.memory_space<vmem>>, vector<16x32xbf16>
    %cst = arith.constant dense<0.000000e+00> : vector<16x32xf32>
    %6 = tpu.matmul %4, %5, %cst {dimension_numbers = #tpu.dot_dimension_numbers<[1], [0], [0], [1], [0, 0, 1, 1], [], []>} : vector<16x16xbf16>, vector<16x32xbf16>, vector<16x32xf32> -> vector<16x32xf32>
    %7 = arith.addf %3, %6 : vector<16x32xf32>
    %c0_6 = arith.constant 0 : index
    %c0_7 = arith.constant 0 : index
    %8 = vector.load %arg7[%c0_6, %c0_7] : memref<16x32xf32, #tpu.memory_space<vmem>>, vector<16x32xf32>
    tpu.vector_store %arg7[%c0_6, %c0_7], %7 {strides = array<i32>} : memref<16x32xf32, #tpu.memory_space<vmem>>, vector<16x32xf32>,
    %c0_i32_8 = arith.constant 0 : i32
    %9 = arith.cmpi eq, %arg2, %c0_i32_8 : i32
    %10 = arith.extui %9 : i1 to i32
    %c0_i32_9 = arith.constant 0 : i32
    %11 = arith.cmpi ne, %10, %c0_i32_9 : i32
    scf.if %11 {
      %c0_10 = arith.constant 0 : index
      %c0_11 = arith.constant 0 : index
      %12 = vector.load %arg7[%c0_10, %c0_11] : memref<16x32xf32, #tpu.memory_space<vmem>>, vector<16x32xf32>
      %c0_12 = arith.constant 0 : index
      %c0_13 = arith.constant 0 : index
      %13 = vector.load %arg5[%c0_12, %c0_13] : memref<1x32xf32, #tpu.memory_space<vmem>>, vector<1x32xf32>
      %14 = vector.broadcast %13 : vector<1x32xf32> to vector<16x32xf32>
      %15 = arith.addf %12, %14 : vector<16x32xf32>
      %c0_14 = arith.constant 0 : index
      %c0_15 = arith.constant 0 : index
      %16 = vector.load %arg6[%c0_14, %c0_15] : memref<16x32xf32, #tpu.memory_space<vmem>>, vector<16x32xf32>
      tpu.vector_store %arg6[%c0_14, %c0_15], %15 {strides = array<i32>} : memref<16x32xf32, #tpu.memory_space<vmem>>, vector<16x32xf32>,
    } else {
    }
    return
  }
  func.func @transform_0(%arg0: i32, %arg1: i32, %arg2: i32) -> (i32, i32) {
    %c0_i32 = arith.constant 0 : i32
    return %arg0, %arg2 : i32, i32
  }
  func.func @transform_1(%arg0: i32, %arg1: i32, %arg2: i32) -> (i32, i32) {
    %c0_i32 = arith.constant 0 : i32
    return %arg2, %arg1 : i32, i32
  }
  func.func @transform_2(%arg0: i32, %arg1: i32, %arg2: i32) -> (i32, i32) {
    %c0_i32 = arith.constant 0 : i32
    %c0_i32_0 = arith.constant 0 : i32
    return %c0_i32, %arg1 : i32, i32
  }
  func.func @transform_3(%arg0: i32, %arg1: i32, %arg2: i32) -> (i32, i32) {
    %c0_i32 = arith.constant 0 : i32
    return %arg0, %arg1 : i32, i32
  }
}

module attributes {stable_mosaic.version = 11 : i64} {
  func.func @_layernorm_kernel(%arg0: i32, %arg1: memref<16x32xf32, #tpu.memory_space<vmem>>, %arg2: memref<1x32xf32, #tpu.memory_space<vmem>>, %arg3: memref<1x32xf32, #tpu.memory_space<vmem>>, %arg4: memref<16x32xf32, #tpu.memory_space<vmem>>) attributes {dimension_semantics = [#tpu.dimension_semantics<parallel>], iteration_bounds = array<i64: 1>, scalar_prefetch = 0 : i64, scratch_operands = 0 : i64, tpu.core_type = #tpu.core_type<tc>, window_params = [{transform_indices = @transform_0, window_bounds = array<i64: 16, 32>}, {pipeline_mode = #tpu.pipeline_mode<synchronous>, transform_indices = @transform_1, window_bounds = array<i64: 1, 32>}, {pipeline_mode = #tpu.pipeline_mode<synchronous>, transform_indices = @transform_2, window_bounds = array<i64: 1, 32>}, {transform_indices = @transform_3, window_bounds = array<i64: 16, 32>}]} {
    %c0 = arith.constant 0 : index
    %c0_0 = arith.constant 0 : index
    %0 = vector.load %arg1[%c0, %c0_0] : memref<16x32xf32, #tpu.memory_space<vmem>>, vector<16x32xf32>
    %cst = arith.constant dense<0.000000e+00> : vector<16xf32>
    %1 = vector.multi_reduction <add>, %0, %cst [1] : vector<16x32xf32> to vector<16xf32>
    %2 = vector.shape_cast %1 : vector<16xf32> to vector<16x1xf32>
    %cst_1 = arith.constant 3.200000e+01 : f32
    %3 = vector.broadcast %cst_1 : f32 to vector<16x1xf32>
    %4 = arith.divf %2, %3 : vector<16x1xf32>
    %5 = vector.broadcast %4 : vector<16x1xf32> to vector<16x32xf32>
    %6 = arith.subf %0, %5 : vector<16x32xf32>
    %7 = arith.mulf %6, %6 : vector<16x32xf32>
    %cst_2 = arith.constant dense<0.000000e+00> : vector<16xf32>
    %8 = vector.multi_reduction <add>, %7, %cst_2 [1] : vector<16x32xf32> to vector<16xf32>
    %9 = vector.shape_cast %8 : vector<16xf32> to vector<16x1xf32>
    %cst_3 = arith.constant 3.200000e+01 : f32
    %10 = vector.broadcast %cst_3 : f32 to vector<16x1xf32>
    %11 = arith.divf %9, %10 : vector<16x1xf32>
    %12 = vector.broadcast %4 : vector<16x1xf32> to vector<16x32xf32>
    %13 = arith.subf %0, %12 : vector<16x32xf32>
    %cst_4 = arith.constant 9.99999974E-6 : f32
    %14 = vector.broadcast %cst_4 : f32 to vector<16x1xf32>
    %15 = arith.addf %11, %14 : vector<16x1xf32>
    %16 = math.rsqrt %15 : vector<16x1xf32>
    %17 = vector.broadcast %16 : vector<16x1xf32> to vector<16x32xf32>
    %18 = arith.mulf %13, %17 : vector<16x32xf32>
    %c0_5 = arith.constant 0 : index
    %c0_6 = arith.constant 0 : index
    %19 = vector.load %arg2[%c0_5, %c0_6] : memref<1x32xf32, #tpu.memory_space<vmem>>, vector<1x32xf32>
    %20 = vector.broadcast %19 : vector<1x32xf32> to vector<16x32xf32>
    %21 = arith.mulf %18, %20 : vector<16x32xf32>
    %c0_7 = arith.constant 0 : index
    %c0_8 = arith.constant 0 : index
    %22 = vector.load %arg3[%c0_7, %c0_8] : memref<1x32xf32, #tpu.memory_space<vmem>>, vector<1x32xf32>
    %23 = vector.broadcast %22 : vector<1x32xf32> to vector<16x32xf32>
    %24 = arith.addf %21, %23 : vector<16x32xf32>
    %c0_9 = arith.constant 0 : index
    %c0_10 = arith.constant 0 : index
    %25 = vector.load %arg4[%c0_9, %c0_10] : memref<16x32xf32, #tpu.memory_space<vmem>>, vector<16x32xf32>
    tpu.vector_store %arg4[%c0_9, %c0_10], %24 {strides = array<i32>} : memref<16x32xf32, #tpu.memory_space<vmem>>, vector<16x32xf32>,
    return
  }
  func.func @transform_0(%arg0: i32) -> (i32, i32) {
    %c0_i32 = arith.constant 0 : i32
    %c0_i32_0 = arith.constant 0 : i32
    return %arg0, %c0_i32 : i32, i32
  }
  func.func @transform_1(%arg0: i32) -> (i32, i32) {
    %c0_i32 = arith.constant 0 : i32
    %c0_i32_0 = arith.constant 0 : i32
    %c0_i32_1 = arith.constant 0 : i32
    return %c0_i32, %c0_i32_0 : i32, i32
  }
  func.func @transform_2(%arg0: i32) -> (i32, i32) {
    %c0_i32 = arith.constant 0 : i32
    %c0_i32_0 = arith.constant 0 : i32
    %c0_i32_1 = arith.constant 0 : i32
    return %c0_i32, %c0_i32_0 : i32, i32
  }
  func.func @transform_3(%arg0: i32) -> (i32, i32) {
    %c0_i32 = arith.constant 0 : i32
    %c0_i32_0 = arith.constant 0 : i32
    return %arg0, %c0_i32 : i32, i32
  }
}

module attributes {stable_mosaic.version = 11 : i64} {
  func.func @_matmul_kernel(%arg0: i32, %arg1: i32, %arg2: i32, %arg3: memref<16x32xbf16, #tpu.memory_space<vmem>>, %arg4: memref<32x96xbf16, #tpu.memory_space<vmem>>, %arg5: memref<16x96xf32, #tpu.memory_space<vmem>>, %arg6: memref<16x96xf32, #tpu.memory_space<vmem>>) attributes {dimension_semantics = [#tpu.dimension_semantics<parallel>, #tpu.dimension_semantics<parallel>, #tpu.dimension_semantics<arbitrary>], iteration_bounds = array<i64: 1, 1, 1>, scalar_prefetch = 0 : i64, scratch_operands = 1 : i64, tpu.core_type = #tpu.core_type<tc>, window_params = [{transform_indices = @transform_0, window_bounds = array<i64: 16, 32>}, {transform_indices = @transform_1, window_bounds = array<i64: 32, 96>}, {transform_indices = @transform_2, window_bounds = array<i64: 16, 96>}]} {
    %c0_i32 = arith.constant 0 : i32
    %0 = arith.cmpi eq, %arg2, %c0_i32 : i32
    %1 = arith.extui %0 : i1 to i32
    %c0_i32_0 = arith.constant 0 : i32
    %2 = arith.cmpi ne, %1, %c0_i32_0 : i32
    scf.if %2 {
      %cst_10 = arith.constant 0.000000e+00 : f32
      %12 = vector.broadcast %cst_10 : f32 to vector<16x96xf32>
      %c0_11 = arith.constant 0 : index
      %c0_12 = arith.constant 0 : index
      %13 = vector.load %arg6[%c0_11, %c0_12] : memref<16x96xf32, #tpu.memory_space<vmem>>, vector<16x96xf32>
      tpu.vector_store %arg6[%c0_11, %c0_12], %12 {strides = array<i32>} : memref<16x96xf32, #tpu.memory_space<vmem>>, vector<16x96xf32>,
    } else {
    }
    %c0 = arith.constant 0 : index
    %c0_1 = arith.constant 0 : index
    %3 = vector.load %arg6[%c0, %c0_1] : memref<16x96xf32, #tpu.memory_space<vmem>>, vector<16x96xf32>
    %c0_2 = arith.constant 0 : index
    %c0_3 = arith.constant 0 : index
    %4 = vector.load %arg3[%c0_2, %c0_3] : memref<16x32xbf16, #tpu.memory_space<vmem>>, vector<16x32xbf16>
    %c0_4 = arith.constant 0 : index
    %c0_5 = arith.constant 0 : index
    %5 = vector.load %arg4[%c0_4, %c0_5] : memref<32x96xbf16, #tpu.memory_space<vmem>>, vector<32x96xbf16>
    %cst = arith.constant dense<0.000000e+00> : vector<16x96xf32>
    %6 = tpu.matmul %4, %5, %cst {dimension_numbers = #tpu.dot_dimension_numbers<[1], [0], [0], [1], [0, 0, 1, 1], [], []>} : vector<16x32xbf16>, vector<32x96xbf16>, vector<16x96xf32> -> vector<16x96xf32>
    %7 = arith.addf %3, %6 : vector<16x96xf32>
    %c0_6 = arith.constant 0 : index
    %c0_7 = arith.constant 0 : index
    %8 = vector.load %arg6[%c0_6, %c0_7] : memref<16x96xf32, #tpu.memory_space<vmem>>, vector<16x96xf32>
    tpu.vector_store %arg6[%c0_6, %c0_7], %7 {strides = array<i32>} : memref<16x96xf32, #tpu.memory_space<vmem>>, vector<16x96xf32>,
    %c0_i32_8 = arith.constant 0 : i32
    %9 = arith.cmpi eq, %arg2, %c0_i32_8 : i32
    %10 = arith.extui %9 : i1 to i32
    %c0_i32_9 = arith.constant 0 : i32
    %11 = arith.cmpi ne, %10, %c0_i32_9 : i32
    scf.if %11 {
      %c0_10 = arith.constant 0 : index
      %c0_11 = arith.constant 0 : index
      %12 = vector.load %arg6[%c0_10, %c0_11] : memref<16x96xf32, #tpu.memory_space<vmem>>, vector<16x96xf32>
      %c0_12 = arith.constant 0 : index
      %c0_13 = arith.constant 0 : index
      %13 = vector.load %arg5[%c0_12, %c0_13] : memref<16x96xf32, #tpu.memory_space<vmem>>, vector<16x96xf32>
      tpu.vector_store %arg5[%c0_12, %c0_13], %12 {strides = array<i32>} : memref<16x96xf32, #tpu.memory_space<vmem>>, vector<16x96xf32>,
    } else {
    }
    return
  }
  func.func @transform_0(%arg0: i32, %arg1: i32, %arg2: i32) -> (i32, i32) {
    %c0_i32 = arith.constant 0 : i32
    return %arg0, %arg2 : i32, i32
  }
  func.func @transform_1(%arg0: i32, %arg1: i32, %arg2: i32) -> (i32, i32) {
    %c0_i32 = arith.constant 0 : i32
    return %arg2, %arg1 : i32, i32
  }
  func.func @transform_2(%arg0: i32, %arg1: i32, %arg2: i32) -> (i32, i32) {
    %c0_i32 = arith.constant 0 : i32
    return %arg0, %arg1 : i32, i32
  }
}

module attributes {stable_mosaic.version = 11 : i64} {
  func.func @_flash_attn_kernel(%arg0: i32, %arg1: i32, %arg2: i32, %arg3: memref<1x8x8xbf16, #tpu.memory_space<vmem>>, %arg4: memref<1x8x8xbf16, #tpu.memory_space<vmem>>, %arg5: memref<1x8x8xbf16, #tpu.memory_space<vmem>>, %arg6: memref<1x8x8xf32, #tpu.memory_space<vmem>>, %arg7: memref<8x1xf32, #tpu.memory_space<vmem>>, %arg8: memref<8x1xf32, #tpu.memory_space<vmem>>, %arg9: memref<8x8xf32, #tpu.memory_space<vmem>>) attributes {dimension_semantics = [#tpu.dimension_semantics<parallel>, #tpu.dimension_semantics<parallel>, #tpu.dimension_semantics<arbitrary>], iteration_bounds = array<i64: 8, 1, 1>, scalar_prefetch = 0 : i64, scratch_operands = 3 : i64, tpu.core_type = #tpu.core_type<tc>, window_params = [{transform_indices = @transform_0, window_bounds = array<i64: 1, 8, 8>}, {transform_indices = @transform_1, window_bounds = array<i64: 1, 8, 8>}, {transform_indices = @transform_2, window_bounds = array<i64: 1, 8, 8>}, {transform_indices = @transform_3, window_bounds = array<i64: 1, 8, 8>}]} {
    %c0_i32 = arith.constant 0 : i32
    %0 = arith.cmpi eq, %arg2, %c0_i32 : i32
    %1 = arith.extui %0 : i1 to i32
    %c0_i32_0 = arith.constant 0 : i32
    %2 = arith.cmpi ne, %1, %c0_i32_0 : i32
    scf.if %2 {
      %cst = arith.constant 0xFF800000 : f32
      %12 = vector.broadcast %cst : f32 to vector<8x1xf32>
      %c0 = arith.constant 0 : index
      %c0_5 = arith.constant 0 : index
      %13 = vector.load %arg7[%c0, %c0_5] : memref<8x1xf32, #tpu.memory_space<vmem>>, vector<8x1xf32>
      tpu.vector_store %arg7[%c0, %c0_5], %12 {strides = array<i32>} : memref<8x1xf32, #tpu.memory_space<vmem>>, vector<8x1xf32>,
      %cst_6 = arith.constant 0.000000e+00 : f32
      %14 = vector.broadcast %cst_6 : f32 to vector<8x1xf32>
      %c0_7 = arith.constant 0 : index
      %c0_8 = arith.constant 0 : index
      %15 = vector.load %arg8[%c0_7, %c0_8] : memref<8x1xf32, #tpu.memory_space<vmem>>, vector<8x1xf32>
      tpu.vector_store %arg8[%c0_7, %c0_8], %14 {strides = array<i32>} : memref<8x1xf32, #tpu.memory_space<vmem>>, vector<8x1xf32>,
      %cst_9 = arith.constant 0.000000e+00 : f32
      %16 = vector.broadcast %cst_9 : f32 to vector<8x8xf32>
      %c0_10 = arith.constant 0 : index
      %c0_11 = arith.constant 0 : index
      %17 = vector.load %arg9[%c0_10, %c0_11] : memref<8x8xf32, #tpu.memory_space<vmem>>, vector<8x8xf32>
      tpu.vector_store %arg9[%c0_10, %c0_11], %16 {strides = array<i32>} : memref<8x8xf32, #tpu.memory_space<vmem>>, vector<8x8xf32>,
    } else {
    }
    %c8_i32 = arith.constant 8 : i32
    %3 = arith.muli %arg2, %c8_i32 : i32
    %c8_i32_1 = arith.constant 8 : i32
    %4 = arith.muli %arg1, %c8_i32_1 : i32
    %c7_i32 = arith.constant 7 : i32
    %5 = arith.addi %4, %c7_i32 : i32
    %6 = arith.cmpi sle, %3, %5 : i32
    %7 = arith.extui %6 : i1 to i32
    %c0_i32_2 = arith.constant 0 : i32
    %8 = arith.cmpi ne, %7, %c0_i32_2 : i32
    scf.if %8 {
      %c0 = arith.constant 0 : index
      %c0_5 = arith.constant 0 : index
      %c0_6 = arith.constant 0 : index
      %12 = vector.load %arg3[%c0, %c0_5, %c0_6] : memref<1x8x8xbf16, #tpu.memory_space<vmem>>, vector<1x8x8xbf16>
      %13 = vector.shape_cast %12 : vector<1x8x8xbf16> to vector<8x8xbf16>
      %c0_7 = arith.constant 0 : index
      %c0_8 = arith.constant 0 : index
      %c0_9 = arith.constant 0 : index
      %14 = vector.load %arg4[%c0_7, %c0_8, %c0_9] : memref<1x8x8xbf16, #tpu.memory_space<vmem>>, vector<1x8x8xbf16>
      %15 = vector.shape_cast %14 : vector<1x8x8xbf16> to vector<8x8xbf16>
      %c0_10 = arith.constant 0 : index
      %c0_11 = arith.constant 0 : index
      %c0_12 = arith.constant 0 : index
      %16 = vector.load %arg5[%c0_10, %c0_11, %c0_12] : memref<1x8x8xbf16, #tpu.memory_space<vmem>>, vector<1x8x8xbf16>
      %17 = vector.shape_cast %16 : vector<1x8x8xbf16> to vector<8x8xbf16>
      %cst = arith.constant dense<0.000000e+00> : vector<8x8xf32>
      %18 = tpu.matmul %13, %15, %cst {dimension_numbers = #tpu.dot_dimension_numbers<[1], [1], [0], [0], [0, 0, 1, 0], [], []>} : vector<8x8xbf16>, vector<8x8xbf16>, vector<8x8xf32> -> vector<8x8xf32>
      %cst_13 = arith.constant 0.353553385 : f32
      %19 = vector.broadcast %cst_13 : f32 to vector<8x8xf32>
      %20 = arith.mulf %18, %19 : vector<8x8xf32>
      %c8_i32_14 = arith.constant 8 : i32
      %21 = arith.muli %arg1, %c8_i32_14 : i32
      %22 = tpu.iota {dimensions = array<i32: 0>} : vector<8x8xi32>
      %23 = vector.broadcast %21 : i32 to vector<8x8xi32>
      %24 = arith.addi %23, %22 : vector<8x8xi32>
      %c8_i32_15 = arith.constant 8 : i32
      %25 = arith.muli %arg2, %c8_i32_15 : i32
      %26 = tpu.iota {dimensions = array<i32: 1>} : vector<8x8xi32>
      %27 = vector.broadcast %25 : i32 to vector<8x8xi32>
      %28 = arith.addi %27, %26 : vector<8x8xi32>
      %29 = arith.cmpi sle, %28, %24 : vector<8x8xi32>
      %cst_16 = arith.constant -1.000000e+09 : f32
      %30 = vector.broadcast %cst_16 : f32 to vector<8x8xf32>
      %31 = arith.select %29, %20, %30 : vector<8x8xi1>, vector<8x8xf32>
      %c0_17 = arith.constant 0 : index
      %c0_18 = arith.constant 0 : index
      %32 = vector.load %arg7[%c0_17, %c0_18] : memref<8x1xf32, #tpu.memory_space<vmem>>, vector<8x1xf32>
      %cst_19 = arith.constant dense<0xFF800000> : vector<8xf32>
      %33 = vector.multi_reduction <maximumf>, %31, %cst_19 [1] : vector<8x8xf32> to vector<8xf32>
      %34 = vector.shape_cast %33 : vector<8xf32> to vector<8x1xf32>
      %35 = arith.maximumf %32, %34 : vector<8x1xf32>
      %36 = arith.subf %32, %35 : vector<8x1xf32>
      %37 = math.exp %36 : vector<8x1xf32>
      %38 = vector.broadcast %35 : vector<8x1xf32> to vector<8x8xf32>
      %39 = arith.subf %31, %38 : vector<8x8xf32>
      %40 = math.exp %39 : vector<8x8xf32>
      %c0_20 = arith.constant 0 : index
      %c0_21 = arith.constant 0 : index
      %41 = vector.load %arg8[%c0_20, %c0_21] : memref<8x1xf32, #tpu.memory_space<vmem>>, vector<8x1xf32>
      %42 = arith.mulf %37, %41 : vector<8x1xf32>
      %cst_22 = arith.constant dense<0.000000e+00> : vector<8xf32>
      %43 = vector.multi_reduction <add>, %40, %cst_22 [1] : vector<8x8xf32> to vector<8xf32>
      %44 = vector.shape_cast %43 : vector<8xf32> to vector<8x1xf32>
      %45 = arith.addf %42, %44 : vector<8x1xf32>
      %c0_23 = arith.constant 0 : index
      %c0_24 = arith.constant 0 : index
      %46 = vector.load %arg8[%c0_23, %c0_24] : memref<8x1xf32, #tpu.memory_space<vmem>>, vector<8x1xf32>
      tpu.vector_store %arg8[%c0_23, %c0_24], %45 {strides = array<i32>} : memref<8x1xf32, #tpu.memory_space<vmem>>, vector<8x1xf32>,
      %c0_25 = arith.constant 0 : index
      %c0_26 = arith.constant 0 : index
      %47 = vector.load %arg9[%c0_25, %c0_26] : memref<8x8xf32, #tpu.memory_space<vmem>>, vector<8x8xf32>
      %48 = vector.broadcast %37 : vector<8x1xf32> to vector<8x8xf32>
      %49 = arith.mulf %48, %47 : vector<8x8xf32>
      %50 = arith.truncf %40 : vector<8x8xf32> to vector<8x8xbf16>
      %cst_27 = arith.constant dense<0.000000e+00> : vector<8x8xf32>
      %51 = tpu.matmul %50, %17, %cst_27 {dimension_numbers = #tpu.dot_dimension_numbers<[1], [0], [0], [1], [0, 0, 1, 1], [], []>} : vector<8x8xbf16>, vector<8x8xbf16>, vector<8x8xf32> -> vector<8x8xf32>
      %52 = arith.addf %49, %51 : vector<8x8xf32>
      %c0_28 = arith.constant 0 : index
      %c0_29 = arith.constant 0 : index
      %53 = vector.load %arg9[%c0_28, %c0_29] : memref<8x8xf32, #tpu.memory_space<vmem>>, vector<8x8xf32>
      tpu.vector_store %arg9[%c0_28, %c0_29], %52 {strides = array<i32>} : memref<8x8xf32, #tpu.memory_space<vmem>>, vector<8x8xf32>,
      %c0_30 = arith.constant 0 : index
      %c0_31 = arith.constant 0 : index
      %54 = vector.load %arg7[%c0_30, %c0_31] : memref<8x1xf32, #tpu.memory_space<vmem>>, vector<8x1xf32>
      tpu.vector_store %arg7[%c0_30, %c0_31], %35 {strides = array<i32>} : memref<8x1xf32, #tpu.memory_space<vmem>>, vector<8x1xf32>,
    } else {
    }
    %c0_i32_3 = arith.constant 0 : i32
    %9 = arith.cmpi eq, %arg2, %c0_i32_3 : i32
    %10 = arith.extui %9 : i1 to i32
    %c0_i32_4 = arith.constant 0 : i32
    %11 = arith.cmpi ne, %10, %c0_i32_4 : i32
    scf.if %11 {
      %c0 = arith.constant 0 : index
      %c0_5 = arith.constant 0 : index
      %12 = vector.load %arg8[%c0, %c0_5] : memref<8x1xf32, #tpu.memory_space<vmem>>, vector<8x1xf32>
      %13 = tpu.reciprocal %12 {approx = true} : vector<8x1xf32> -> vector<8x1xf32>
      %c0_6 = arith.constant 0 : index
      %c0_7 = arith.constant 0 : index
      %14 = vector.load %arg9[%c0_6, %c0_7] : memref<8x8xf32, #tpu.memory_space<vmem>>, vector<8x8xf32>
      %15 = vector.broadcast %13 : vector<8x1xf32> to vector<8x8xf32>
      %16 = arith.mulf %14, %15 : vector<8x8xf32>
      %c0_8 = arith.constant 0 : index
      %c0_9 = arith.constant 0 : index
      %c0_10 = arith.constant 0 : index
      %17 = vector.load %arg6[%c0_8, %c0_9, %c0_10] : memref<1x8x8xf32, #tpu.memory_space<vmem>>, vector<1x8x8xf32>
      %18 = vector.shape_cast %17 : vector<1x8x8xf32> to vector<8x8xf32>
      %19 = vector.shape_cast %16 : vector<8x8xf32> to vector<1x8x8xf32>
      tpu.vector_store %arg6[%c0_8, %c0_9, %c0_10], %19 {strides = array<i32>} : memref<1x8x8xf32, #tpu.memory_space<vmem>>, vector<1x8x8xf32>,
    } else {
    }
    return
  }
  func.func @transform_0(%arg0: i32, %arg1: i32, %arg2: i32) -> (i32, i32, i32) {
    %c0_i32 = arith.constant 0 : i32
    %c0_i32_0 = arith.constant 0 : i32
    return %arg0, %arg1, %c0_i32 : i32, i32, i32
  }
  func.func @transform_1(%arg0: i32, %arg1: i32, %arg2: i32) -> (i32, i32, i32) {
    %c0_i32 = arith.constant 0 : i32
    %c0_i32_0 = arith.constant 0 : i32
    return %arg0, %arg2, %c0_i32 : i32, i32, i32
  }
  func.func @transform_2(%arg0: i32, %arg1: i32, %arg2: i32) -> (i32, i32, i32) {
    %c0_i32 = arith.constant 0 : i32
    %c0_i32_0 = arith.constant 0 : i32
    return %arg0, %arg2, %c0_i32 : i32, i32, i32
  }
  func.func @transform_3(%arg0: i32, %arg1: i32, %arg2: i32) -> (i32, i32, i32) {
    %c0_i32 = arith.constant 0 : i32
    %c0_i32_0 = arith.constant 0 : i32
    return %arg0, %arg1, %c0_i32 : i32, i32, i32
  }
}

module attributes {stable_mosaic.version = 11 : i64} {
  func.func @_matmul_kernel(%arg0: i32, %arg1: i32, %arg2: i32, %arg3: memref<16x32xbf16, #tpu.memory_space<vmem>>, %arg4: memref<32x32xbf16, #tpu.memory_space<vmem>>, %arg5: memref<16x32xf32, #tpu.memory_space<vmem>>, %arg6: memref<16x32xf32, #tpu.memory_space<vmem>>) attributes {dimension_semantics = [#tpu.dimension_semantics<parallel>, #tpu.dimension_semantics<parallel>, #tpu.dimension_semantics<arbitrary>], iteration_bounds = array<i64: 1, 1, 1>, scalar_prefetch = 0 : i64, scratch_operands = 1 : i64, tpu.core_type = #tpu.core_type<tc>, window_params = [{transform_indices = @transform_0, window_bounds = array<i64: 16, 32>}, {transform_indices = @transform_1, window_bounds = array<i64: 32, 32>}, {transform_indices = @transform_2, window_bounds = array<i64: 16, 32>}]} {
    %c0_i32 = arith.constant 0 : i32
    %0 = arith.cmpi eq, %arg2, %c0_i32 : i32
    %1 = arith.extui %0 : i1 to i32
    %c0_i32_0 = arith.constant 0 : i32
    %2 = arith.cmpi ne, %1, %c0_i32_0 : i32
    scf.if %2 {
      %cst_10 = arith.constant 0.000000e+00 : f32
      %12 = vector.broadcast %cst_10 : f32 to vector<16x32xf32>
      %c0_11 = arith.constant 0 : index
      %c0_12 = arith.constant 0 : index
      %13 = vector.load %arg6[%c0_11, %c0_12] : memref<16x32xf32, #tpu.memory_space<vmem>>, vector<16x32xf32>
      tpu.vector_store %arg6[%c0_11, %c0_12], %12 {strides = array<i32>} : memref<16x32xf32, #tpu.memory_space<vmem>>, vector<16x32xf32>,
    } else {
    }
    %c0 = arith.constant 0 : index
    %c0_1 = arith.constant 0 : index
    %3 = vector.load %arg6[%c0, %c0_1] : memref<16x32xf32, #tpu.memory_space<vmem>>, vector<16x32xf32>
    %c0_2 = arith.constant 0 : index
    %c0_3 = arith.constant 0 : index
    %4 = vector.load %arg3[%c0_2, %c0_3] : memref<16x32xbf16, #tpu.memory_space<vmem>>, vector<16x32xbf16>
    %c0_4 = arith.constant 0 : index
    %c0_5 = arith.constant 0 : index
    %5 = vector.load %arg4[%c0_4, %c0_5] : memref<32x32xbf16, #tpu.memory_space<vmem>>, vector<32x32xbf16>
    %cst = arith.constant dense<0.000000e+00> : vector<16x32xf32>
    %6 = tpu.matmul %4, %5, %cst {dimension_numbers = #tpu.dot_dimension_numbers<[1], [0], [0], [1], [0, 0, 1, 1], [], []>} : vector<16x32xbf16>, vector<32x32xbf16>, vector<16x32xf32> -> vector<16x32xf32>
    %7 = arith.addf %3, %6 : vector<16x32xf32>
    %c0_6 = arith.constant 0 : index
    %c0_7 = arith.constant 0 : index
    %8 = vector.load %arg6[%c0_6, %c0_7] : memref<16x32xf32, #tpu.memory_space<vmem>>, vector<16x32xf32>
    tpu.vector_store %arg6[%c0_6, %c0_7], %7 {strides = array<i32>} : memref<16x32xf32, #tpu.memory_space<vmem>>, vector<16x32xf32>,
    %c0_i32_8 = arith.constant 0 : i32
    %9 = arith.cmpi eq, %arg2, %c0_i32_8 : i32
    %10 = arith.extui %9 : i1 to i32
    %c0_i32_9 = arith.constant 0 : i32
    %11 = arith.cmpi ne, %10, %c0_i32_9 : i32
    scf.if %11 {
      %c0_10 = arith.constant 0 : index
      %c0_11 = arith.constant 0 : index
      %12 = vector.load %arg6[%c0_10, %c0_11] : memref<16x32xf32, #tpu.memory_space<vmem>>, vector<16x32xf32>
      %c0_12 = arith.constant 0 : index
      %c0_13 = arith.constant 0 : index
      %13 = vector.load %arg5[%c0_12, %c0_13] : memref<16x32xf32, #tpu.memory_space<vmem>>, vector<16x32xf32>
      tpu.vector_store %arg5[%c0_12, %c0_13], %12 {strides = array<i32>} : memref<16x32xf32, #tpu.memory_space<vmem>>, vector<16x32xf32>,
    } else {
    }
    return
  }
  func.func @transform_0(%arg0: i32, %arg1: i32, %arg2: i32) -> (i32, i32) {
    %c0_i32 = arith.constant 0 : i32
    return %arg0, %arg2 : i32, i32
  }
  func.func @transform_1(%arg0: i32, %arg1: i32, %arg2: i32) -> (i32, i32) {
    %c0_i32 = arith.constant 0 : i32
    return %arg2, %arg1 : i32, i32
  }
  func.func @transform_2(%arg0: i32, %arg1: i32, %arg2: i32) -> (i32, i32) {
    %c0_i32 = arith.constant 0 : i32
    return %arg0, %arg1 : i32, i32
  }
}

module attributes {stable_mosaic.version = 11 : i64} {
  func.func @_layernorm_kernel(%arg0: i32, %arg1: memref<16x32xf32, #tpu.memory_space<vmem>>, %arg2: memref<16x32xf32, #tpu.memory_space<vmem>>, %arg3: memref<1x32xf32, #tpu.memory_space<vmem>>, %arg4: memref<1x32xf32, #tpu.memory_space<vmem>>, %arg5: memref<16x32xf32, #tpu.memory_space<vmem>>) attributes {dimension_semantics = [#tpu.dimension_semantics<parallel>], iteration_bounds = array<i64: 1>, scalar_prefetch = 0 : i64, scratch_operands = 0 : i64, tpu.core_type = #tpu.core_type<tc>, window_params = [{transform_indices = @transform_0, window_bounds = array<i64: 16, 32>}, {transform_indices = @transform_1, window_bounds = array<i64: 16, 32>}, {pipeline_mode = #tpu.pipeline_mode<synchronous>, transform_indices = @transform_2, window_bounds = array<i64: 1, 32>}, {pipeline_mode = #tpu.pipeline_mode<synchronous>, transform_indices = @transform_3, window_bounds = array<i64: 1, 32>}, {transform_indices = @transform_4, window_bounds = array<i64: 16, 32>}]} {
    %c0 = arith.constant 0 : index
    %c0_0 = arith.constant 0 : index
    %0 = vector.load %arg1[%c0, %c0_0] : memref<16x32xf32, #tpu.memory_space<vmem>>, vector<16x32xf32>
    %c0_1 = arith.constant 0 : index
    %c0_2 = arith.constant 0 : index
    %1 = vector.load %arg2[%c0_1, %c0_2] : memref<16x32xf32, #tpu.memory_space<vmem>>, vector<16x32xf32>
    %2 = arith.addf %0, %1 : vector<16x32xf32>
    %cst = arith.constant dense<0.000000e+00> : vector<16xf32>
    %3 = vector.multi_reduction <add>, %2, %cst [1] : vector<16x32xf32> to vector<16xf32>
    %4 = vector.shape_cast %3 : vector<16xf32> to vector<16x1xf32>
    %cst_3 = arith.constant 3.200000e+01 : f32
    %5 = vector.broadcast %cst_3 : f32 to vector<16x1xf32>
    %6 = arith.divf %4, %5 : vector<16x1xf32>
    %7 = vector.broadcast %6 : vector<16x1xf32> to vector<16x32xf32>
    %8 = arith.subf %2, %7 : vector<16x32xf32>
    %9 = arith.mulf %8, %8 : vector<16x32xf32>
    %cst_4 = arith.constant dense<0.000000e+00> : vector<16xf32>
    %10 = vector.multi_reduction <add>, %9, %cst_4 [1] : vector<16x32xf32> to vector<16xf32>
    %11 = vector.shape_cast %10 : vector<16xf32> to vector<16x1xf32>
    %cst_5 = arith.constant 3.200000e+01 : f32
    %12 = vector.broadcast %cst_5 : f32 to vector<16x1xf32>
    %13 = arith.divf %11, %12 : vector<16x1xf32>
    %14 = vector.broadcast %6 : vector<16x1xf32> to vector<16x32xf32>
    %15 = arith.subf %2, %14 : vector<16x32xf32>
    %cst_6 = arith.constant 9.99999974E-6 : f32
    %16 = vector.broadcast %cst_6 : f32 to vector<16x1xf32>
    %17 = arith.addf %13, %16 : vector<16x1xf32>
    %18 = math.rsqrt %17 : vector<16x1xf32>
    %19 = vector.broadcast %18 : vector<16x1xf32> to vector<16x32xf32>
    %20 = arith.mulf %15, %19 : vector<16x32xf32>
    %c0_7 = arith.constant 0 : index
    %c0_8 = arith.constant 0 : index
    %21 = vector.load %arg3[%c0_7, %c0_8] : memref<1x32xf32, #tpu.memory_space<vmem>>, vector<1x32xf32>
    %22 = vector.broadcast %21 : vector<1x32xf32> to vector<16x32xf32>
    %23 = arith.mulf %20, %22 : vector<16x32xf32>
    %c0_9 = arith.constant 0 : index
    %c0_10 = arith.constant 0 : index
    %24 = vector.load %arg4[%c0_9, %c0_10] : memref<1x32xf32, #tpu.memory_space<vmem>>, vector<1x32xf32>
    %25 = vector.broadcast %24 : vector<1x32xf32> to vector<16x32xf32>
    %26 = arith.addf %23, %25 : vector<16x32xf32>
    %c0_11 = arith.constant 0 : index
    %c0_12 = arith.constant 0 : index
    %27 = vector.load %arg5[%c0_11, %c0_12] : memref<16x32xf32, #tpu.memory_space<vmem>>, vector<16x32xf32>
    tpu.vector_store %arg5[%c0_11, %c0_12], %26 {strides = array<i32>} : memref<16x32xf32, #tpu.memory_space<vmem>>, vector<16x32xf32>,
    return
  }
  func.func @transform_0(%arg0: i32) -> (i32, i32) {
    %c0_i32 = arith.constant 0 : i32
    %c0_i32_0 = arith.constant 0 : i32
    return %arg0, %c0_i32 : i32, i32
  }
  func.func @transform_1(%arg0: i32) -> (i32, i32) {
    %c0_i32 = arith.constant 0 : i32
    %c0_i32_0 = arith.constant 0 : i32
    return %arg0, %c0_i32 : i32, i32
  }
  func.func @transform_2(%arg0: i32) -> (i32, i32) {
    %c0_i32 = arith.constant 0 : i32
    %c0_i32_0 = arith.constant 0 : i32
    %c0_i32_1 = arith.constant 0 : i32
    return %c0_i32, %c0_i32_0 : i32, i32
  }
  func.func @transform_3(%arg0: i32) -> (i32, i32) {
    %c0_i32 = arith.constant 0 : i32
    %c0_i32_0 = arith.constant 0 : i32
    %c0_i32_1 = arith.constant 0 : i32
    return %c0_i32, %c0_i32_0 : i32, i32
  }
  func.func @transform_4(%arg0: i32) -> (i32, i32) {
    %c0_i32 = arith.constant 0 : i32
    %c0_i32_0 = arith.constant 0 : i32
    return %arg0, %c0_i32 : i32, i32
  }
}

module attributes {stable_mosaic.version = 11 : i64} {
  func.func @_matmul_kernel(%arg0: i32, %arg1: i32, %arg2: i32, %arg3: memref<16x32xbf16, #tpu.memory_space<vmem>>, %arg4: memref<32x64xbf16, #tpu.memory_space<vmem>>, %arg5: memref<1x64xf32, #tpu.memory_space<vmem>>, %arg6: memref<16x64xf32, #tpu.memory_space<vmem>>, %arg7: memref<16x64xf32, #tpu.memory_space<vmem>>) attributes {dimension_semantics = [#tpu.dimension_semantics<parallel>, #tpu.dimension_semantics<parallel>, #tpu.dimension_semantics<arbitrary>], iteration_bounds = array<i64: 1, 1, 1>, scalar_prefetch = 0 : i64, scratch_operands = 1 : i64, tpu.core_type = #tpu.core_type<tc>, window_params = [{transform_indices = @transform_0, window_bounds = array<i64: 16, 32>}, {transform_indices = @transform_1, window_bounds = array<i64: 32, 64>}, {transform_indices = @transform_2, window_bounds = array<i64: 1, 64>}, {transform_indices = @transform_3, window_bounds = array<i64: 16, 64>}]} {
    %c0_i32 = arith.constant 0 : i32
    %0 = arith.cmpi eq, %arg2, %c0_i32 : i32
    %1 = arith.extui %0 : i1 to i32
    %c0_i32_0 = arith.constant 0 : i32
    %2 = arith.cmpi ne, %1, %c0_i32_0 : i32
    scf.if %2 {
      %cst_10 = arith.constant 0.000000e+00 : f32
      %12 = vector.broadcast %cst_10 : f32 to vector<16x64xf32>
      %c0_11 = arith.constant 0 : index
      %c0_12 = arith.constant 0 : index
      %13 = vector.load %arg7[%c0_11, %c0_12] : memref<16x64xf32, #tpu.memory_space<vmem>>, vector<16x64xf32>
      tpu.vector_store %arg7[%c0_11, %c0_12], %12 {strides = array<i32>} : memref<16x64xf32, #tpu.memory_space<vmem>>, vector<16x64xf32>,
    } else {
    }
    %c0 = arith.constant 0 : index
    %c0_1 = arith.constant 0 : index
    %3 = vector.load %arg7[%c0, %c0_1] : memref<16x64xf32, #tpu.memory_space<vmem>>, vector<16x64xf32>
    %c0_2 = arith.constant 0 : index
    %c0_3 = arith.constant 0 : index
    %4 = vector.load %arg3[%c0_2, %c0_3] : memref<16x32xbf16, #tpu.memory_space<vmem>>, vector<16x32xbf16>
    %c0_4 = arith.constant 0 : index
    %c0_5 = arith.constant 0 : index
    %5 = vector.load %arg4[%c0_4, %c0_5] : memref<32x64xbf16, #tpu.memory_space<vmem>>, vector<32x64xbf16>
    %cst = arith.constant dense<0.000000e+00> : vector<16x64xf32>
    %6 = tpu.matmul %4, %5, %cst {dimension_numbers = #tpu.dot_dimension_numbers<[1], [0], [0], [1], [0, 0, 1, 1], [], []>} : vector<16x32xbf16>, vector<32x64xbf16>, vector<16x64xf32> -> vector<16x64xf32>
    %7 = arith.addf %3, %6 : vector<16x64xf32>
    %c0_6 = arith.constant 0 : index
    %c0_7 = arith.constant 0 : index
    %8 = vector.load %arg7[%c0_6, %c0_7] : memref<16x64xf32, #tpu.memory_space<vmem>>, vector<16x64xf32>
    tpu.vector_store %arg7[%c0_6, %c0_7], %7 {strides = array<i32>} : memref<16x64xf32, #tpu.memory_space<vmem>>, vector<16x64xf32>,
    %c0_i32_8 = arith.constant 0 : i32
    %9 = arith.cmpi eq, %arg2, %c0_i32_8 : i32
    %10 = arith.extui %9 : i1 to i32
    %c0_i32_9 = arith.constant 0 : i32
    %11 = arith.cmpi ne, %10, %c0_i32_9 : i32
    scf.if %11 {
      %c0_10 = arith.constant 0 : index
      %c0_11 = arith.constant 0 : index
      %12 = vector.load %arg7[%c0_10, %c0_11] : memref<16x64xf32, #tpu.memory_space<vmem>>, vector<16x64xf32>
      %c0_12 = arith.constant 0 : index
      %c0_13 = arith.constant 0 : index
      %13 = vector.load %arg5[%c0_12, %c0_13] : memref<1x64xf32, #tpu.memory_space<vmem>>, vector<1x64xf32>
      %14 = vector.broadcast %13 : vector<1x64xf32> to vector<16x64xf32>
      %15 = arith.addf %12, %14 : vector<16x64xf32>
      %cst_14 = arith.constant 0.000000e+00 : f32
      %16 = vector.broadcast %cst_14 : f32 to vector<16x64xf32>
      %17 = arith.maximumf %15, %16 : vector<16x64xf32>
      %c0_15 = arith.constant 0 : index
      %c0_16 = arith.constant 0 : index
      %18 = vector.load %arg6[%c0_15, %c0_16] : memref<16x64xf32, #tpu.memory_space<vmem>>, vector<16x64xf32>
      tpu.vector_store %arg6[%c0_15, %c0_16], %17 {strides = array<i32>} : memref<16x64xf32, #tpu.memory_space<vmem>>, vector<16x64xf32>,
    } else {
    }
    return
  }
  func.func @transform_0(%arg0: i32, %arg1: i32, %arg2: i32) -> (i32, i32) {
    %c0_i32 = arith.constant 0 : i32
    return %arg0, %arg2 : i32, i32
  }
  func.func @transform_1(%arg0: i32, %arg1: i32, %arg2: i32) -> (i32, i32) {
    %c0_i32 = arith.constant 0 : i32
    return %arg2, %arg1 : i32, i32
  }
  func.func @transform_2(%arg0: i32, %arg1: i32, %arg2: i32) -> (i32, i32) {
    %c0_i32 = arith.constant 0 : i32
    %c0_i32_0 = arith.constant 0 : i32
    return %c0_i32, %arg1 : i32, i32
  }
  func.func @transform_3(%arg0: i32, %arg1: i32, %arg2: i32) -> (i32, i32) {
    %c0_i32 = arith.constant 0 : i32
    return %arg0, %arg1 : i32, i32
  }
}

module attributes {stable_mosaic.version = 11 : i64} {
  func.func @_matmul_kernel(%arg0: i32, %arg1: i32, %arg2: i32, %arg3: memref<16x32xbf16, #tpu.memory_space<vmem>>, %arg4: memref<32x16xbf16, #tpu.memory_space<vmem>>, %arg5: memref<1x16xf32, #tpu.memory_space<vmem>>, %arg6: memref<16x16xf32, #tpu.memory_space<vmem>>, %arg7: memref<16x16xf32, #tpu.memory_space<vmem>>) attributes {dimension_semantics = [#tpu.dimension_semantics<parallel>, #tpu.dimension_semantics<parallel>, #tpu.dimension_semantics<arbitrary>], iteration_bounds = array<i64: 1, 1, 1>, scalar_prefetch = 0 : i64, scratch_operands = 1 : i64, tpu.core_type = #tpu.core_type<tc>, window_params = [{transform_indices = @transform_0, window_bounds = array<i64: 16, 32>}, {transform_indices = @transform_1, window_bounds = array<i64: 32, 16>}, {transform_indices = @transform_2, window_bounds = array<i64: 1, 16>}, {transform_indices = @transform_3, window_bounds = array<i64: 16, 16>}]} {
    %c0_i32 = arith.constant 0 : i32
    %0 = arith.cmpi eq, %arg2, %c0_i32 : i32
    %1 = arith.extui %0 : i1 to i32
    %c0_i32_0 = arith.constant 0 : i32
    %2 = arith.cmpi ne, %1, %c0_i32_0 : i32
    scf.if %2 {
      %cst_10 = arith.constant 0.000000e+00 : f32
      %12 = vector.broadcast %cst_10 : f32 to vector<16x16xf32>
      %c0_11 = arith.constant 0 : index
      %c0_12 = arith.constant 0 : index
      %13 = vector.load %arg7[%c0_11, %c0_12] : memref<16x16xf32, #tpu.memory_space<vmem>>, vector<16x16xf32>
      tpu.vector_store %arg7[%c0_11, %c0_12], %12 {strides = array<i32>} : memref<16x16xf32, #tpu.memory_space<vmem>>, vector<16x16xf32>,
    } else {
    }
    %c0 = arith.constant 0 : index
    %c0_1 = arith.constant 0 : index
    %3 = vector.load %arg7[%c0, %c0_1] : memref<16x16xf32, #tpu.memory_space<vmem>>, vector<16x16xf32>
    %c0_2 = arith.constant 0 : index
    %c0_3 = arith.constant 0 : index
    %4 = vector.load %arg3[%c0_2, %c0_3] : memref<16x32xbf16, #tpu.memory_space<vmem>>, vector<16x32xbf16>
    %c0_4 = arith.constant 0 : index
    %c0_5 = arith.constant 0 : index
    %5 = vector.load %arg4[%c0_4, %c0_5] : memref<32x16xbf16, #tpu.memory_space<vmem>>, vector<32x16xbf16>
    %cst = arith.constant dense<0.000000e+00> : vector<16x16xf32>
    %6 = tpu.matmul %4, %5, %cst {dimension_numbers = #tpu.dot_dimension_numbers<[1], [0], [0], [1], [0, 0, 1, 1], [], []>} : vector<16x32xbf16>, vector<32x16xbf16>, vector<16x16xf32> -> vector<16x16xf32>
    %7 = arith.addf %3, %6 : vector<16x16xf32>
    %c0_6 = arith.constant 0 : index
    %c0_7 = arith.constant 0 : index
    %8 = vector.load %arg7[%c0_6, %c0_7] : memref<16x16xf32, #tpu.memory_space<vmem>>, vector<16x16xf32>
    tpu.vector_store %arg7[%c0_6, %c0_7], %7 {strides = array<i32>} : memref<16x16xf32, #tpu.memory_space<vmem>>, vector<16x16xf32>,
    %c0_i32_8 = arith.constant 0 : i32
    %9 = arith.cmpi eq, %arg2, %c0_i32_8 : i32
    %10 = arith.extui %9 : i1 to i32
    %c0_i32_9 = arith.constant 0 : i32
    %11 = arith.cmpi ne, %10, %c0_i32_9 : i32
    scf.if %11 {
      %c0_10 = arith.constant 0 : index
      %c0_11 = arith.constant 0 : index
      %12 = vector.load %arg7[%c0_10, %c0_11] : memref<16x16xf32, #tpu.memory_space<vmem>>, vector<16x16xf32>
      %c0_12 = arith.constant 0 : index
      %c0_13 = arith.constant 0 : index
      %13 = vector.load %arg5[%c0_12, %c0_13] : memref<1x16xf32, #tpu.memory_space<vmem>>, vector<1x16xf32>
      %14 = vector.broadcast %13 : vector<1x16xf32> to vector<16x16xf32>
      %15 = arith.addf %12, %14 : vector<16x16xf32>
      %c0_14 = arith.constant 0 : index
      %c0_15 = arith.constant 0 : index
      %16 = vector.load %arg6[%c0_14, %c0_15] : memref<16x16xf32, #tpu.memory_space<vmem>>, vector<16x16xf32>
      tpu.vector_store %arg6[%c0_14, %c0_15], %15 {strides = array<i32>} : memref<16x16xf32, #tpu.memory_space<vmem>>, vector<16x16xf32>,
    } else {
    }
    return
  }
  func.func @transform_0(%arg0: i32, %arg1: i32, %arg2: i32) -> (i32, i32) {
    %c0_i32 = arith.constant 0 : i32
    return %arg0, %arg2 : i32, i32
  }
  func.func @transform_1(%arg0: i32, %arg1: i32, %arg2: i32) -> (i32, i32) {
    %c0_i32 = arith.constant 0 : i32
    return %arg2, %arg1 : i32, i32
  }
  func.func @transform_2(%arg0: i32, %arg1: i32, %arg2: i32) -> (i32, i32) {
    %c0_i32 = arith.constant 0 : i32
    %c0_i32_0 = arith.constant 0 : i32
    return %c0_i32, %arg1 : i32, i32
  }
  func.func @transform_3(%arg0: i32, %arg1: i32, %arg2: i32) -> (i32, i32) {
    %c0_i32 = arith.constant 0 : i32
    return %arg0, %arg1 : i32, i32
  }
}

module attributes {stable_mosaic.version = 11 : i64} {
  func.func @_matmul_kernel(%arg0: i32, %arg1: i32, %arg2: i32, %arg3: memref<16x64xbf16, #tpu.memory_space<vmem>>, %arg4: memref<64x32xbf16, #tpu.memory_space<vmem>>, %arg5: memref<1x32xf32, #tpu.memory_space<vmem>>, %arg6: memref<16x32xf32, #tpu.memory_space<vmem>>, %arg7: memref<16x32xf32, #tpu.memory_space<vmem>>) attributes {dimension_semantics = [#tpu.dimension_semantics<parallel>, #tpu.dimension_semantics<parallel>, #tpu.dimension_semantics<arbitrary>], iteration_bounds = array<i64: 1, 1, 1>, scalar_prefetch = 0 : i64, scratch_operands = 1 : i64, tpu.core_type = #tpu.core_type<tc>, window_params = [{transform_indices = @transform_0, window_bounds = array<i64: 16, 64>}, {transform_indices = @transform_1, window_bounds = array<i64: 64, 32>}, {transform_indices = @transform_2, window_bounds = array<i64: 1, 32>}, {transform_indices = @transform_3, window_bounds = array<i64: 16, 32>}]} {
    %c0_i32 = arith.constant 0 : i32
    %0 = arith.cmpi eq, %arg2, %c0_i32 : i32
    %1 = arith.extui %0 : i1 to i32
    %c0_i32_0 = arith.constant 0 : i32
    %2 = arith.cmpi ne, %1, %c0_i32_0 : i32
    scf.if %2 {
      %cst_10 = arith.constant 0.000000e+00 : f32
      %12 = vector.broadcast %cst_10 : f32 to vector<16x32xf32>
      %c0_11 = arith.constant 0 : index
      %c0_12 = arith.constant 0 : index
      %13 = vector.load %arg7[%c0_11, %c0_12] : memref<16x32xf32, #tpu.memory_space<vmem>>, vector<16x32xf32>
      tpu.vector_store %arg7[%c0_11, %c0_12], %12 {strides = array<i32>} : memref<16x32xf32, #tpu.memory_space<vmem>>, vector<16x32xf32>,
    } else {
    }
    %c0 = arith.constant 0 : index
    %c0_1 = arith.constant 0 : index
    %3 = vector.load %arg7[%c0, %c0_1] : memref<16x32xf32, #tpu.memory_space<vmem>>, vector<16x32xf32>
    %c0_2 = arith.constant 0 : index
    %c0_3 = arith.constant 0 : index
    %4 = vector.load %arg3[%c0_2, %c0_3] : memref<16x64xbf16, #tpu.memory_space<vmem>>, vector<16x64xbf16>
    %c0_4 = arith.constant 0 : index
    %c0_5 = arith.constant 0 : index
    %5 = vector.load %arg4[%c0_4, %c0_5] : memref<64x32xbf16, #tpu.memory_space<vmem>>, vector<64x32xbf16>
    %cst = arith.constant dense<0.000000e+00> : vector<16x32xf32>
    %6 = tpu.matmul %4, %5, %cst {dimension_numbers = #tpu.dot_dimension_numbers<[1], [0], [0], [1], [0, 0, 1, 1], [], []>} : vector<16x64xbf16>, vector<64x32xbf16>, vector<16x32xf32> -> vector<16x32xf32>
    %7 = arith.addf %3, %6 : vector<16x32xf32>
    %c0_6 = arith.constant 0 : index
    %c0_7 = arith.constant 0 : index
    %8 = vector.load %arg7[%c0_6, %c0_7] : memref<16x32xf32, #tpu.memory_space<vmem>>, vector<16x32xf32>
    tpu.vector_store %arg7[%c0_6, %c0_7], %7 {strides = array<i32>} : memref<16x32xf32, #tpu.memory_space<vmem>>, vector<16x32xf32>,
    %c0_i32_8 = arith.constant 0 : i32
    %9 = arith.cmpi eq, %arg2, %c0_i32_8 : i32
    %10 = arith.extui %9 : i1 to i32
    %c0_i32_9 = arith.constant 0 : i32
    %11 = arith.cmpi ne, %10, %c0_i32_9 : i32
    scf.if %11 {
      %c0_10 = arith.constant 0 : index
      %c0_11 = arith.constant 0 : index
      %12 = vector.load %arg7[%c0_10, %c0_11] : memref<16x32xf32, #tpu.memory_space<vmem>>, vector<16x32xf32>
      %c0_12 = arith.constant 0 : index
      %c0_13 = arith.constant 0 : index
      %13 = vector.load %arg5[%c0_12, %c0_13] : memref<1x32xf32, #tpu.memory_space<vmem>>, vector<1x32xf32>
      %14 = vector.broadcast %13 : vector<1x32xf32> to vector<16x32xf32>
      %15 = arith.addf %12, %14 : vector<16x32xf32>
      %c0_14 = arith.constant 0 : index
      %c0_15 = arith.constant 0 : index
      %16 = vector.load %arg6[%c0_14, %c0_15] : memref<16x32xf32, #tpu.memory_space<vmem>>, vector<16x32xf32>
      tpu.vector_store %arg6[%c0_14, %c0_15], %15 {strides = array<i32>} : memref<16x32xf32, #tpu.memory_space<vmem>>, vector<16x32xf32>,
    } else {
    }
    return
  }
  func.func @transform_0(%arg0: i32, %arg1: i32, %arg2: i32) -> (i32, i32) {
    %c0_i32 = arith.constant 0 : i32
    return %arg0, %arg2 : i32, i32
  }
  func.func @transform_1(%arg0: i32, %arg1: i32, %arg2: i32) -> (i32, i32) {
    %c0_i32 = arith.constant 0 : i32
    return %arg2, %arg1 : i32, i32
  }
  func.func @transform_2(%arg0: i32, %arg1: i32, %arg2: i32) -> (i32, i32) {
    %c0_i32 = arith.constant 0 : i32
    %c0_i32_0 = arith.constant 0 : i32
    return %c0_i32, %arg1 : i32, i32
  }
  func.func @transform_3(%arg0: i32, %arg1: i32, %arg2: i32) -> (i32, i32) {
    %c0_i32 = arith.constant 0 : i32
    return %arg0, %arg1 : i32, i32
  }
}

module attributes {stable_mosaic.version = 11 : i64} {
  func.func @_matmul_kernel(%arg0: i32, %arg1: i32, %arg2: i32, %arg3: memref<16x16xbf16, #tpu.memory_space<vmem>>, %arg4: memref<16x64xbf16, #tpu.memory_space<vmem>>, %arg5: memref<16x64xf32, #tpu.memory_space<vmem>>, %arg6: memref<16x64xf32, #tpu.memory_space<vmem>>) attributes {dimension_semantics = [#tpu.dimension_semantics<parallel>, #tpu.dimension_semantics<parallel>, #tpu.dimension_semantics<arbitrary>], iteration_bounds = array<i64: 1, 1, 1>, scalar_prefetch = 0 : i64, scratch_operands = 1 : i64, tpu.core_type = #tpu.core_type<tc>, window_params = [{transform_indices = @transform_0, window_bounds = array<i64: 16, 16>}, {transform_indices = @transform_1, window_bounds = array<i64: 16, 64>}, {transform_indices = @transform_2, window_bounds = array<i64: 16, 64>}]} {
    %c0_i32 = arith.constant 0 : i32
    %0 = arith.cmpi eq, %arg2, %c0_i32 : i32
    %1 = arith.extui %0 : i1 to i32
    %c0_i32_0 = arith.constant 0 : i32
    %2 = arith.cmpi ne, %1, %c0_i32_0 : i32
    scf.if %2 {
      %cst_10 = arith.constant 0.000000e+00 : f32
      %12 = vector.broadcast %cst_10 : f32 to vector<16x64xf32>
      %c0_11 = arith.constant 0 : index
      %c0_12 = arith.constant 0 : index
      %13 = vector.load %arg6[%c0_11, %c0_12] : memref<16x64xf32, #tpu.memory_space<vmem>>, vector<16x64xf32>
      tpu.vector_store %arg6[%c0_11, %c0_12], %12 {strides = array<i32>} : memref<16x64xf32, #tpu.memory_space<vmem>>, vector<16x64xf32>,
    } else {
    }
    %c0 = arith.constant 0 : index
    %c0_1 = arith.constant 0 : index
    %3 = vector.load %arg6[%c0, %c0_1] : memref<16x64xf32, #tpu.memory_space<vmem>>, vector<16x64xf32>
    %c0_2 = arith.constant 0 : index
    %c0_3 = arith.constant 0 : index
    %4 = vector.load %arg3[%c0_2, %c0_3] : memref<16x16xbf16, #tpu.memory_space<vmem>>, vector<16x16xbf16>
    %c0_4 = arith.constant 0 : index
    %c0_5 = arith.constant 0 : index
    %5 = vector.load %arg4[%c0_4, %c0_5] : memref<16x64xbf16, #tpu.memory_space<vmem>>, vector<16x64xbf16>
    %cst = arith.constant dense<0.000000e+00> : vector<16x64xf32>
    %6 = tpu.matmul %4, %5, %cst {dimension_numbers = #tpu.dot_dimension_numbers<[1], [0], [0], [1], [0, 0, 1, 1], [], []>} : vector<16x16xbf16>, vector<16x64xbf16>, vector<16x64xf32> -> vector<16x64xf32>
    %7 = arith.addf %3, %6 : vector<16x64xf32>
    %c0_6 = arith.constant 0 : index
    %c0_7 = arith.constant 0 : index
    %8 = vector.load %arg6[%c0_6, %c0_7] : memref<16x64xf32, #tpu.memory_space<vmem>>, vector<16x64xf32>
    tpu.vector_store %arg6[%c0_6, %c0_7], %7 {strides = array<i32>} : memref<16x64xf32, #tpu.memory_space<vmem>>, vector<16x64xf32>,
    %c0_i32_8 = arith.constant 0 : i32
    %9 = arith.cmpi eq, %arg2, %c0_i32_8 : i32
    %10 = arith.extui %9 : i1 to i32
    %c0_i32_9 = arith.constant 0 : i32
    %11 = arith.cmpi ne, %10, %c0_i32_9 : i32
    scf.if %11 {
      %c0_10 = arith.constant 0 : index
      %c0_11 = arith.constant 0 : index
      %12 = vector.load %arg6[%c0_10, %c0_11] : memref<16x64xf32, #tpu.memory_space<vmem>>, vector<16x64xf32>
      %c0_12 = arith.constant 0 : index
      %c0_13 = arith.constant 0 : index
      %13 = vector.load %arg5[%c0_12, %c0_13] : memref<16x64xf32, #tpu.memory_space<vmem>>, vector<16x64xf32>
      tpu.vector_store %arg5[%c0_12, %c0_13], %12 {strides = array<i32>} : memref<16x64xf32, #tpu.memory_space<vmem>>, vector<16x64xf32>,
    } else {
    }
    return
  }
  func.func @transform_0(%arg0: i32, %arg1: i32, %arg2: i32) -> (i32, i32) {
    %c0_i32 = arith.constant 0 : i32
    return %arg0, %arg2 : i32, i32
  }
  func.func @transform_1(%arg0: i32, %arg1: i32, %arg2: i32) -> (i32, i32) {
    %c0_i32 = arith.constant 0 : i32
    return %arg2, %arg1 : i32, i32
  }
  func.func @transform_2(%arg0: i32, %arg1: i32, %arg2: i32) -> (i32, i32) {
    %c0_i32 = arith.constant 0 : i32
    return %arg0, %arg1 : i32, i32
  }
}

module attributes {stable_mosaic.version = 11 : i64} {
  func.func @_matmul_kernel(%arg0: i32, %arg1: i32, %arg2: i32, %arg3: memref<32x16xbf16, #tpu.memory_space<vmem>>, %arg4: memref<16x32xbf16, #tpu.memory_space<vmem>>, %arg5: memref<32x32xf32, #tpu.memory_space<vmem>>, %arg6: memref<32x32xf32, #tpu.memory_space<vmem>>) attributes {dimension_semantics = [#tpu.dimension_semantics<parallel>, #tpu.dimension_semantics<parallel>, #tpu.dimension_semantics<arbitrary>], iteration_bounds = array<i64: 1, 1, 1>, scalar_prefetch = 0 : i64, scratch_operands = 1 : i64, tpu.core_type = #tpu.core_type<tc>, window_params = [{transform_indices = @transform_0, window_bounds = array<i64: 32, 16>}, {transform_indices = @transform_1, window_bounds = array<i64: 16, 32>}, {transform_indices = @transform_2, window_bounds = array<i64: 32, 32>}]} {
    %c0_i32 = arith.constant 0 : i32
    %0 = arith.cmpi eq, %arg2, %c0_i32 : i32
    %1 = arith.extui %0 : i1 to i32
    %c0_i32_0 = arith.constant 0 : i32
    %2 = arith.cmpi ne, %1, %c0_i32_0 : i32
    scf.if %2 {
      %cst_10 = arith.constant 0.000000e+00 : f32
      %12 = vector.broadcast %cst_10 : f32 to vector<32x32xf32>
      %c0_11 = arith.constant 0 : index
      %c0_12 = arith.constant 0 : index
      %13 = vector.load %arg6[%c0_11, %c0_12] : memref<32x32xf32, #tpu.memory_space<vmem>>, vector<32x32xf32>
      tpu.vector_store %arg6[%c0_11, %c0_12], %12 {strides = array<i32>} : memref<32x32xf32, #tpu.memory_space<vmem>>, vector<32x32xf32>,
    } else {
    }
    %c0 = arith.constant 0 : index
    %c0_1 = arith.constant 0 : index
    %3 = vector.load %arg6[%c0, %c0_1] : memref<32x32xf32, #tpu.memory_space<vmem>>, vector<32x32xf32>
    %c0_2 = arith.constant 0 : index
    %c0_3 = arith.constant 0 : index
    %4 = vector.load %arg3[%c0_2, %c0_3] : memref<32x16xbf16, #tpu.memory_space<vmem>>, vector<32x16xbf16>
    %c0_4 = arith.constant 0 : index
    %c0_5 = arith.constant 0 : index
    %5 = vector.load %arg4[%c0_4, %c0_5] : memref<16x32xbf16, #tpu.memory_space<vmem>>, vector<16x32xbf16>
    %cst = arith.constant dense<0.000000e+00> : vector<32x32xf32>
    %6 = tpu.matmul %4, %5, %cst {dimension_numbers = #tpu.dot_dimension_numbers<[1], [0], [0], [1], [0, 0, 1, 1], [], []>} : vector<32x16xbf16>, vector<16x32xbf16>, vector<32x32xf32> -> vector<32x32xf32>
    %7 = arith.addf %3, %6 : vector<32x32xf32>
    %c0_6 = arith.constant 0 : index
    %c0_7 = arith.constant 0 : index
    %8 = vector.load %arg6[%c0_6, %c0_7] : memref<32x32xf32, #tpu.memory_space<vmem>>, vector<32x32xf32>
    tpu.vector_store %arg6[%c0_6, %c0_7], %7 {strides = array<i32>} : memref<32x32xf32, #tpu.memory_space<vmem>>, vector<32x32xf32>,
    %c0_i32_8 = arith.constant 0 : i32
    %9 = arith.cmpi eq, %arg2, %c0_i32_8 : i32
    %10 = arith.extui %9 : i1 to i32
    %c0_i32_9 = arith.constant 0 : i32
    %11 = arith.cmpi ne, %10, %c0_i32_9 : i32
    scf.if %11 {
      %c0_10 = arith.constant 0 : index
      %c0_11 = arith.constant 0 : index
      %12 = vector.load %arg6[%c0_10, %c0_11] : memref<32x32xf32, #tpu.memory_space<vmem>>, vector<32x32xf32>
      %c0_12 = arith.constant 0 : index
      %c0_13 = arith.constant 0 : index
      %13 = vector.load %arg5[%c0_12, %c0_13] : memref<32x32xf32, #tpu.memory_space<vmem>>, vector<32x32xf32>
      tpu.vector_store %arg5[%c0_12, %c0_13], %12 {strides = array<i32>} : memref<32x32xf32, #tpu.memory_space<vmem>>, vector<32x32xf32>,
    } else {
    }
    return
  }
  func.func @transform_0(%arg0: i32, %arg1: i32, %arg2: i32) -> (i32, i32) {
    %c0_i32 = arith.constant 0 : i32
    return %arg0, %arg2 : i32, i32
  }
  func.func @transform_1(%arg0: i32, %arg1: i32, %arg2: i32) -> (i32, i32) {
    %c0_i32 = arith.constant 0 : i32
    return %arg2, %arg1 : i32, i32
  }
  func.func @transform_2(%arg0: i32, %arg1: i32, %arg2: i32) -> (i32, i32) {
    %c0_i32 = arith.constant 0 : i32
    return %arg0, %arg1 : i32, i32
  }
}

module attributes {stable_mosaic.version = 11 : i64} {
  func.func @_matmul_kernel(%arg0: i32, %arg1: i32, %arg2: i32, %arg3: memref<64x8xbf16, #tpu.memory_space<vmem>>, %arg4: memref<8x4xbf16, #tpu.memory_space<vmem>>, %arg5: memref<64x4xf32, #tpu.memory_space<vmem>>, %arg6: memref<64x4xf32, #tpu.memory_space<vmem>>) attributes {dimension_semantics = [#tpu.dimension_semantics<parallel>, #tpu.dimension_semantics<parallel>, #tpu.dimension_semantics<arbitrary>], iteration_bounds = array<i64: 1, 1, 1>, scalar_prefetch = 0 : i64, scratch_operands = 1 : i64, tpu.core_type = #tpu.core_type<tc>, window_params = [{transform_indices = @transform_0, window_bounds = array<i64: 64, 8>}, {transform_indices = @transform_1, window_bounds = array<i64: 8, 4>}, {transform_indices = @transform_2, window_bounds = array<i64: 64, 4>}]} {
    %c0_i32 = arith.constant 0 : i32
    %0 = arith.cmpi eq, %arg2, %c0_i32 : i32
    %1 = arith.extui %0 : i1 to i32
    %c0_i32_0 = arith.constant 0 : i32
    %2 = arith.cmpi ne, %1, %c0_i32_0 : i32
    scf.if %2 {
      %cst_10 = arith.constant 0.000000e+00 : f32
      %12 = vector.broadcast %cst_10 : f32 to vector<64x4xf32>
      %c0_11 = arith.constant 0 : index
      %c0_12 = arith.constant 0 : index
      %13 = vector.load %arg6[%c0_11, %c0_12] : memref<64x4xf32, #tpu.memory_space<vmem>>, vector<64x4xf32>
      tpu.vector_store %arg6[%c0_11, %c0_12], %12 {strides = array<i32>} : memref<64x4xf32, #tpu.memory_space<vmem>>, vector<64x4xf32>,
    } else {
    }
    %c0 = arith.constant 0 : index
    %c0_1 = arith.constant 0 : index
    %3 = vector.load %arg6[%c0, %c0_1] : memref<64x4xf32, #tpu.memory_space<vmem>>, vector<64x4xf32>
    %c0_2 = arith.constant 0 : index
    %c0_3 = arith.constant 0 : index
    %4 = vector.load %arg3[%c0_2, %c0_3] : memref<64x8xbf16, #tpu.memory_space<vmem>>, vector<64x8xbf16>
    %c0_4 = arith.constant 0 : index
    %c0_5 = arith.constant 0 : index
    %5 = vector.load %arg4[%c0_4, %c0_5] : memref<8x4xbf16, #tpu.memory_space<vmem>>, vector<8x4xbf16>
    %cst = arith.constant dense<0.000000e+00> : vector<64x4xf32>
    %6 = tpu.matmul %4, %5, %cst {dimension_numbers = #tpu.dot_dimension_numbers<[1], [0], [0], [1], [0, 0, 1, 1], [], []>} : vector<64x8xbf16>, vector<8x4xbf16>, vector<64x4xf32> -> vector<64x4xf32>
    %7 = arith.addf %3, %6 : vector<64x4xf32>
    %c0_6 = arith.constant 0 : index
    %c0_7 = arith.constant 0 : index
    %8 = vector.load %arg6[%c0_6, %c0_7] : memref<64x4xf32, #tpu.memory_space<vmem>>, vector<64x4xf32>
    tpu.vector_store %arg6[%c0_6, %c0_7], %7 {strides = array<i32>} : memref<64x4xf32, #tpu.memory_space<vmem>>, vector<64x4xf32>,
    %c0_i32_8 = arith.constant 0 : i32
    %9 = arith.cmpi eq, %arg2, %c0_i32_8 : i32
    %10 = arith.extui %9 : i1 to i32
    %c0_i32_9 = arith.constant 0 : i32
    %11 = arith.cmpi ne, %10, %c0_i32_9 : i32
    scf.if %11 {
      %c0_10 = arith.constant 0 : index
      %c0_11 = arith.constant 0 : index
      %12 = vector.load %arg6[%c0_10, %c0_11] : memref<64x4xf32, #tpu.memory_space<vmem>>, vector<64x4xf32>
      %c0_12 = arith.constant 0 : index
      %c0_13 = arith.constant 0 : index
      %13 = vector.load %arg5[%c0_12, %c0_13] : memref<64x4xf32, #tpu.memory_space<vmem>>, vector<64x4xf32>
      tpu.vector_store %arg5[%c0_12, %c0_13], %12 {strides = array<i32>} : memref<64x4xf32, #tpu.memory_space<vmem>>, vector<64x4xf32>,
    } else {
    }
    return
  }
  func.func @transform_0(%arg0: i32, %arg1: i32, %arg2: i32) -> (i32, i32) {
    %c0_i32 = arith.constant 0 : i32
    return %arg0, %arg2 : i32, i32
  }
  func.func @transform_1(%arg0: i32, %arg1: i32, %arg2: i32) -> (i32, i32) {
    %c0_i32 = arith.constant 0 : i32
    return %arg2, %arg1 : i32, i32
  }
  func.func @transform_2(%arg0: i32, %arg1: i32, %arg2: i32) -> (i32, i32) {
    %c0_i32 = arith.constant 0 : i32
    return %arg0, %arg1 : i32, i32
  }
}

</mosaic_0001>

<bundles_post_ra>
// kernel: _lambda_.29
= control target key start
LH: loop header
LB: loop body
LE: loop exit
PB: predicated region body
PF: predicated region fallthrough
CT: control target
= control target key end

     0   :  { %vm78_vm0 = vcmask 1041408   ;;  %vm65_vm1 = vcmask 31744   ;;  %vm19_vm2 = vcmask 64512   ;;  %v243_v1 = vmov 0.0   ;;  %s337_s1 = inlined_call_operand.vmem [shape: bf16[4,8], index: 1, kind: input, shape index: {}]   ;;  %s338_s0 = inlined_call_operand.vmem [shape: bf16[64,4], index: 0, kind: input, shape index: {}]   ;;  %s339_s2 = inlined_call_operand.vmem [shape: f32[1,8], index: 2, kind: input, shape index: {}]   ;;  %s340_s3 = inlined_call_operand.vmem [shape: f32[64,8], index: 3, kind: output, shape index: {}]  }
   0x1   :  { %v44_v0 = vld [vmem:[%s337_s1] sm:$0x3]  ;;  %22 = vst.msk [vmem:[#allocation2 + $0x10] sm:$0xff] %vm19_vm2, %v243_v1  ;;  %20 = vst.msk [vmem:[#allocation2] sm:$0xff] %vm19_vm2, %v243_v1  ;;  %v240_v4 = vld [vmem:[%s338_s0 + $0x10] sm:$0xff]  }
   0x2   :  { %21 = vst.msk [vmem:[#allocation2 + $0x8] sm:$0xff] %vm19_vm2, %v243_v1  ;;  %23 = vst.msk [vmem:[#allocation2 + $0x18] sm:$0xff] %vm19_vm2, %v243_v1  ;;  %236 = vmatprep.subr.msk.bf16.mxu0 %vm78_vm0, %v44_v0  ;;  %237 = vmatprep.subr.msk.bf16.mxu1 %vm78_vm0, %v44_v0  ;;  %v80_v2 = vsel %vm78_vm0, %v44_v0, 0  ;;  %v239_v3 = vld [vmem:[%s338_s0] sm:$0xff]   ;;  %v241_v5 = vld [vmem:[%s338_s0 + $0x8] sm:$0xff]  }
   0x3   :  { %24 = vst.msk [vmem:[#allocation2 + $0x20] sm:$0xff] %vm19_vm2, %v243_v1  ;;  %25 = vst.msk [vmem:[#allocation2 + $0x28] sm:$0xff] %vm19_vm2, %v243_v1  ;;  %225 = vmatpush3.bf16.msra.mxu0 %v80_v2  ;;  %235 = vmatpush3.bf16.msra.mxu1 %v80_v2  ;;  %v242_v6 = vld [vmem:[%s338_s0 + $0x18] sm:$0xff]   ;;  %v218_v31 = vld [vmem:[%s339_s2] ss:$0 sm:$0xff] }
   0x4   :  { %26 = vst.msk [vmem:[#allocation2 + $0x30] sm:$0xff] %vm19_vm2, %v243_v1  ;;  %27 = vst.msk [vmem:[#allocation2 + $0x38] sm:$0xff] %vm19_vm2, %v243_v1  ;;  %226 = vmatprep.mubr.msk.bf16.mxu0 %vm65_vm1, %v239_v3  ;;  %230 = vmatprep.mubr.msk.bf16.mxu1 %vm65_vm1, %v240_v4 }
   0x6   :  { %227 = vmatmul.mubr.msk.bf16.vlgmr.msra.gmra.mrb[0].mxu0 %vm65_vm1, %v241_v5  ;;  %231 = vmatmul.mubr.msk.bf16.vlgmr.msra.gmra.mrb[0].mxu1 %vm65_vm1, %v242_v6 }
   0x8   :  { %v30_v7 = vld [vmem:[#allocation2 + $0x10] sm:$0xff]  ;;  %v28_v9 = vld [vmem:[#allocation2] sm:$0xff] }
   0x9   :  { %v31_v12 = vld [vmem:[#allocation2 + $0x18] sm:$0xff]  ;;  %v29_v17 = vld [vmem:[#allocation2 + $0x8] sm:$0xff] }
   0xa   :  { %v32_v11 = vld [vmem:[#allocation2 + $0x20] sm:$0xff]  ;;  %v33_v22 = vld [vmem:[#allocation2 + $0x28] sm:$0xff] }
   0xb   :  { %v34_v8 = vld [vmem:[#allocation2 + $0x30] sm:$0xff]  ;;  %v35_v16 = vld [vmem:[#allocation2 + $0x38] sm:$0xff] }
  0xd9   :  { %v228_v10 = vpop.f32.mrb[0].mxu0  ;;  %v232_v14 = vpop.f32.mrb[0].mxu1 }
  0xda   :  { %v149_v13 = vadd.f32 %v228_v10, %v30_v7  ;;  %v116_v15 = vpop.f32.mrb[1].mxu0  ;;  %v153_v18 = vadd.f32 %v232_v14, %v34_v8  ;;  %v132_v20 = vpop.f32.mrb[1].mxu1 }
  0xdb   :  { %v147_v19 = vadd.f32 %v116_v15, %v28_v9  ;;  %v229_v21 = vpop.f32.mrb[2].mxu0  ;;  %v151_v23 = vadd.f32 %v132_v20, %v32_v11  ;;  %v233_v25 = vpop.f32.mrb[2].mxu1 }
  0xdc   :  { %158 = vst.msk [vmem:[#allocation2 + $0x10] sm:$0xff] %vm19_vm2, %v149_v13  ;;  %v150_v24 = vadd.f32 %v229_v21, %v31_v12  ;;  %v119_v26 = vpop.f32.mrb[3].mxu0  ;;  %162 = vst.msk [vmem:[#allocation2 + $0x30] sm:$0xff] %vm19_vm2, %v153_v18  ;;  %v154_v27 = vadd.f32 %v233_v25, %v35_v16  ;;  %v135_v29 = vpop.f32.mrb[3].mxu1 }
  0xdd   :  { %156 = vst.msk [vmem:[#allocation2] sm:$0xff] %vm19_vm2, %v147_v19  ;;  %v148_v28 = vadd.f32 %v119_v26, %v29_v17  ;;  %160 = vst.msk [vmem:[#allocation2 + $0x20] sm:$0xff] %vm19_vm2, %v151_v23  ;;  %v152_v30 = vadd.f32 %v135_v29, %v33_v22 }
  0xde   :  { %159 = vst.msk [vmem:[#allocation2 + $0x18] sm:$0xff] %vm19_vm2, %v150_v24  ;;  %163 = vst.msk [vmem:[#allocation2 + $0x38] sm:$0xff] %vm19_vm2, %v154_v27 }
  0xdf   :  { %157 = vst.msk [vmem:[#allocation2 + $0x8] sm:$0xff] %vm19_vm2, %v148_v28  ;;  %161 = vst.msk [vmem:[#allocation2 + $0x28] sm:$0xff] %vm19_vm2, %v152_v30 }
  0xe3   :  { %v169_v32 = vld [vmem:[#allocation2 + $0x10] sm:$0xff] }
  0xe4   :  { %v184_v33 = vadd.f32 %v218_v31, %v169_v32  ;;  %v173_v34 = vld [vmem:[#allocation2 + $0x30] sm:$0xff]  ;;  %v167_v35 = vld [vmem:[#allocation2] sm:$0xff] }
  0xe5   :  { %v188_v36 = vadd.f32 %v218_v31, %v173_v34  ;;  %v182_v37 = vadd.f32 %v218_v31, %v167_v35  ;;  %v171_v38 = vld [vmem:[#allocation2 + $0x20] sm:$0xff]  ;;  %v170_v39 = vld [vmem:[#allocation2 + $0x18] sm:$0xff] }
  0xe6   :  { %v192_v40 = vmax.f32 %v184_v33, 0.0  ;;  %v186_v41 = vadd.f32 %v218_v31, %v171_v38  ;;  %v185_v42 = vadd.f32 %v218_v31, %v170_v39  ;;  %v174_v43 = vld [vmem:[#allocation2 + $0x38] sm:$0xff]  ;;  %v168_v44 = vld [vmem:[#allocation2 + $0x8] sm:$0xff] }
  0xe7   :  { %v196_v45 = vmax.f32 %v188_v36, 0.0  ;;  %v190_v46 = vmax.f32 %v182_v37, 0.0  ;;  %v189_v47 = vadd.f32 %v218_v31, %v174_v43  ;;  %v183_v48 = vadd.f32 %v218_v31, %v168_v44  ;;  %v172_v49 = vld [vmem:[#allocation2 + $0x28] sm:$0xff] }
  0xe8   :  { %200 = vst.msk [vmem:[%s340_s3 + $0x10] sm:$0xff] %vm19_vm2, %v192_v40  ;;  %v194_v50 = vmax.f32 %v186_v41, 0.0  ;;  %v193_v51 = vmax.f32 %v185_v42, 0.0  ;;  %v187_v52 = vadd.f32 %v218_v31, %v172_v49 }
  0xe9   :  { %204 = vst.msk [vmem:[%s340_s3 + $0x30] sm:$0xff] %vm19_vm2, %v196_v45  ;;  %198 = vst.msk [vmem:[%s340_s3] sm:$0xff] %vm19_vm2, %v190_v46  ;;  %v197_v53 = vmax.f32 %v189_v47, 0.0  ;;  %v191_v54 = vmax.f32 %v183_v48, 0.0 }
  0xea   :  { %202 = vst.msk [vmem:[%s340_s3 + $0x20] sm:$0xff] %vm19_vm2, %v194_v50  ;;  %201 = vst.msk [vmem:[%s340_s3 + $0x18] sm:$0xff] %vm19_vm2, %v193_v51  ;;  %v195_v55 = vmax.f32 %v187_v52, 0.0 }
  0xeb   :  { %205 = vst.msk [vmem:[%s340_s3 + $0x38] sm:$0xff] %vm19_vm2, %v197_v53  ;;  %199 = vst.msk [vmem:[%s340_s3 + $0x8] sm:$0xff] %vm19_vm2, %v191_v54 }
  0xec   :  { %203 = vst.msk [vmem:[%s340_s3 + $0x28] sm:$0xff] %vm19_vm2, %v195_v55 }

// kernel: _lambda_.30
= control target key start
LH: loop header
LB: loop body
LE: loop exit
PB: predicated region body
PF: predicated region fallthrough
CT: control target
= control target key end

     0   :  { %vm92_vm0 = vcmask 1043456   ;;  %vm25_vm1 = vcmask 64512   ;;  %v478_v1 = vmov 0.0   ;;  %s609_s2 = inlined_call_operand.vmem [shape: bf16[8,8], index: 2, kind: input, shape index: {}]   ;;  %s610_s0 = inlined_call_operand.vmem [shape: bf16[64,8], index: 0, kind: input, shape index: {}]   ;;  %s611_s1 = inlined_call_operand.vmem [shape: bf16[8,8], index: 1, kind: input, shape index: {}]   ;;  %s612_s4 = inlined_call_operand.vmem [shape: f32[1,8], index: 4, kind: input, shape index: {}]   ;;  %s613_s3 = inlined_call_operand.vmem [shape: f32[1,8], index: 3, kind: input, shape index: {}]   ;;  %s614_s5 = inlined_call_operand.vmem [shape: f32[64,8], index: 5, kind: output, shape index: {}]  }
   0x1   :  { %v185_v0 = vld [vmem:[%s609_s2] sm:$0xf]  ;;  %36 = vst.msk [vmem:[#allocation3 + $0x10] sm:$0xff] %vm25_vm1, %v478_v1  ;;  %26 = vst.msk [vmem:[#allocation2] sm:$0xff] %vm25_vm1, %v478_v1  ;;  %v443_v4 = vld [vmem:[%s610_s0 + $0x8] sm:$0xff]  }
   0x2   :  { %27 = vst.msk [vmem:[#allocation2 + $0x8] sm:$0xff] %vm25_vm1, %v478_v1  ;;  %28 = vst.msk [vmem:[#allocation2 + $0x10] sm:$0xff] %vm25_vm1, %v478_v1  ;;  %440 = vmatprep.subr.msk.bf16.mxu1 %vm92_vm0, %v185_v0  ;;  %v187_v2 = vsel %vm92_vm0, %v185_v0, 0  ;;  %v442_v3 = vld [vmem:[%s610_s0] sm:$0xff]   ;;  %v444_v5 = vld [vmem:[%s610_s0 + $0x10] sm:$0xff]  }
   0x3   :  { %29 = vst.msk [vmem:[#allocation2 + $0x18] sm:$0xff] %vm25_vm1, %v478_v1  ;;  %30 = vst.msk [vmem:[#allocation2 + $0x20] sm:$0xff] %vm25_vm1, %v478_v1  ;;  %430 = vmatpush3.bf16.msra.mxu1 %v187_v2  ;;  %431 = vmatprep.mubr.msk.bf16.mxu1 %vm25_vm1, %v442_v3  ;;  %v58_v6 = vld [vmem:[%s611_s1] sm:$0xf]  ;;  %v445_v8 = vld [vmem:[%s610_s0 + $0x18] sm:$0xff]  }
   0x4   :  { %31 = vst.msk [vmem:[#allocation2 + $0x28] sm:$0xff] %vm25_vm1, %v478_v1  ;;  %32 = vst.msk [vmem:[#allocation2 + $0x30] sm:$0xff] %vm25_vm1, %v478_v1  ;;  %421 = vmatprep.mubr.msk.bf16.mxu0 %vm25_vm1, %v442_v3  ;;  %439 = vmatprep.subr.msk.bf16.mxu0 %vm92_vm0, %v58_v6  ;;  %v94_v7 = vsel %vm92_vm0, %v58_v6, 0  ;;  %v400_v34 = vld [vmem:[%s612_s4] ss:$0 sm:$0xff] }
   0x5   :  { %33 = vst.msk [vmem:[#allocation2 + $0x38] sm:$0xff] %vm25_vm1, %v478_v1  ;;  %34 = vst.msk [vmem:[#allocation3] sm:$0xff] %vm25_vm1, %v478_v1  ;;  %420 = vmatpush3.bf16.msra.mxu0 %v94_v7 }
   0x6   :  { %35 = vst.msk [vmem:[#allocation3 + $0x8] sm:$0xff] %vm25_vm1, %v478_v1  ;;  %37 = vst.msk [vmem:[#allocation3 + $0x18] sm:$0xff] %vm25_vm1, %v478_v1  ;;  %432 = vmatmul.mubr.msk.bf16.vlgmr.msra.gmra.mrb[0].mxu1 %vm25_vm1, %v443_v4 }
   0x7   :  { %38 = vst.msk [vmem:[#allocation3 + $0x20] sm:$0xff] %vm25_vm1, %v478_v1  ;;  %39 = vst.msk [vmem:[#allocation3 + $0x28] sm:$0xff] %vm25_vm1, %v478_v1  ;;  %435 = vmatprep.mubr.msk.bf16.mxu1 %vm25_vm1, %v444_v5 }
   0x8   :  { %40 = vst.msk [vmem:[#allocation3 + $0x30] sm:$0xff] %vm25_vm1, %v478_v1  ;;  %41 = vst.msk [vmem:[#allocation3 + $0x38] sm:$0xff] %vm25_vm1, %v478_v1  ;;  %422 = vmatmul.mubr.msk.bf16.vlgmr.msra.gmra.mrb[0].mxu0 %vm25_vm1, %v443_v4  ;;  %v179_v9 = vld [vmem:[#allocation3 + $0x10] sm:$0xff]  ;;  %v50_v21 = vld [vmem:[#allocation2] sm:$0xff] }
   0x9   :  { %425 = vmatprep.mubr.msk.bf16.mxu0 %vm25_vm1, %v444_v5  ;;  %v52_v18 = vld [vmem:[#allocation2 + $0x10] sm:$0xff]  ;;  %v51_v27 = vld [vmem:[#allocation2 + $0x8] sm:$0xff] }
   0xa   :  { %v53_v24 = vld [vmem:[#allocation2 + $0x18] sm:$0xff]  ;;  %v54_v49 = vld [vmem:[#allocation2 + $0x20] sm:$0xff] }
   0xb   :  { %v56_v44 = vld [vmem:[#allocation2 + $0x30] sm:$0xff]  ;;  %v55_v60 = vld [vmem:[#allocation2 + $0x28] sm:$0xff] }
   0xc   :  { %v177_v10 = vld [vmem:[#allocation3] sm:$0xff]  ;;  %v57_v54 = vld [vmem:[#allocation2 + $0x38] sm:$0xff] }
   0xd   :  { %v180_v12 = vld [vmem:[#allocation3 + $0x18] sm:$0xff]  ;;  %v178_v15 = vld [vmem:[#allocation3 + $0x8] sm:$0xff] }
   0xe   :  { %436 = vmatmul.mubr.msk.bf16.gmra.mrb[4].mxu1 %vm25_vm1, %v445_v8  ;;  %v181_v31 = vld [vmem:[#allocation3 + $0x20] sm:$0xff]  ;;  %v182_v40 = vld [vmem:[#allocation3 + $0x28] sm:$0xff] }
   0xf   :  { %v183_v28 = vld [vmem:[#allocation3 + $0x30] sm:$0xff]  ;;  %v184_v36 = vld [vmem:[#allocation3 + $0x38] sm:$0xff] }
  0x10   :  { %426 = vmatmul.mubr.msk.bf16.gmra.mrb[4].mxu0 %vm25_vm1, %v445_v8 }
  0xd9   :  { %v433_v11 = vpop.f32.mrb[0].mxu1 }
  0xda   :  { %v256_v13 = vadd.f32 %v433_v11, %v179_v9  ;;  %v223_v14 = vpop.f32.mrb[1].mxu1 }
  0xdb   :  { %v254_v16 = vadd.f32 %v223_v14, %v177_v10  ;;  %v434_v17 = vpop.f32.mrb[2].mxu1  ;;  %v423_v23 = vpop.f32.mrb[0].mxu0 }
  0xdc   :  { %264 = vst.msk [vmem:[#allocation3 + $0x10] sm:$0xff] %vm25_vm1, %v256_v13  ;;  %v257_v19 = vadd.f32 %v434_v17, %v180_v12  ;;  %v226_v20 = vpop.f32.mrb[3].mxu1  ;;  %v163_v25 = vadd.f32 %v423_v23, %v52_v18  ;;  %v130_v26 = vpop.f32.mrb[1].mxu0 }
  0xdd   :  { %262 = vst.msk [vmem:[#allocation3] sm:$0xff] %vm25_vm1, %v254_v16  ;;  %v255_v22 = vadd.f32 %v226_v20, %v178_v15  ;;  %v161_v29 = vadd.f32 %v130_v26, %v50_v21  ;;  %v424_v30 = vpop.f32.mrb[2].mxu0 }
  0xde   :  { %265 = vst.msk [vmem:[#allocation3 + $0x18] sm:$0xff] %vm25_vm1, %v257_v19  ;;  %171 = vst.msk [vmem:[#allocation2 + $0x10] sm:$0xff] %vm25_vm1, %v163_v25  ;;  %v164_v32 = vadd.f32 %v424_v30, %v53_v24  ;;  %v133_v33 = vpop.f32.mrb[3].mxu0 }
  0xdf   :  { %263 = vst.msk [vmem:[#allocation3 + $0x8] sm:$0xff] %vm25_vm1, %v255_v22  ;;  %169 = vst.msk [vmem:[#allocation2] sm:$0xff] %vm25_vm1, %v161_v29  ;;  %v162_v37 = vadd.f32 %v133_v33, %v51_v27  ;;  %v399_v27 = vld [vmem:[%s613_s3] ss:$0 sm:$0xff] }
  0xe0   :  { %172 = vst.msk [vmem:[#allocation2 + $0x18] sm:$0xff] %vm25_vm1, %v164_v32 }
  0xe1   :  { %v437_v35 = vpop.f32.mrb[4].mxu1  ;;  %170 = vst.msk [vmem:[#allocation2 + $0x8] sm:$0xff] %vm25_vm1, %v162_v37 }
  0xe2   :  { %v260_v38 = vadd.f32 %v437_v35, %v183_v28  ;;  %v239_v39 = vpop.f32.mrb[5].mxu1 }
  0xe3   :  { %v298_v41 = vld [vmem:[#allocation3 + $0x10] sm:$0xff]  ;;  %v258_v42 = vadd.f32 %v239_v39, %v181_v31  ;;  %v438_v43 = vpop.f32.mrb[6].mxu1  ;;  %v427_v53 = vpop.f32.mrb[4].mxu0 }
  0xe4   :  { %v313_v45 = vadd.f32 %v400_v34, %v298_v41  ;;  %v296_v46 = vld [vmem:[#allocation3] sm:$0xff]  ;;  %268 = vst.msk [vmem:[#allocation3 + $0x30] sm:$0xff] %vm25_vm1, %v260_v38  ;;  %v261_v47 = vadd.f32 %v438_v43, %v184_v36  ;;  %v242_v48 = vpop.f32.mrb[7].mxu1  ;;  %v167_v58 = vadd.f32 %v427_v53, %v56_v44  ;;  %v146_v59 = vpop.f32.mrb[5].mxu0 }
  0xe5   :  { %v311_v50 = vadd.f32 %v400_v34, %v296_v46  ;;  %v299_v51 = vld [vmem:[#allocation3 + $0x18] sm:$0xff]  ;;  %266 = vst.msk [vmem:[#allocation3 + $0x20] sm:$0xff] %vm25_vm1, %v258_v42  ;;  %v259_v52 = vadd.f32 %v242_v48, %v182_v40  ;;  %v165_v63 = vadd.f32 %v146_v59, %v54_v49  ;;  %v428_v0 = vpop.f32.mrb[6].mxu0  ;;  %v275_v26 = vld [vmem:[#allocation2 + $0x10] sm:$0xff] }
  0xe6   :  { %v403_v55 = vmul.f32 -1.442695, %v313_v45  ;;  %v314_v56 = vadd.f32 %v400_v34, %v299_v51  ;;  %v297_v57 = vld [vmem:[#allocation3 + $0x8] sm:$0xff]  ;;  %269 = vst.msk [vmem:[#allocation3 + $0x38] sm:$0xff] %vm25_vm1, %v261_v47  ;;  %175 = vst.msk [vmem:[#allocation2 + $0x30] sm:$0xff] %vm25_vm1, %v167_v58  ;;  %v168_v2 = vadd.f32 %v428_v0, %v57_v54  ;;  %v149_v3 = vpop.f32.mrb[7].mxu0 }
  0xe7   :  { %v401_v61 = vmul.f32 -1.442695, %v311_v50  ;;  %v312_v62 = vadd.f32 %v400_v34, %v297_v57  ;;  %267 = vst.msk [vmem:[#allocation3 + $0x28] sm:$0xff] %vm25_vm1, %v259_v52  ;;  %173 = vst.msk [vmem:[#allocation2 + $0x20] sm:$0xff] %vm25_vm1, %v165_v63  ;;  %v166_v5 = vadd.f32 %v149_v3, %v55_v60  ;;  %v273_v29 = vld [vmem:[#allocation2] sm:$0xff]  ;;  %v276_v38 = vld [vmem:[#allocation2 + $0x18] sm:$0xff] }
  0xe8   :  { %446 = vpow2.f32 %v403_v55  ;;  %v404_v1 = vmul.f32 -1.442695, %v314_v56  ;;  %176 = vst.msk [vmem:[#allocation2 + $0x38] sm:$0xff] %vm25_vm1, %v168_v2  ;;  %v288_v37 = vadd.f32 %v399_v27, %v273_v29  ;;  %v274_v40 = vld [vmem:[#allocation2 + $0x8] sm:$0xff]  ;;  %v291_v44 = vadd.f32 %v399_v27, %v276_v38 }
  0xe9   :  { %448 = vpow2.f32 %v401_v61  ;;  %v402_v4 = vmul.f32 -1.442695, %v312_v62  ;;  %174 = vst.msk [vmem:[#allocation2 + $0x28] sm:$0xff] %vm25_vm1, %v166_v5  ;;  %v289_v47 = vadd.f32 %v399_v27, %v274_v40 }
  0xea   :  { %450 = vpow2.f32 %v404_v1 }
  0xeb   :  { %452 = vpow2.f32 %v402_v4  ;;  %v302_v6 = vld [vmem:[#allocation3 + $0x30] sm:$0xff] }
  0xec   :  { %v317_v7 = vadd.f32 %v400_v34, %v302_v6  ;;  %v300_v8 = vld [vmem:[#allocation3 + $0x20] sm:$0xff] }
  0xed   :  { %v315_v9 = vadd.f32 %v400_v34, %v300_v8  ;;  %v303_v10 = vld [vmem:[#allocation3 + $0x38] sm:$0xff]  ;;  %v279_v48 = vld [vmem:[#allocation2 + $0x30] sm:$0xff] }
  0xee   :  { %v407_v11 = vmul.f32 -1.442695, %v317_v7  ;;  %v318_v12 = vadd.f32 %v400_v34, %v303_v10  ;;  %v301_v13 = vld [vmem:[#allocation3 + $0x28] sm:$0xff]  ;;  %v277_v51 = vld [vmem:[#allocation2 + $0x20] sm:$0xff]  ;;  %v294_v53 = vadd.f32 %v399_v27, %v279_v48 }
  0xef   :  { %v405_v14 = vmul.f32 -1.442695, %v315_v9  ;;  %v316_v15 = vadd.f32 %v400_v34, %v301_v13  ;;  %v290_v34 = vadd.f32 %v399_v27, %v275_v26  ;;  %v292_v54 = vadd.f32 %v399_v27, %v277_v51  ;;  %v280_v55 = vld [vmem:[#allocation2 + $0x38] sm:$0xff] }
  0xf0   :  { %454 = vpow2.f32 %v407_v11  ;;  %v408_v16 = vmul.f32 -1.442695, %v318_v12  ;;  %v278_v56 = vld [vmem:[#allocation2 + $0x28] sm:$0xff]  ;;  %v295_v60 = vadd.f32 %v399_v27, %v280_v55 }
  0xf1   :  { %456 = vpow2.f32 %v405_v14  ;;  %v406_v17 = vmul.f32 -1.442695, %v316_v15  ;;  %v293_v63 = vadd.f32 %v399_v27, %v278_v56 }
  0xf2   :  { %v447_v18 = vpop.eup %446  ;;  %458 = vpow2.f32 %v408_v16 }
  0xf3   :  { %v449_v19 = vpop.eup %448  ;;  %v345_v20 = vadd.f32 1.0, %v447_v18  ;;  %460 = vpow2.f32 %v406_v17 }
  0xf4   :  { %v451_v21 = vpop.eup %450  ;;  %v343_v22 = vadd.f32 1.0, %v449_v19 }
  0xf5   :  { %v453_v23 = vpop.eup %452  ;;  %462 = vrcp.f32 %v345_v20  ;;  %v346_v24 = vadd.f32 1.0, %v451_v21 }
  0xf6   :  { %464 = vrcp.f32 %v343_v22  ;;  %v344_v25 = vadd.f32 1.0, %v453_v23 }
  0xf7   :  { %466 = vrcp.f32 %v346_v24 }
  0xf8   :  { %468 = vrcp.f32 %v344_v25 }
  0xfa   :  { %v455_v28 = vpop.eup %454 }
  0xfb   :  { %v457_v30 = vpop.eup %456  ;;  %v349_v31 = vadd.f32 1.0, %v455_v28 }
  0xfc   :  { %v459_v32 = vpop.eup %458  ;;  %v347_v33 = vadd.f32 1.0, %v457_v30 }
  0xfd   :  { %v461_v35 = vpop.eup %460  ;;  %470 = vrcp.f32 %v349_v31  ;;  %v350_v36 = vadd.f32 1.0, %v459_v32 }
  0xfe   :  { %472 = vrcp.f32 %v347_v33  ;;  %v348_v39 = vadd.f32 1.0, %v461_v35 }
  0xff   :  { %v463_v41 = vpop.eup %462  ;;  %474 = vrcp.f32 %v350_v36 }
 0x100   :  { %v465_v42 = vpop.eup %464  ;;  %476 = vrcp.f32 %v348_v39  ;;  %v369_v43 = vmul.f32 %v463_v41, %v290_v34 }
 0x101   :  { %v467_v45 = vpop.eup %466  ;;  %v367_v46 = vmul.f32 %v465_v42, %v288_v37 }
 0x102   :  { %v469_v49 = vpop.eup %468  ;;  %377 = vst.msk [vmem:[%s614_s5 + $0x10] sm:$0xff] %vm25_vm1, %v369_v43  ;;  %v370_v50 = vmul.f32 %v467_v45, %v291_v44 }
 0x103   :  { %375 = vst.msk [vmem:[%s614_s5] sm:$0xff] %vm25_vm1, %v367_v46  ;;  %v368_v52 = vmul.f32 %v469_v49, %v289_v47 }
 0x104   :  { %378 = vst.msk [vmem:[%s614_s5 + $0x18] sm:$0xff] %vm25_vm1, %v370_v50 }
 0x105   :  { %376 = vst.msk [vmem:[%s614_s5 + $0x8] sm:$0xff] %vm25_vm1, %v368_v52 }
 0x107   :  { %v471_v57 = vpop.eup %470 }
 0x108   :  { %v473_v58 = vpop.eup %472  ;;  %v373_v59 = vmul.f32 %v471_v57, %v294_v53 }
 0x109   :  { %v475_v61 = vpop.eup %474  ;;  %v371_v62 = vmul.f32 %v473_v58, %v292_v54 }
 0x10a   :  { %v477_v0 = vpop.eup %476  ;;  %381 = vst.msk [vmem:[%s614_s5 + $0x30] sm:$0xff] %vm25_vm1, %v373_v59  ;;  %v374_v1 = vmul.f32 %v475_v61, %v295_v60 }
 0x10b   :  { %379 = vst.msk [vmem:[%s614_s5 + $0x20] sm:$0xff] %vm25_vm1, %v371_v62  ;;  %v372_v2 = vmul.f32 %v477_v0, %v293_v63 }
 0x10c   :  { %382 = vst.msk [vmem:[%s614_s5 + $0x38] sm:$0xff] %vm25_vm1, %v374_v1 }
 0x10d   :  { %380 = vst.msk [vmem:[%s614_s5 + $0x28] sm:$0xff] %vm25_vm1, %v372_v2 }

// kernel: _lambda_.31
= control target key start
LH: loop header
LB: loop body
LE: loop exit
PB: predicated region body
PF: predicated region fallthrough
CT: control target
= control target key end

     0   :  { %vm19_vm0 = vcmask 130048   ;;  %v177_v1 = vmov 0.0   ;;  %vm58_vm1 = vcmask 261120   ;;  %s237_s1 = inlined_call_operand.vmem [shape: bf16[32,16], index: 1, kind: input, shape index: {}]   ;;  %s238_s0 = inlined_call_operand.vmem [shape: bf16[32,32], index: 0, kind: input, shape index: {}]   ;;  %s239_s2 = inlined_call_operand.vmem [shape: f32[1,16], index: 2, kind: input, shape index: {}]   ;;  %s240_s3 = inlined_call_operand.vmem [shape: f32[32,16], index: 3, kind: output, shape index: {}]  }
   0x1   :  { %v173_v0 = vld [vmem:[%s237_s1] sm:$0xff]   ;;  %22 = vst.msk [vmem:[#allocation2 + $0x10] sm:$0xff] %vm19_vm0, %v177_v1  ;;  %20 = vst.msk [vmem:[#allocation2] sm:$0xff] %vm19_vm0, %v177_v1  ;;  %v174_v2 = vld [vmem:[%s237_s1 + $0x8] sm:$0xff]  }
   0x2   :  { %21 = vst.msk [vmem:[#allocation2 + $0x8] sm:$0xff] %vm19_vm0, %v177_v1  ;;  %23 = vst.msk [vmem:[#allocation2 + $0x18] sm:$0xff] %vm19_vm0, %v177_v1  ;;  %164 = vmatprep.subr.bf16.mxu0 %v173_v0  ;;  %v175_v3 = vld [vmem:[%s238_s0] sm:$0xff]   ;;  %v176_v4 = vld [vmem:[%s238_s0 + $0x8] sm:$0xff]  }
   0x3   :  { %165 = vmatpush3.bf16.msra.mxu0 %v173_v0  ;;  %168 = vmatprep.mubr.msk.bf16.mxu0 %vm58_vm1, %v175_v3  ;;  %v159_v17 = vld [vmem:[%s239_s2] ss:$0 sm:$0xff] }
   0x4   :  { %166 = vmatprep.subr.bf16.mxu0 %v174_v2 }
   0x7   :  { %167 = vmatpush3.bf16.msra.mxu0 %v174_v2 }
   0x8   :  { %v26_v5 = vld [vmem:[#allocation2 + $0x10] sm:$0xff]  ;;  %v24_v6 = vld [vmem:[#allocation2] sm:$0xff] }
   0x9   :  { %v27_v8 = vld [vmem:[#allocation2 + $0x18] sm:$0xff]  ;;  %v25_v11 = vld [vmem:[#allocation2 + $0x8] sm:$0xff] }
   0xa   :  { %169 = vmatmul.mubr.msk.bf16.vlgmr.msra.gmra.mrb[0].mxu0 %vm58_vm1, %v176_v4 }
  0xdd   :  { %v170_v7 = vpop.f32.mrb[0].mxu0 }
  0xde   :  { %v116_v9 = vadd.f32 %v170_v7, %v26_v5  ;;  %v99_v10 = vpop.f32.mrb[1].mxu0 }
  0xdf   :  { %v114_v12 = vadd.f32 %v99_v10, %v24_v6  ;;  %v171_v13 = vpop.f32.mrb[2].mxu0 }
  0xe0   :  { %121 = vst.msk [vmem:[#allocation2 + $0x10] sm:$0xff] %vm19_vm0, %v116_v9  ;;  %v117_v14 = vadd.f32 %v171_v13, %v27_v8  ;;  %v102_v15 = vpop.f32.mrb[3].mxu0 }
  0xe1   :  { %119 = vst.msk [vmem:[#allocation2] sm:$0xff] %vm19_vm0, %v114_v12  ;;  %v115_v16 = vadd.f32 %v102_v15, %v25_v11 }
  0xe2   :  { %122 = vst.msk [vmem:[#allocation2 + $0x18] sm:$0xff] %vm19_vm0, %v117_v14 }
  0xe3   :  { %120 = vst.msk [vmem:[#allocation2 + $0x8] sm:$0xff] %vm19_vm0, %v115_v16 }
  0xe7   :  { %v128_v18 = vld [vmem:[#allocation2 + $0x10] sm:$0xff] }
  0xe8   :  { %v139_v19 = vadd.f32 %v159_v17, %v128_v18  ;;  %v126_v20 = vld [vmem:[#allocation2] sm:$0xff] }
  0xe9   :  { %v137_v21 = vadd.f32 %v159_v17, %v126_v20  ;;  %v129_v22 = vld [vmem:[#allocation2 + $0x18] sm:$0xff] }
  0xea   :  { %v143_v23 = vmax.f32 %v139_v19, 0.0  ;;  %v140_v24 = vadd.f32 %v159_v17, %v129_v22  ;;  %v127_v25 = vld [vmem:[#allocation2 + $0x8] sm:$0xff] }
  0xeb   :  { %v141_v26 = vmax.f32 %v137_v21, 0.0  ;;  %v138_v27 = vadd.f32 %v159_v17, %v127_v25 }
  0xec   :  { %147 = vst.msk [vmem:[%s240_s3 + $0x10] sm:$0xff] %vm19_vm0, %v143_v23  ;;  %v144_v28 = vmax.f32 %v140_v24, 0.0 }
  0xed   :  { %145 = vst.msk [vmem:[%s240_s3] sm:$0xff] %vm19_vm0, %v141_v26  ;;  %v142_v29 = vmax.f32 %v138_v27, 0.0 }
  0xee   :  { %148 = vst.msk [vmem:[%s240_s3 + $0x18] sm:$0xff] %vm19_vm0, %v144_v28 }
  0xef   :  { %146 = vst.msk [vmem:[%s240_s3 + $0x8] sm:$0xff] %vm19_vm0, %v142_v29 }

// kernel: _lambda_.32
= control target key start
LH: loop header
LB: loop body
LE: loop exit
PB: predicated region body
PF: predicated region fallthrough
CT: control target
= control target key end

     0   :  { %vm25_vm0 = vcmask 130048   ;;  %v315_v1 = vmov 0.0   ;;  %s400_s2 = inlined_call_operand.vmem [shape: bf16[16,16], index: 2, kind: input, shape index: {}]   ;;  %s401_s0 = inlined_call_operand.vmem [shape: bf16[32,16], index: 0, kind: input, shape index: {}]   ;;  %s402_s1 = inlined_call_operand.vmem [shape: bf16[16,16], index: 1, kind: input, shape index: {}]   ;;  %s403_s4 = inlined_call_operand.vmem [shape: f32[1,16], index: 4, kind: input, shape index: {}]   ;;  %s404_s3 = inlined_call_operand.vmem [shape: f32[1,16], index: 3, kind: input, shape index: {}]   ;;  %s405_s5 = inlined_call_operand.vmem [shape: f32[32,16], index: 5, kind: output, shape index: {}]  }
   0x1   :  { %v295_v0 = vld [vmem:[%s400_s2] sm:$0xff]   ;;  %32 = vst.msk [vmem:[#allocation3 + $0x10] sm:$0xff] %vm25_vm0, %v315_v1  ;;  %26 = vst.msk [vmem:[#allocation2] sm:$0xff] %vm25_vm0, %v315_v1  ;;  %v297_v3 = vld [vmem:[%s401_s0 + $0x8] sm:$0xff]  }
   0x2   :  { %27 = vst.msk [vmem:[#allocation2 + $0x8] sm:$0xff] %vm25_vm0, %v315_v1  ;;  %28 = vst.msk [vmem:[#allocation2 + $0x10] sm:$0xff] %vm25_vm0, %v315_v1  ;;  %v296_v2 = vld [vmem:[%s401_s0] sm:$0xff]   ;;  %288 = vmatprep.subr.bf16.mxu1 %v295_v0 }
   0x3   :  { %29 = vst.msk [vmem:[#allocation2 + $0x18] sm:$0xff] %vm25_vm0, %v315_v1  ;;  %30 = vst.msk [vmem:[#allocation3] sm:$0xff] %vm25_vm0, %v315_v1  ;;  %289 = vmatpush3.bf16.msra.mxu1 %v295_v0  ;;  %290 = vmatprep.mubr.msk.bf16.mxu1 %vm25_vm0, %v296_v2  ;;  %v298_v4 = vld [vmem:[%s402_s1] sm:$0xff]  }
   0x4   :  { %31 = vst.msk [vmem:[#allocation3 + $0x8] sm:$0xff] %vm25_vm0, %v315_v1  ;;  %33 = vst.msk [vmem:[#allocation3 + $0x18] sm:$0xff] %vm25_vm0, %v315_v1  ;;  %284 = vmatprep.mubr.msk.bf16.mxu0 %vm25_vm0, %v296_v2  ;;  %282 = vmatprep.subr.bf16.mxu0 %v298_v4  ;;  %v271_v29 = vld [vmem:[%s403_s4] ss:$0 sm:$0xff] }
   0x5   :  { %283 = vmatpush3.bf16.msra.mxu0 %v298_v4  ;;  %v270_v51 = vld [vmem:[%s404_s3] ss:$0 sm:$0xff] }
   0x6   :  { %291 = vmatmul.mubr.msk.bf16.vlgmr.msra.gmra.mrb[0].mxu1 %vm25_vm0, %v297_v3 }
   0x8   :  { %285 = vmatmul.mubr.msk.bf16.vlgmr.msra.gmra.mrb[0].mxu0 %vm25_vm0, %v297_v3  ;;  %v126_v5 = vld [vmem:[#allocation3 + $0x10] sm:$0xff]  ;;  %v38_v15 = vld [vmem:[#allocation2] sm:$0xff] }
   0x9   :  { %v40_v12 = vld [vmem:[#allocation2 + $0x10] sm:$0xff]  ;;  %v39_v23 = vld [vmem:[#allocation2 + $0x8] sm:$0xff] }
   0xa   :  { %v124_v6 = vld [vmem:[#allocation3] sm:$0xff]  ;;  %v41_v19 = vld [vmem:[#allocation2 + $0x18] sm:$0xff] }
   0xb   :  { %v127_v8 = vld [vmem:[#allocation3 + $0x18] sm:$0xff]  ;;  %v125_v11 = vld [vmem:[#allocation3 + $0x8] sm:$0xff] }
  0xd9   :  { %v292_v7 = vpop.f32.mrb[0].mxu1 }
  0xda   :  { %v187_v9 = vadd.f32 %v292_v7, %v126_v5  ;;  %v170_v10 = vpop.f32.mrb[1].mxu1 }
  0xdb   :  { %v185_v13 = vadd.f32 %v170_v10, %v124_v6  ;;  %v293_v14 = vpop.f32.mrb[2].mxu1  ;;  %v286_v18 = vpop.f32.mrb[0].mxu0 }
  0xdc   :  { %191 = vst.msk [vmem:[#allocation3 + $0x10] sm:$0xff] %vm25_vm0, %v187_v9  ;;  %v188_v16 = vadd.f32 %v293_v14, %v127_v8  ;;  %v173_v17 = vpop.f32.mrb[3].mxu1  ;;  %v118_v21 = vadd.f32 %v286_v18, %v40_v12  ;;  %v101_v22 = vpop.f32.mrb[1].mxu0 }
  0xdd   :  { %189 = vst.msk [vmem:[#allocation3] sm:$0xff] %vm25_vm0, %v185_v13  ;;  %v186_v20 = vadd.f32 %v173_v17, %v125_v11  ;;  %v116_v24 = vadd.f32 %v101_v22, %v38_v15  ;;  %v287_v25 = vpop.f32.mrb[2].mxu0 }
  0xde   :  { %192 = vst.msk [vmem:[#allocation3 + $0x18] sm:$0xff] %vm25_vm0, %v188_v16  ;;  %122 = vst.msk [vmem:[#allocation2 + $0x10] sm:$0xff] %vm25_vm0, %v118_v21  ;;  %v119_v26 = vadd.f32 %v287_v25, %v41_v19  ;;  %v104_v27 = vpop.f32.mrb[3].mxu0 }
  0xdf   :  { %190 = vst.msk [vmem:[#allocation3 + $0x8] sm:$0xff] %vm25_vm0, %v186_v20  ;;  %120 = vst.msk [vmem:[#allocation2] sm:$0xff] %vm25_vm0, %v116_v24  ;;  %v117_v28 = vadd.f32 %v104_v27, %v39_v23 }
  0xe0   :  { %123 = vst.msk [vmem:[#allocation2 + $0x18] sm:$0xff] %vm25_vm0, %v119_v26 }
  0xe1   :  { %121 = vst.msk [vmem:[#allocation2 + $0x8] sm:$0xff] %vm25_vm0, %v117_v28 }
  0xe3   :  { %v213_v30 = vld [vmem:[#allocation3 + $0x10] sm:$0xff] }
  0xe4   :  { %v224_v31 = vadd.f32 %v271_v29, %v213_v30  ;;  %v211_v32 = vld [vmem:[#allocation3] sm:$0xff] }
  0xe5   :  { %v222_v33 = vadd.f32 %v271_v29, %v211_v32  ;;  %v214_v34 = vld [vmem:[#allocation3 + $0x18] sm:$0xff]  ;;  %v198_v50 = vld [vmem:[#allocation2 + $0x10] sm:$0xff] }
  0xe6   :  { %v274_v35 = vmul.f32 -1.442695, %v224_v31  ;;  %v225_v36 = vadd.f32 %v271_v29, %v214_v34  ;;  %v212_v37 = vld [vmem:[#allocation3 + $0x8] sm:$0xff]  ;;  %v196_v52 = vld [vmem:[#allocation2] sm:$0xff]  ;;  %v209_v53 = vadd.f32 %v270_v51, %v198_v50 }
  0xe7   :  { %v272_v38 = vmul.f32 -1.442695, %v222_v33  ;;  %v223_v39 = vadd.f32 %v271_v29, %v212_v37  ;;  %v207_v54 = vadd.f32 %v270_v51, %v196_v52  ;;  %v199_v55 = vld [vmem:[#allocation2 + $0x18] sm:$0xff] }
  0xe8   :  { %299 = vpow2.f32 %v274_v35  ;;  %v275_v40 = vmul.f32 -1.442695, %v225_v36  ;;  %v197_v56 = vld [vmem:[#allocation2 + $0x8] sm:$0xff]  ;;  %v210_v60 = vadd.f32 %v270_v51, %v199_v55 }
  0xe9   :  { %301 = vpow2.f32 %v272_v38  ;;  %v273_v41 = vmul.f32 -1.442695, %v223_v39  ;;  %v208_v63 = vadd.f32 %v270_v51, %v197_v56 }
  0xea   :  { %303 = vpow2.f32 %v275_v40 }
  0xeb   :  { %305 = vpow2.f32 %v273_v41 }
  0xf2   :  { %v300_v42 = vpop.eup %299 }
  0xf3   :  { %v302_v43 = vpop.eup %301  ;;  %v240_v44 = vadd.f32 1.0, %v300_v42 }
  0xf4   :  { %v304_v45 = vpop.eup %303  ;;  %v238_v46 = vadd.f32 1.0, %v302_v43 }
  0xf5   :  { %v306_v47 = vpop.eup %305  ;;  %307 = vrcp.f32 %v240_v44  ;;  %v241_v48 = vadd.f32 1.0, %v304_v45 }
  0xf6   :  { %309 = vrcp.f32 %v238_v46  ;;  %v239_v49 = vadd.f32 1.0, %v306_v47 }
  0xf7   :  { %311 = vrcp.f32 %v241_v48 }
  0xf8   :  { %313 = vrcp.f32 %v239_v49 }
  0xff   :  { %v308_v57 = vpop.eup %307 }
 0x100   :  { %v310_v58 = vpop.eup %309  ;;  %v252_v59 = vmul.f32 %v308_v57, %v209_v53 }
 0x101   :  { %v312_v61 = vpop.eup %311  ;;  %v250_v62 = vmul.f32 %v310_v58, %v207_v54 }
 0x102   :  { %v314_v0 = vpop.eup %313  ;;  %256 = vst.msk [vmem:[%s405_s5 + $0x10] sm:$0xff] %vm25_vm0, %v252_v59  ;;  %v253_v1 = vmul.f32 %v312_v61, %v210_v60 }
 0x103   :  { %254 = vst.msk [vmem:[%s405_s5] sm:$0xff] %vm25_vm0, %v250_v62  ;;  %v251_v2 = vmul.f32 %v314_v0, %v208_v63 }
 0x104   :  { %257 = vst.msk [vmem:[%s405_s5 + $0x18] sm:$0xff] %vm25_vm0, %v253_v1 }
 0x105   :  { %255 = vst.msk [vmem:[%s405_s5 + $0x8] sm:$0xff] %vm25_vm0, %v251_v2 }

// kernel: _lambda_.33
= control target key start
LH: loop header
LB: loop body
LE: loop exit
PB: predicated region body
PF: predicated region fallthrough
CT: control target
= control target key end

     0   :  { %vm19_vm0 = vcmask 130048   ;;  %v166_v0 = vmov 0.0   ;;  %vm167_vm1 = vmmov 0   ;;  %vm63_vm2 = vcmask 523264   ;;  %s218_s1 = inlined_call_operand.vmem [shape: bf16[64,16], index: 1, kind: input, shape index: {}]   ;;  %s219_s0 = inlined_call_operand.vmem [shape: bf16[16,64], index: 0, kind: input, shape index: {}]   ;;  %s220_s2 = inlined_call_operand.vmem [shape: f32[1,16], index: 2, kind: input, shape index: {}]   ;;  %s221_s3 = inlined_call_operand.vmem [shape: f32[16,16], index: 3, kind: output, shape index: {}]  }
   0x1   :  { %147 = vmatprep.subr.bf16.mxu0 %v166_v0  ;;  %v161_v1 = vld [vmem:[%s218_s1] sm:$0xff]   ;;  %155 = vmatprep.mubr.msk.bf16.mxu0 %vm167_vm1, %v166_v0  ;;  %20 = vst.msk [vmem:[#allocation2] sm:$0xff] %vm19_vm0, %v166_v0  ;;  %21 = vst.msk [vmem:[#allocation2 + $0x8] sm:$0xff] %vm19_vm0, %v166_v0  ;;  %v162_v2 = vld [vmem:[%s218_s1 + $0x8] sm:$0xff]  }
   0x2   :  { %148 = vmatpush3.bf16.msra.mxu0 %v161_v1  ;;  %v163_v3 = vld [vmem:[%s218_s1 + $0x10] sm:$0xff]   ;;  %v164_v4 = vld [vmem:[%s218_s1 + $0x18] sm:$0xff]   ;;  %v165_v5 = vld [vmem:[%s219_s0] sm:$0xff]  }
   0x3   :  { %149 = vmatprep.subr.bf16.mxu0 %v166_v0  ;;  %v141_v14 = vld [vmem:[%s220_s2] ss:$0 sm:$0xff] }
   0x6   :  { %150 = vmatpush3.bf16.msra.mxu0 %v162_v2 }
   0x7   :  { %151 = vmatprep.subr.bf16.mxu0 %v166_v0 }
   0x8   :  { %v22_v6 = vld [vmem:[#allocation2] sm:$0xff]  ;;  %v23_v8 = vld [vmem:[#allocation2 + $0x8] sm:$0xff] }
   0xa   :  { %152 = vmatpush3.bf16.msra.mxu0 %v163_v3 }
   0xb   :  { %153 = vmatprep.subr.bf16.mxu0 %v166_v0 }
   0xe   :  { %154 = vmatpush3.bf16.msra.mxu0 %v164_v4 }
  0x11   :  { %156 = vmatmul.mubr.msk.bf16.vlgmr.msra.gmra.mrb[0].mxu0 %vm63_vm2, %v165_v5 }
  0xe4   :  { %v101_v7 = vpop.f32.mrb[0].mxu0 }
  0xe5   :  { %v108_v9 = vadd.f32 %v101_v7, %v22_v6  ;;  %v157_v10 = vpop.f32.mrb[1].mxu0 }
  0xe6   :  { %v104_v11 = vpop.f32.mrb[2].mxu0 }
  0xe7   :  { %111 = vst.msk [vmem:[#allocation2] sm:$0xff] %vm19_vm0, %v108_v9  ;;  %v109_v12 = vadd.f32 %v104_v11, %v23_v8  ;;  %v158_v13 = vpop.f32.mrb[3].mxu0 }
  0xe9   :  { %112 = vst.msk [vmem:[#allocation2 + $0x8] sm:$0xff] %vm19_vm0, %v109_v12 }
  0xee   :  { %v116_v15 = vld [vmem:[#allocation2] sm:$0xff] }
  0xef   :  { %v125_v16 = vadd.f32 %v141_v14, %v116_v15 }
  0xf0   :  { %v117_v17 = vld [vmem:[#allocation2 + $0x8] sm:$0xff] }
  0xf1   :  { %v127_v18 = vmax.f32 %v125_v16, 0.0  ;;  %v126_v19 = vadd.f32 %v141_v14, %v117_v17 }
  0xf3   :  { %129 = vst.msk [vmem:[%s221_s3] sm:$0xff] %vm19_vm0, %v127_v18  ;;  %v128_v20 = vmax.f32 %v126_v19, 0.0 }
  0xf5   :  { %130 = vst.msk [vmem:[%s221_s3 + $0x8] sm:$0xff] %vm19_vm0, %v128_v20 }

// kernel: _lambda_.34
= control target key start
LH: loop header
LB: loop body
LE: loop exit
PB: predicated region body
PF: predicated region fallthrough
CT: control target
= control target key end

     0   :  { %vm25_vm0 = vcmask 130048   ;;  %v234_v0 = vmov 0.0   ;;  %vm235_vm1 = vmmov 0   ;;  %s299_s2 = inlined_call_operand.vmem [shape: bf16[16,16], index: 2, kind: input, shape index: {}]   ;;  %s300_s0 = inlined_call_operand.vmem [shape: bf16[16,16], index: 0, kind: input, shape index: {}]   ;;  %s301_s1 = inlined_call_operand.vmem [shape: bf16[16,16], index: 1, kind: input, shape index: {}]   ;;  %s302_s4 = inlined_call_operand.vmem [shape: f32[1,16], index: 4, kind: input, shape index: {}]   ;;  %s303_s3 = inlined_call_operand.vmem [shape: f32[1,16], index: 3, kind: input, shape index: {}]   ;;  %s304_s5 = inlined_call_operand.vmem [shape: f32[16,16], index: 5, kind: output, shape index: {}]  }
   0x1   :  { %215 = vmatprep.subr.bf16.mxu1 %v234_v0  ;;  %v223_v1 = vld [vmem:[%s299_s2] sm:$0xff]   ;;  %217 = vmatprep.mubr.msk.bf16.mxu1 %vm235_vm1, %v234_v0  ;;  %26 = vst.msk [vmem:[#allocation2] sm:$0xff] %vm25_vm0, %v234_v0  ;;  %27 = vst.msk [vmem:[#allocation2 + $0x8] sm:$0xff] %vm25_vm0, %v234_v0 }
   0x2   :  { %28 = vst.msk [vmem:[#allocation3] sm:$0xff] %vm25_vm0, %v234_v0  ;;  %29 = vst.msk [vmem:[#allocation3 + $0x8] sm:$0xff] %vm25_vm0, %v234_v0  ;;  %v224_v2 = vld [vmem:[%s300_s0] sm:$0xff]   ;;  %209 = vmatprep.subr.bf16.mxu0 %v234_v0  ;;  %211 = vmatprep.mubr.msk.bf16.mxu0 %vm235_vm1, %v234_v0 }
   0x3   :  { %216 = vmatpush3.bf16.msra.mxu1 %v223_v1  ;;  %v225_v3 = vld [vmem:[%s301_s1] sm:$0xff]  }
   0x4   :  { %210 = vmatpush3.bf16.msra.mxu0 %v225_v3  ;;  %v202_v20 = vld [vmem:[%s302_s4] ss:$0 sm:$0xff] }
   0x5   :  { %v201_v32 = vld [vmem:[%s303_s3] ss:$0 sm:$0xff] }
   0x6   :  { %218 = vmatmul.mubr.msk.bf16.vlgmr.msra.gmra.mrb[0].mxu1 %vm25_vm0, %v224_v2 }
   0x7   :  { %212 = vmatmul.mubr.msk.bf16.vlgmr.msra.gmra.mrb[0].mxu0 %vm25_vm0, %v224_v2 }
   0x8   :  { %v32_v7 = vld [vmem:[#allocation2] sm:$0xff]  ;;  %v33_v12 = vld [vmem:[#allocation2 + $0x8] sm:$0xff] }
   0x9   :  { %v96_v4 = vld [vmem:[#allocation3] sm:$0xff]  ;;  %v97_v6 = vld [vmem:[#allocation3 + $0x8] sm:$0xff] }
  0xd9   :  { %v140_v5 = vpop.f32.mrb[0].mxu1 }
  0xda   :  { %v147_v8 = vadd.f32 %v140_v5, %v96_v4  ;;  %v219_v9 = vpop.f32.mrb[1].mxu1  ;;  %v85_v11 = vpop.f32.mrb[0].mxu0 }
  0xdb   :  { %v143_v10 = vpop.f32.mrb[2].mxu1  ;;  %v92_v15 = vadd.f32 %v85_v11, %v32_v7  ;;  %v213_v16 = vpop.f32.mrb[1].mxu0 }
  0xdc   :  { %149 = vst.msk [vmem:[#allocation3] sm:$0xff] %vm25_vm0, %v147_v8  ;;  %v148_v13 = vadd.f32 %v143_v10, %v97_v6  ;;  %v220_v14 = vpop.f32.mrb[3].mxu1  ;;  %v88_v17 = vpop.f32.mrb[2].mxu0 }
  0xdd   :  { %94 = vst.msk [vmem:[#allocation2] sm:$0xff] %vm25_vm0, %v92_v15  ;;  %v93_v18 = vadd.f32 %v88_v17, %v33_v12  ;;  %v214_v19 = vpop.f32.mrb[3].mxu0 }
  0xde   :  { %150 = vst.msk [vmem:[#allocation3 + $0x8] sm:$0xff] %vm25_vm0, %v148_v13 }
  0xdf   :  { %95 = vst.msk [vmem:[#allocation2 + $0x8] sm:$0xff] %vm25_vm0, %v93_v18 }
  0xe3   :  { %v165_v21 = vld [vmem:[#allocation3] sm:$0xff] }
  0xe4   :  { %v174_v22 = vadd.f32 %v202_v20, %v165_v21  ;;  %v154_v31 = vld [vmem:[#allocation2] sm:$0xff] }
  0xe5   :  { %v166_v23 = vld [vmem:[#allocation3 + $0x8] sm:$0xff]  ;;  %v163_v33 = vadd.f32 %v201_v32, %v154_v31 }
  0xe6   :  { %v203_v24 = vmul.f32 -1.442695, %v174_v22  ;;  %v175_v25 = vadd.f32 %v202_v20, %v166_v23  ;;  %v155_v34 = vld [vmem:[#allocation2 + $0x8] sm:$0xff] }
  0xe7   :  { %v164_v37 = vadd.f32 %v201_v32, %v155_v34 }
  0xe8   :  { %226 = vpow2.f32 %v203_v24  ;;  %v204_v26 = vmul.f32 -1.442695, %v175_v25 }
  0xea   :  { %228 = vpow2.f32 %v204_v26 }
  0xf2   :  { %v227_v27 = vpop.eup %226 }
  0xf3   :  { %v182_v28 = vadd.f32 1.0, %v227_v27 }
  0xf4   :  { %v229_v29 = vpop.eup %228 }
  0xf5   :  { %230 = vrcp.f32 %v182_v28  ;;  %v183_v30 = vadd.f32 1.0, %v229_v29 }
  0xf7   :  { %232 = vrcp.f32 %v183_v30 }
  0xff   :  { %v231_v35 = vpop.eup %230 }
 0x100   :  { %v188_v36 = vmul.f32 %v231_v35, %v163_v33 }
 0x101   :  { %v233_v38 = vpop.eup %232 }
 0x102   :  { %190 = vst.msk [vmem:[%s304_s5] sm:$0xff] %vm25_vm0, %v188_v36  ;;  %v189_v39 = vmul.f32 %v233_v38, %v164_v37 }
 0x104   :  { %191 = vst.msk [vmem:[%s304_s5 + $0x8] sm:$0xff] %vm25_vm0, %v189_v39 }

// kernel: _lambda_.35
= control target key start
LH: loop header
LB: loop body
LE: loop exit
PB: predicated region body
PF: predicated region fallthrough
CT: control target
= control target key end

     0   :  { %vm19_vm0 = vcmask 261120   ;;  %v125_v0 = vmov 0.0   ;;  %vm126_vm1 = vmmov 0   ;;  %vm39_vm2 = vcmask 130048   ;;  %s168_s1 = inlined_call_operand.vmem [shape: bf16[16,32], index: 1, kind: input, shape index: {}]   ;;  %s169_s0 = inlined_call_operand.vmem [shape: bf16[16,16], index: 0, kind: input, shape index: {}]   ;;  %s170_s2 = inlined_call_operand.vmem [shape: f32[1,32], index: 2, kind: input, shape index: {}]   ;;  %s171_s3 = inlined_call_operand.vmem [shape: f32[16,32], index: 3, kind: output, shape index: {}]  }
   0x1   :  { %20 = vst.msk [vmem:[#allocation2] sm:$0xff] %vm19_vm0, %v125_v0  ;;  %21 = vst.msk [vmem:[#allocation2 + $0x8] sm:$0xff] %vm19_vm0, %v125_v0  ;;  %115 = vmatprep.subr.bf16.mxu0 %v125_v0  ;;  %v123_v1 = vld [vmem:[%s168_s1] sm:$0xff]   ;;  %117 = vmatprep.mubr.msk.bf16.mxu0 %vm126_vm1, %v125_v0 }
   0x2   :  { %v124_v2 = vld [vmem:[%s169_s0] sm:$0xff]   ;;  %116 = vmatpush3.bf16.msra.mxu0 %v123_v1 }
   0x3   :  { %v112_v11 = vld [vmem:[%s170_s2] ss:$0 sm:$0xff] }
   0x5   :  { %118 = vmatmul.mubr.msk.bf16.vlgmr.msra.gmra.mrb[0].mxu0 %vm39_vm2, %v124_v2 }
   0x8   :  { %v22_v3 = vld [vmem:[#allocation2] sm:$0xff]  ;;  %v23_v5 = vld [vmem:[#allocation2 + $0x8] sm:$0xff] }
  0xd8   :  { %v77_v4 = vpop.f32.mrb[0].mxu0 }
  0xd9   :  { %v84_v6 = vadd.f32 %v77_v4, %v22_v3  ;;  %v119_v7 = vpop.f32.mrb[1].mxu0 }
  0xda   :  { %v80_v8 = vpop.f32.mrb[2].mxu0 }
  0xdb   :  { %87 = vst.msk [vmem:[#allocation2] sm:$0xff] %vm19_vm0, %v84_v6  ;;  %v85_v9 = vadd.f32 %v80_v8, %v23_v5  ;;  %v120_v10 = vpop.f32.mrb[3].mxu0 }
  0xdd   :  { %88 = vst.msk [vmem:[#allocation2 + $0x8] sm:$0xff] %vm19_vm0, %v85_v9 }
  0xe2   :  { %v92_v12 = vld [vmem:[#allocation2] sm:$0xff] }
  0xe3   :  { %v101_v13 = vadd.f32 %v112_v11, %v92_v12 }
  0xe4   :  { %v93_v14 = vld [vmem:[#allocation2 + $0x8] sm:$0xff] }
  0xe5   :  { %103 = vst.msk [vmem:[%s171_s3] sm:$0xff] %vm19_vm0, %v101_v13  ;;  %v102_v15 = vadd.f32 %v112_v11, %v93_v14 }
  0xe7   :  { %104 = vst.msk [vmem:[%s171_s3 + $0x8] sm:$0xff] %vm19_vm0, %v102_v15 }

// kernel: _lambda_.37
= control target key start
LH: loop header
LB: loop body
LE: loop exit
PB: predicated region body
PF: predicated region fallthrough
CT: control target
= control target key end

     0   :  { %vm16_vm0 = vcmask 785408   ;;  %v125_v0 = vmov 0.0   ;;  %vm126_vm1 = vmmov 0   ;;  %vm44_vm2 = vcmask 261120   ;;  %s163_s1 = inlined_call_operand.vmem [shape: bf16[32,96], index: 1, kind: input, shape index: {}]   ;;  %s164_s0 = inlined_call_operand.vmem [shape: bf16[16,32], index: 0, kind: input, shape index: {}]   ;;  %s165_s2 = inlined_call_operand.vmem [shape: f32[16,96], index: 2, kind: output, shape index: {}]  }
   0x1   :  { %112 = vmatprep.subr.bf16.mxu0 %v125_v0  ;;  %v122_v1 = vld [vmem:[%s163_s1] sm:$0xff]   ;;  %116 = vmatprep.mubr.msk.bf16.mxu0 %vm126_vm1, %v125_v0  ;;  %17 = vst.msk [vmem:[#allocation2] sm:$0xff] %vm16_vm0, %v125_v0  ;;  %18 = vst.msk [vmem:[#allocation2 + $0x8] sm:$0xff] %vm16_vm0, %v125_v0  ;;  %v123_v2 = vld [vmem:[%s163_s1 + $0x8] sm:$0xff]  }
   0x2   :  { %113 = vmatpush3.bf16.msra.mxu0 %v122_v1  ;;  %v124_v3 = vld [vmem:[%s164_s0] sm:$0xff]  }
   0x3   :  { %114 = vmatprep.subr.bf16.mxu0 %v125_v0 }
   0x6   :  { %115 = vmatpush3.bf16.msra.mxu0 %v123_v2 }
   0x8   :  { %v19_v4 = vld [vmem:[#allocation2] sm:$0xff]  ;;  %v20_v6 = vld [vmem:[#allocation2 + $0x8] sm:$0xff] }
   0x9   :  { %117 = vmatmul.mubr.msk.bf16.vlgmr.msra.gmra.mrb[0].mxu0 %vm44_vm2, %v124_v3 }
  0xdc   :  { %v82_v5 = vpop.f32.mrb[0].mxu0 }
  0xdd   :  { %v89_v7 = vadd.f32 %v82_v5, %v19_v4  ;;  %v118_v8 = vpop.f32.mrb[1].mxu0 }
  0xde   :  { %v85_v9 = vpop.f32.mrb[2].mxu0 }
  0xdf   :  { %92 = vst.msk [vmem:[#allocation2] sm:$0xff] %vm16_vm0, %v89_v7  ;;  %v90_v10 = vadd.f32 %v85_v9, %v20_v6  ;;  %v119_v11 = vpop.f32.mrb[3].mxu0 }
  0xe1   :  { %93 = vst.msk [vmem:[#allocation2 + $0x8] sm:$0xff] %vm16_vm0, %v90_v10 }
  0xe6   :  { %v97_v12 = vld [vmem:[#allocation2] sm:$0xff] }
  0xe7   :  { %99 = vst.msk [vmem:[%s165_s2] sm:$0xff] %vm16_vm0, %v97_v12 }
  0xe8   :  { %v98_v13 = vld [vmem:[#allocation2 + $0x8] sm:$0xff] }
  0xe9   :  { %100 = vst.msk [vmem:[%s165_s2 + $0x8] sm:$0xff] %vm16_vm0, %v98_v13 }

// kernel: _lambda_.36
= control target key start
LH: loop header
LB: loop body
LE: loop exit
PB: predicated region body
PF: predicated region fallthrough
CT: control target
= control target key end

     0   :  { %vm16_vm0 = vcmask 261120   ;;  %s118_s0 = inlined_call_operand.vmem [shape: f32[16,32], index: 0, kind: input, shape index: {}]   ;;  %s119_s1 = inlined_call_operand.vmem [shape: f32[1,32], index: 1, kind: input, shape index: {}]   ;;  %s120_s2 = inlined_call_operand.vmem [shape: f32[1,32], index: 2, kind: input, shape index: {}]   ;;  %s121_s3 = inlined_call_operand.vmem [shape: f32[16,32], index: 3, kind: output, shape index: {}]  }
   0x1   :  { %v14_v0 = vld [vmem:[%s118_s0] sm:$0xff]  ;;  %v15_v1 = vld [vmem:[%s118_s0 + $0x8] sm:$0xff] }
   0x2   :  { %v17_v2 = vsel %vm16_vm0, %v14_v0, 0.0  ;;  %v20_v3 = vsel %vm16_vm0, %v15_v1, 0.0  ;;  %v68_v21 = vld [vmem:[%s119_s1] ss:$0 sm:$0xff] }
   0x3   :  { %18 = vadd.xlane.f32.xlu0 %v17_v2  ;;  %v69_v23 = vld [vmem:[%s120_s2] ss:$0 sm:$0xff] }
   0x7   :  { %21 = vadd.xlane.f32.xlu0 %v20_v3 }
  0x90   :  { %v19_v4 = vpop.xlane.xlu0 %18 }
  0x91   :  { %v24_v5 = vmul.f32 0.03125, %v19_v4 }
  0x93   :  { %v26_v6 = vsub.f32 %v14_v0, %v24_v5 }
  0x94   :  { %v22_v7 = vpop.xlane.xlu0 %21 }
  0x95   :  { %v25_v8 = vmul.f32 0.03125, %v22_v7  ;;  %v28_v9 = vmul.f32 %v26_v6, %v26_v6 }
  0x97   :  { %v27_v10 = vsub.f32 %v15_v1, %v25_v8  ;;  %v30_v11 = vsel %vm16_vm0, %v28_v9, 0.0 }
  0x98   :  { %31 = vadd.xlane.f32.xlu1 %v30_v11 }
  0x99   :  { %v29_v12 = vmul.f32 %v27_v10, %v27_v10 }
  0x9b   :  { %v33_v13 = vsel %vm16_vm0, %v29_v12, 0.0 }
  0x9c   :  { %34 = vadd.xlane.f32.xlu1 %v33_v13 }
 0x125   :  { %v32_v14 = vpop.xlane.xlu1 %31 }
 0x126   :  { %v36_v15 = vmul.f32 0.03125, %v32_v14 }
 0x128   :  { %v38_v16 = vadd.f32 1e-05, %v36_v15 }
 0x129   :  { %v35_v17 = vpop.xlane.xlu1 %34 }
 0x12a   :  { %70 = vrsqrt.f32 %v38_v16  ;;  %v37_v18 = vmul.f32 0.03125, %v35_v17 }
 0x12c   :  { %v39_v19 = vadd.f32 1e-05, %v37_v18 }
 0x12e   :  { %72 = vrsqrt.f32 %v39_v19 }
 0x134   :  { %v71_v20 = vpop.eup %70 }
 0x135   :  { %v42_v22 = vmul.f32 %v71_v20, %v26_v6 }
 0x137   :  { %v51_v24 = vmul.f32 %v68_v21, %v42_v22 }
 0x138   :  { %v73_v25 = vpop.eup %72 }
 0x139   :  { %v60_v26 = vadd.f32 %v69_v23, %v51_v24  ;;  %v43_v27 = vmul.f32 %v73_v25, %v27_v10 }
 0x13b   :  { %62 = vst.msk [vmem:[%s121_s3] sm:$0xff] %vm16_vm0, %v60_v26  ;;  %v52_v28 = vmul.f32 %v68_v21, %v43_v27 }
 0x13d   :  { %v61_v29 = vadd.f32 %v69_v23, %v52_v28 }
 0x13f   :  { %63 = vst.msk [vmem:[%s121_s3 + $0x8] sm:$0xff] %vm16_vm0, %v61_v29 }

// kernel: _lambda_.38
= control target key start
LH: loop header
LB: loop body
LE: loop exit
PB: predicated region body
PF: predicated region fallthrough
CT: control target
= control target key end

     0   :  { %s654_s12 = smov 0   ;;  %s656_s13 = smov 0   ;;  %s714_s0 = inlined_call_operand.vmem [shape: bf16[8,8,8], index: 0, kind: input, shape index: {}]   ;;  %s715_s1 = inlined_call_operand.vmem [shape: bf16[8,8,8], index: 1, kind: input, shape index: {}]   ;;  %s716_s2 = inlined_call_operand.vmem [shape: bf16[8,8,8], index: 2, kind: input, shape index: {}]   ;;  %s717_s3 = inlined_call_operand.vmem [shape: f32[8,8,8], index: 3, kind: output, shape index: {}]  }
   0x1   :  { %s658_s14 = smov 0  }
   0x2 LB: > { %s32_s15 = sadd.s32 1, %s624_s13  ;;  %p545_p0 = scmp.ge.s32.totalorder %s628_s14, 1  ;;  %s628_s14 = sphi %s658_s14, %s13_s14   ;;  %s624_s13 = sphi %s656_s13, %s719_s13   ;;  %s620_s12 = sphi %s654_s12, %s718_s12  }
   0x3   : > { %p34_p1 = scmp.ge.s32.totalorder %s32_s15, 8  ;;  %p190_p2 = scmp.lt.s32.totalorder %s628_s14, 9 }
   0x5   : > { %s721_s15 = smov (%p34_p1, %s32_s15), 0  ;;  %p191_p3 = pnand %p545_p0, %p190_p2 }
   0x6   : > { %p232_p4 = scmp.lt.s32.totalorder (!%p191_p3), %s620_s12, 7  ;;  %vm268_vm0 = vcmask (!%p191_p3), 64512   ;;  %v630_v0 = vmov (!%p191_p3), 0.0   ;;  %vm631_vm1 = vmmov (!%p191_p3), 0   ;;  %vm265_vm2 = vcmask (!%p191_p3), 7168  }
   0x7   : > { %194 = sbr.rel (%p191_p3) target bundleno = 824 (0x338), region = 32  ;;  %558 = vmatprep.subr.bf16.mxu0 (!%p191_p3), %v630_v0  ;;  %269 = vst.msk [vmem:[#allocation4] sm:$0xff] (!%p191_p3), %vm268_vm0, %v630_v0  ;;  %560 = vmatprep.mubr.msk.bf16.mxu0 (!%p191_p3), %vm631_vm1, %v630_v0  ;;  %v632_v4 = vmov (!%p191_p3), -inf   ;;  %v328_v5 = vlaneseq (!%p191_p3)  ;;  %v633_v15 = vmov (!%p191_p3), 0   ;;  %vm373_vm4 = vcmask (!%p191_p3), 1043456  }
   0x8   : > { %564 = vmatprep.subr.bf16.mxu1 (!%p191_p3), %v630_v0  ;;  %566 = vmatprep.mubr.msk.bf16.mxu1 (!%p191_p3), %vm631_vm1, %v630_v0  ;;  %266 = vst.msk [vmem:[#allocation2] sm:$0xff] (!%p191_p3), %vm265_vm2, %v632_v4  ;;  %267 = vst.msk [vmem:[#allocation3] sm:$0xff] (!%p191_p3), %vm265_vm2, %v630_v0 }
   0x9   : > { %v329_v6 = vshrl.u32 (!%p191_p3), %v328_v5, 7  ;;  %v333_v7 = vand.u32 (!%p191_p3), 127, %v328_v5  ;;  %598 = vset.pattern.permute.xlu0 (!%p191_p3), %v633_v15  ;;  %599 = vset.pattern.permute.xlu1 (!%p191_p3), %v633_v15 }
   0xb   : > { %vm336_vm3 = vcmp.le.s32.totalorder (!%p191_p3), %v333_v7, %v329_v6 }
   0xe   : > { %s723_s12 = smov (!%p232_p4, %s620_s12), 7  ;;  %v362_v36 = vld [vmem:[#allocation4] sm:$0xff] }
   0xf   : > { %s676_s16 = sshll.u32 %s723_s12, 2  ;;  %v338_v16 = vld [vmem:[#allocation2] sm:$0xff]  ;;  %v354_v30 = vld [vmem:[#allocation3] sm:$0xff]  ;;  %s549_s26 = sshll.u32 %s723_s12, 3 }
  0x10   : > { %s245_s19 = scalar_lea.vmem %s715_s1, %s676_s16  ;;  %s238_s22 = scalar_lea.vmem %s714_s0, %s676_s16 }
  0x11   : > { %v278_v1 = vld [vmem:[%s245_s19] sm:$0xf]  ;;  %s252_s25 = scalar_lea.vmem %s716_s2, %s676_s16  ;;  %s259_s29 = scalar_lea.vmem %s717_s3, %s549_s26 }
  0x12   : > { %v285_v2 = vsel %vm268_vm0, %v278_v1, 0  ;;  %v277_v3 = vld [vmem:[%s238_s22] sm:$0xf] }
  0x13   : > { %559 = vmatpush3.bf16.xpose.msra.mxu0 %v285_v2  ;;  %v279_v20 = vld [vmem:[%s252_s25] sm:$0xf] }
  0x14   : > { %v375_v21 = vsel %vm373_vm4, %v279_v20, 0 }
  0x15   : > { %565 = vmatpush3.bf16.msra.mxu1 %v375_v21 }
  0x1a   : > { %561 = vmatmul.mubr.msk.bf16.vlgmr.msra.gmra.mrb[0].mxu0 %vm268_vm0, %v277_v3 }
  0xed   : > { %v321_v8 = vpop.f32.mrb[0].mxu0 }
  0xee   : > { %v327_v9 = vmul.f32 0.35355338, %v321_v8  ;;  %v562_v10 = vpop.f32.mrb[1].mxu0 }
  0xef   : > { %v324_v11 = vpop.f32.mrb[2].mxu0 }
  0xf0   : > { %v563_v12 = vpop.f32.mrb[3].mxu0  ;;  %v337_v13 = vsel %vm336_vm3, %v327_v9, -1e+09 }
  0xf1   : > { %v339_v14 = vsel %vm268_vm0, %v337_v13, -inf }
  0xf2   : > { %340 = vmax.xlane.f32.xlu0 %v339_v14 }
 0x17f   : > { %v341_v17 = vpop.xlane.xlu0 %340 }
 0x180   : > { %v342_v18 = vmax.f32 %v338_v16, %v341_v17 }
 0x182   : > { %v343_v19 = vsub.f32 %v338_v16, %v342_v18  ;;  %419 = vst.msk [vmem:[#allocation2] sm:$0xff] %vm265_vm2, %v342_v18  ;;  %348 = vperm.xlu0 %598, %v342_v18  }
 0x184   : > { %v344_v28 = vmul.f32 1.442695, %v343_v19 }
 0x201   : > { %v349_v22 = vpop.permute.xlu0 %348 }
 0x202   : > { %v351_v23 = vsub.f32 %v337_v13, %v349_v22 }
 0x204   : > { %v352_v24 = vmul.f32 1.442695, %v351_v23 }
 0x206   : > { %600 = vpow2.f32 %v352_v24 }
 0x207   : > { %602 = vpow2.f32 %v344_v28 }
 0x210   : > { %v601_v25 = vpop.eup %600 }
 0x211   : > { %v356_v26 = vsel %vm268_vm0, %v601_v25, 0.0  ;;  %v369_v27 = vpack.c.bf16 %v601_v25, %v601_v25  ;;  %v603_v29 = vpop.eup %602 }
 0x212   : > { %357 = vadd.xlane.f32.xlu1 %v356_v26  ;;  %v355_v31 = vmul.f32 %v603_v29, %v354_v30 }
 0x213   : > { %567 = vmatmul.mubr.msk.bf16.vlgmr.msra.gmra.mrb[0].mxu1 %vm268_vm0, %v369_v27 }
 0x223   : > { %365 = vperm.xlu1 %599, %v603_v29  }
 0x29f   : > { %v358_v32 = vpop.xlane.xlu1 %357 }
 0x2a0   : > { %v359_v33 = vadd.f32 %v358_v32, %v355_v31 }
 0x2a2   : > { %361 = vst.msk [vmem:[#allocation3] sm:$0xff] %vm265_vm2, %v359_v33 }
 0x2a3   : > { %v366_v37 = vpop.permute.xlu1 %365 }
 0x2a4   : > { %v368_v38 = vmul.f32 %v366_v37, %v362_v36 }
 0x2a9   : > { %v423_v34 = vld [vmem:[#allocation3] sm:$0xff] }
 0x2aa   : > { %604 = vrcp.f32 %v423_v34 }
 0x2b4   : > { %v605_v35 = vpop.eup %604 }
 0x2b5   : > { %428 = vperm.xlu1 %599, %v605_v35  }
 0x2e6   : > { %v411_v39 = vpop.f32.mrb[0].mxu1 }
 0x2e7   : > { %v417_v40 = vadd.f32 %v411_v39, %v368_v38  ;;  %v568_v41 = vpop.f32.mrb[1].mxu1 }
 0x2e8   : > { %v414_v42 = vpop.f32.mrb[2].mxu1 }
 0x2e9   : > { %418 = vst.msk [vmem:[#allocation4] sm:$0xff] %vm268_vm0, %v417_v40  ;;  %v569_v43 = vpop.f32.mrb[3].mxu1 }
 0x2f0   : > { %v425_v44 = vld [vmem:[#allocation4] sm:$0xff] }
 0x334   : > { %v429_v45 = vpop.permute.xlu1 %428 }
 0x335   : > { %v431_v46 = vmul.f32 %v429_v45, %v425_v44 }
 0x337   : > { %433 = vst.msk [vmem:[%s259_s29] sm:$0xff] %vm268_vm0, %v431_v46 }
 0x338 PF: > { %s13_s14 = sadd.s32 1, %s628_s14   ;;  %s718_s12 = smov %s624_s13 }
 0x339   : > { %p10_p5 = scmp.ge.s32.totalorder %s13_s14, 10   ;;  %s719_s13 = smov %s721_s15 }
 0x33b   :  { %12 = sbr.rel (!%p10_p5) target bundleno = 2 (0x2), region = 80 }

// kernel: _lambda_.39
= control target key start
LH: loop header
LB: loop body
LE: loop exit
PB: predicated region body
PF: predicated region fallthrough
CT: control target
= control target key end

     0   :  { %vm16_vm0 = vcmask 261120   ;;  %v124_v0 = vmov 0.0   ;;  %vm125_vm1 = vmmov 0   ;;  %s163_s1 = inlined_call_operand.vmem [shape: bf16[32,32], index: 1, kind: input, shape index: {}]   ;;  %s164_s0 = inlined_call_operand.vmem [shape: bf16[16,32], index: 0, kind: input, shape index: {}]   ;;  %s165_s2 = inlined_call_operand.vmem [shape: f32[16,32], index: 2, kind: output, shape index: {}]  }
   0x1   :  { %111 = vmatprep.subr.bf16.mxu0 %v124_v0  ;;  %v121_v1 = vld [vmem:[%s163_s1] sm:$0xff]   ;;  %115 = vmatprep.mubr.msk.bf16.mxu0 %vm125_vm1, %v124_v0  ;;  %17 = vst.msk [vmem:[#allocation2] sm:$0xff] %vm16_vm0, %v124_v0  ;;  %18 = vst.msk [vmem:[#allocation2 + $0x8] sm:$0xff] %vm16_vm0, %v124_v0  ;;  %v122_v2 = vld [vmem:[%s163_s1 + $0x8] sm:$0xff]  }
   0x2   :  { %112 = vmatpush3.bf16.msra.mxu0 %v121_v1  ;;  %v123_v3 = vld [vmem:[%s164_s0] sm:$0xff]  }
   0x3   :  { %113 = vmatprep.subr.bf16.mxu0 %v124_v0 }
   0x6   :  { %114 = vmatpush3.bf16.msra.mxu0 %v122_v2 }
   0x8   :  { %v19_v4 = vld [vmem:[#allocation2] sm:$0xff]  ;;  %v20_v6 = vld [vmem:[#allocation2 + $0x8] sm:$0xff] }
   0x9   :  { %116 = vmatmul.mubr.msk.bf16.vlgmr.msra.gmra.mrb[0].mxu0 %vm16_vm0, %v123_v3 }
  0xdc   :  { %v82_v5 = vpop.f32.mrb[0].mxu0 }
  0xdd   :  { %v89_v7 = vadd.f32 %v82_v5, %v19_v4  ;;  %v117_v8 = vpop.f32.mrb[1].mxu0 }
  0xde   :  { %v85_v9 = vpop.f32.mrb[2].mxu0 }
  0xdf   :  { %91 = vst.msk [vmem:[#allocation2] sm:$0xff] %vm16_vm0, %v89_v7  ;;  %v90_v10 = vadd.f32 %v85_v9, %v20_v6  ;;  %v118_v11 = vpop.f32.mrb[3].mxu0 }
  0xe1   :  { %92 = vst.msk [vmem:[#allocation2 + $0x8] sm:$0xff] %vm16_vm0, %v90_v10 }
  0xe6   :  { %v96_v12 = vld [vmem:[#allocation2] sm:$0xff] }
  0xe7   :  { %98 = vst.msk [vmem:[%s165_s2] sm:$0xff] %vm16_vm0, %v96_v12 }
  0xe8   :  { %v97_v13 = vld [vmem:[#allocation2 + $0x8] sm:$0xff] }
  0xe9   :  { %99 = vst.msk [vmem:[%s165_s2 + $0x8] sm:$0xff] %vm16_vm0, %v97_v13 }

// kernel: _lambda_.40
= control target key start
LH: loop header
LB: loop body
LE: loop exit
PB: predicated region body
PF: predicated region fallthrough
CT: control target
= control target key end

     0   :  { %vm23_vm0 = vcmask 261120   ;;  %s136_s0 = inlined_call_operand.vmem [shape: f32[16,32], index: 0, kind: input, shape index: {}]   ;;  %s137_s1 = inlined_call_operand.vmem [shape: f32[16,32], index: 1, kind: input, shape index: {}]   ;;  %s138_s2 = inlined_call_operand.vmem [shape: f32[1,32], index: 2, kind: input, shape index: {}]   ;;  %s139_s3 = inlined_call_operand.vmem [shape: f32[1,32], index: 3, kind: input, shape index: {}]   ;;  %s140_s4 = inlined_call_operand.vmem [shape: f32[16,32], index: 4, kind: output, shape index: {}]  }
   0x1   :  { %v17_v0 = vld [vmem:[%s136_s0] sm:$0xff]  ;;  %v18_v2 = vld [vmem:[%s136_s0 + $0x8] sm:$0xff] }
   0x2   :  { %v19_v1 = vld [vmem:[%s137_s1] sm:$0xff]  ;;  %v20_v4 = vld [vmem:[%s137_s1 + $0x8] sm:$0xff] }
   0x3   :  { %v21_v3 = vadd.f32 %v19_v1, %v17_v0  ;;  %v22_v5 = vadd.f32 %v20_v4, %v18_v2  ;;  %v75_v25 = vld [vmem:[%s138_s2] ss:$0 sm:$0xff] }
   0x4   :  { %v76_v27 = vld [vmem:[%s139_s3] ss:$0 sm:$0xff] }
   0x5   :  { %v24_v6 = vsel %vm23_vm0, %v21_v3, 0.0  ;;  %v27_v7 = vsel %vm23_vm0, %v22_v5, 0.0 }
   0x6   :  { %25 = vadd.xlane.f32.xlu0 %v24_v6 }
   0xa   :  { %28 = vadd.xlane.f32.xlu0 %v27_v7 }
  0x93   :  { %v26_v8 = vpop.xlane.xlu0 %25 }
  0x94   :  { %v31_v9 = vmul.f32 0.03125, %v26_v8 }
  0x96   :  { %v33_v10 = vsub.f32 %v21_v3, %v31_v9 }
  0x97   :  { %v29_v11 = vpop.xlane.xlu0 %28 }
  0x98   :  { %v32_v12 = vmul.f32 0.03125, %v29_v11  ;;  %v35_v13 = vmul.f32 %v33_v10, %v33_v10 }
  0x9a   :  { %v34_v14 = vsub.f32 %v22_v5, %v32_v12  ;;  %v37_v15 = vsel %vm23_vm0, %v35_v13, 0.0 }
  0x9b   :  { %38 = vadd.xlane.f32.xlu1 %v37_v15 }
  0x9c   :  { %v36_v16 = vmul.f32 %v34_v14, %v34_v14 }
  0x9e   :  { %v40_v17 = vsel %vm23_vm0, %v36_v16, 0.0 }
  0x9f   :  { %41 = vadd.xlane.f32.xlu1 %v40_v17 }
 0x128   :  { %v39_v18 = vpop.xlane.xlu1 %38 }
 0x129   :  { %v43_v19 = vmul.f32 0.03125, %v39_v18 }
 0x12b   :  { %v45_v20 = vadd.f32 1e-05, %v43_v19 }
 0x12c   :  { %v42_v21 = vpop.xlane.xlu1 %41 }
 0x12d   :  { %77 = vrsqrt.f32 %v45_v20  ;;  %v44_v22 = vmul.f32 0.03125, %v42_v21 }
 0x12f   :  { %v46_v23 = vadd.f32 1e-05, %v44_v22 }
 0x131   :  { %79 = vrsqrt.f32 %v46_v23 }
 0x137   :  { %v78_v24 = vpop.eup %77 }
 0x138   :  { %v49_v26 = vmul.f32 %v78_v24, %v33_v10 }
 0x13a   :  { %v58_v28 = vmul.f32 %v75_v25, %v49_v26 }
 0x13b   :  { %v80_v29 = vpop.eup %79 }
 0x13c   :  { %v67_v30 = vadd.f32 %v76_v27, %v58_v28  ;;  %v50_v31 = vmul.f32 %v80_v29, %v34_v14 }
 0x13e   :  { %69 = vst.msk [vmem:[%s140_s4] sm:$0xff] %vm23_vm0, %v67_v30  ;;  %v59_v32 = vmul.f32 %v75_v25, %v50_v31 }
 0x140   :  { %v68_v33 = vadd.f32 %v76_v27, %v59_v32 }
 0x142   :  { %70 = vst.msk [vmem:[%s140_s4 + $0x8] sm:$0xff] %vm23_vm0, %v68_v33 }

// kernel: _lambda_.41
= control target key start
LH: loop header
LB: loop body
LE: loop exit
PB: predicated region body
PF: predicated region fallthrough
CT: control target
= control target key end

     0   :  { %vm19_vm0 = vcmask 523264   ;;  %v140_v0 = vmov 0.0   ;;  %vm141_vm1 = vmmov 0   ;;  %vm47_vm2 = vcmask 261120   ;;  %s186_s1 = inlined_call_operand.vmem [shape: bf16[32,64], index: 1, kind: input, shape index: {}]   ;;  %s187_s0 = inlined_call_operand.vmem [shape: bf16[16,32], index: 0, kind: input, shape index: {}]   ;;  %s188_s2 = inlined_call_operand.vmem [shape: f32[1,64], index: 2, kind: input, shape index: {}]   ;;  %s189_s3 = inlined_call_operand.vmem [shape: f32[16,64], index: 3, kind: output, shape index: {}]  }
   0x1   :  { %127 = vmatprep.subr.bf16.mxu0 %v140_v0  ;;  %v137_v1 = vld [vmem:[%s186_s1] sm:$0xff]   ;;  %131 = vmatprep.mubr.msk.bf16.mxu0 %vm141_vm1, %v140_v0  ;;  %20 = vst.msk [vmem:[#allocation2] sm:$0xff] %vm19_vm0, %v140_v0  ;;  %21 = vst.msk [vmem:[#allocation2 + $0x8] sm:$0xff] %vm19_vm0, %v140_v0  ;;  %v138_v2 = vld [vmem:[%s186_s1 + $0x8] sm:$0xff]  }
   0x2   :  { %128 = vmatpush3.bf16.msra.mxu0 %v137_v1  ;;  %v139_v3 = vld [vmem:[%s187_s0] sm:$0xff]  }
   0x3   :  { %129 = vmatprep.subr.bf16.mxu0 %v140_v0  ;;  %v123_v12 = vld [vmem:[%s188_s2] ss:$0 sm:$0xff] }
   0x6   :  { %130 = vmatpush3.bf16.msra.mxu0 %v138_v2 }
   0x8   :  { %v22_v4 = vld [vmem:[#allocation2] sm:$0xff]  ;;  %v23_v6 = vld [vmem:[#allocation2 + $0x8] sm:$0xff] }
   0x9   :  { %132 = vmatmul.mubr.msk.bf16.vlgmr.msra.gmra.mrb[0].mxu0 %vm47_vm2, %v139_v3 }
  0xdc   :  { %v85_v5 = vpop.f32.mrb[0].mxu0 }
  0xdd   :  { %v92_v7 = vadd.f32 %v85_v5, %v22_v4  ;;  %v133_v8 = vpop.f32.mrb[1].mxu0 }
  0xde   :  { %v88_v9 = vpop.f32.mrb[2].mxu0 }
  0xdf   :  { %95 = vst.msk [vmem:[#allocation2] sm:$0xff] %vm19_vm0, %v92_v7  ;;  %v93_v10 = vadd.f32 %v88_v9, %v23_v6  ;;  %v134_v11 = vpop.f32.mrb[3].mxu0 }
  0xe1   :  { %96 = vst.msk [vmem:[#allocation2 + $0x8] sm:$0xff] %vm19_vm0, %v93_v10 }
  0xe6   :  { %v100_v13 = vld [vmem:[#allocation2] sm:$0xff] }
  0xe7   :  { %v109_v14 = vadd.f32 %v123_v12, %v100_v13 }
  0xe8   :  { %v101_v15 = vld [vmem:[#allocation2 + $0x8] sm:$0xff] }
  0xe9   :  { %v111_v16 = vmax.f32 %v109_v14, 0.0  ;;  %v110_v17 = vadd.f32 %v123_v12, %v101_v15 }
  0xeb   :  { %113 = vst.msk [vmem:[%s189_s3] sm:$0xff] %vm19_vm0, %v111_v16  ;;  %v112_v18 = vmax.f32 %v110_v17, 0.0 }
  0xed   :  { %114 = vst.msk [vmem:[%s189_s3 + $0x8] sm:$0xff] %vm19_vm0, %v112_v18 }

// kernel: _lambda_.51
= control target key start
LH: loop header
LB: loop body
LE: loop exit
PB: predicated region body
PF: predicated region fallthrough
CT: control target
= control target key end

     0   :  { %vm19_vm0 = vcmask 130048   ;;  %v138_v0 = vmov 0.0   ;;  %vm139_vm1 = vmmov 0   ;;  %vm47_vm2 = vcmask 261120   ;;  %s184_s1 = inlined_call_operand.vmem [shape: bf16[32,16], index: 1, kind: input, shape index: {}]   ;;  %s185_s0 = inlined_call_operand.vmem [shape: bf16[16,32], index: 0, kind: input, shape index: {}]   ;;  %s186_s2 = inlined_call_operand.vmem [shape: f32[1,16], index: 2, kind: input, shape index: {}]   ;;  %s187_s3 = inlined_call_operand.vmem [shape: f32[16,16], index: 3, kind: output, shape index: {}]  }
   0x1   :  { %125 = vmatprep.subr.bf16.mxu0 %v138_v0  ;;  %v135_v1 = vld [vmem:[%s184_s1] sm:$0xff]   ;;  %129 = vmatprep.mubr.msk.bf16.mxu0 %vm139_vm1, %v138_v0  ;;  %20 = vst.msk [vmem:[#allocation2] sm:$0xff] %vm19_vm0, %v138_v0  ;;  %21 = vst.msk [vmem:[#allocation2 + $0x8] sm:$0xff] %vm19_vm0, %v138_v0  ;;  %v136_v2 = vld [vmem:[%s184_s1 + $0x8] sm:$0xff]  }
   0x2   :  { %126 = vmatpush3.bf16.msra.mxu0 %v135_v1  ;;  %v137_v3 = vld [vmem:[%s185_s0] sm:$0xff]  }
   0x3   :  { %127 = vmatprep.subr.bf16.mxu0 %v138_v0  ;;  %v121_v12 = vld [vmem:[%s186_s2] ss:$0 sm:$0xff] }
   0x6   :  { %128 = vmatpush3.bf16.msra.mxu0 %v136_v2 }
   0x8   :  { %v22_v4 = vld [vmem:[#allocation2] sm:$0xff]  ;;  %v23_v6 = vld [vmem:[#allocation2 + $0x8] sm:$0xff] }
   0x9   :  { %130 = vmatmul.mubr.msk.bf16.vlgmr.msra.gmra.mrb[0].mxu0 %vm47_vm2, %v137_v3 }
  0xdc   :  { %v85_v5 = vpop.f32.mrb[0].mxu0 }
  0xdd   :  { %v92_v7 = vadd.f32 %v85_v5, %v22_v4  ;;  %v131_v8 = vpop.f32.mrb[1].mxu0 }
  0xde   :  { %v88_v9 = vpop.f32.mrb[2].mxu0 }
  0xdf   :  { %95 = vst.msk [vmem:[#allocation2] sm:$0xff] %vm19_vm0, %v92_v7  ;;  %v93_v10 = vadd.f32 %v88_v9, %v23_v6  ;;  %v132_v11 = vpop.f32.mrb[3].mxu0 }
  0xe1   :  { %96 = vst.msk [vmem:[#allocation2 + $0x8] sm:$0xff] %vm19_vm0, %v93_v10 }
  0xe6   :  { %v100_v13 = vld [vmem:[#allocation2] sm:$0xff] }
  0xe7   :  { %v109_v14 = vadd.f32 %v121_v12, %v100_v13 }
  0xe8   :  { %v101_v15 = vld [vmem:[#allocation2 + $0x8] sm:$0xff] }
  0xe9   :  { %111 = vst.msk [vmem:[%s187_s3] sm:$0xff] %vm19_vm0, %v109_v14  ;;  %v110_v16 = vadd.f32 %v121_v12, %v101_v15 }
  0xeb   :  { %112 = vst.msk [vmem:[%s187_s3 + $0x8] sm:$0xff] %vm19_vm0, %v110_v16 }

// kernel: _lambda_.42
= control target key start
LH: loop header
LB: loop body
LE: loop exit
PB: predicated region body
PF: predicated region fallthrough
CT: control target
= control target key end

     0   :  { %vm19_vm0 = vcmask 261120   ;;  %v164_v0 = vmov 0.0   ;;  %vm165_vm1 = vmmov 0   ;;  %vm63_vm2 = vcmask 523264   ;;  %s216_s1 = inlined_call_operand.vmem [shape: bf16[64,32], index: 1, kind: input, shape index: {}]   ;;  %s217_s0 = inlined_call_operand.vmem [shape: bf16[16,64], index: 0, kind: input, shape index: {}]   ;;  %s218_s2 = inlined_call_operand.vmem [shape: f32[1,32], index: 2, kind: input, shape index: {}]   ;;  %s219_s3 = inlined_call_operand.vmem [shape: f32[16,32], index: 3, kind: output, shape index: {}]  }
   0x1   :  { %145 = vmatprep.subr.bf16.mxu0 %v164_v0  ;;  %v159_v1 = vld [vmem:[%s216_s1] sm:$0xff]   ;;  %153 = vmatprep.mubr.msk.bf16.mxu0 %vm165_vm1, %v164_v0  ;;  %20 = vst.msk [vmem:[#allocation2] sm:$0xff] %vm19_vm0, %v164_v0  ;;  %21 = vst.msk [vmem:[#allocation2 + $0x8] sm:$0xff] %vm19_vm0, %v164_v0  ;;  %v160_v2 = vld [vmem:[%s216_s1 + $0x8] sm:$0xff]  }
   0x2   :  { %146 = vmatpush3.bf16.msra.mxu0 %v159_v1  ;;  %v161_v3 = vld [vmem:[%s216_s1 + $0x10] sm:$0xff]   ;;  %v162_v4 = vld [vmem:[%s216_s1 + $0x18] sm:$0xff]   ;;  %v163_v5 = vld [vmem:[%s217_s0] sm:$0xff]  }
   0x3   :  { %147 = vmatprep.subr.bf16.mxu0 %v164_v0  ;;  %v139_v14 = vld [vmem:[%s218_s2] ss:$0 sm:$0xff] }
   0x6   :  { %148 = vmatpush3.bf16.msra.mxu0 %v160_v2 }
   0x7   :  { %149 = vmatprep.subr.bf16.mxu0 %v164_v0 }
   0x8   :  { %v22_v6 = vld [vmem:[#allocation2] sm:$0xff]  ;;  %v23_v8 = vld [vmem:[#allocation2 + $0x8] sm:$0xff] }
   0xa   :  { %150 = vmatpush3.bf16.msra.mxu0 %v161_v3 }
   0xb   :  { %151 = vmatprep.subr.bf16.mxu0 %v164_v0 }
   0xe   :  { %152 = vmatpush3.bf16.msra.mxu0 %v162_v4 }
  0x11   :  { %154 = vmatmul.mubr.msk.bf16.vlgmr.msra.gmra.mrb[0].mxu0 %vm63_vm2, %v163_v5 }
  0xe4   :  { %v101_v7 = vpop.f32.mrb[0].mxu0 }
  0xe5   :  { %v108_v9 = vadd.f32 %v101_v7, %v22_v6  ;;  %v155_v10 = vpop.f32.mrb[1].mxu0 }
  0xe6   :  { %v104_v11 = vpop.f32.mrb[2].mxu0 }
  0xe7   :  { %111 = vst.msk [vmem:[#allocation2] sm:$0xff] %vm19_vm0, %v108_v9  ;;  %v109_v12 = vadd.f32 %v104_v11, %v23_v8  ;;  %v156_v13 = vpop.f32.mrb[3].mxu0 }
  0xe9   :  { %112 = vst.msk [vmem:[#allocation2 + $0x8] sm:$0xff] %vm19_vm0, %v109_v12 }
  0xee   :  { %v116_v15 = vld [vmem:[#allocation2] sm:$0xff] }
  0xef   :  { %v125_v16 = vadd.f32 %v139_v14, %v116_v15 }
  0xf0   :  { %v117_v17 = vld [vmem:[#allocation2 + $0x8] sm:$0xff] }
  0xf1   :  { %127 = vst.msk [vmem:[%s219_s3] sm:$0xff] %vm19_vm0, %v125_v16  ;;  %v126_v18 = vadd.f32 %v139_v14, %v117_v17 }
  0xf3   :  { %128 = vst.msk [vmem:[%s219_s3 + $0x8] sm:$0xff] %vm19_vm0, %v126_v18 }

// kernel: _lambda_.53
= control target key start
LH: loop header
LB: loop body
LE: loop exit
PB: predicated region body
PF: predicated region fallthrough
CT: control target
= control target key end

     0   :  { %vm16_vm0 = vcmask 523264   ;;  %v112_v0 = vmov 0.0   ;;  %vm113_vm1 = vmmov 0   ;;  %vm36_vm2 = vcmask 130048   ;;  %s147_s1 = inlined_call_operand.vmem [shape: bf16[16,64], index: 1, kind: input, shape index: {}]   ;;  %s148_s0 = inlined_call_operand.vmem [shape: bf16[16,16], index: 0, kind: input, shape index: {}]   ;;  %s149_s2 = inlined_call_operand.vmem [shape: f32[16,64], index: 2, kind: output, shape index: {}]  }
   0x1   :  { %17 = vst.msk [vmem:[#allocation2] sm:$0xff] %vm16_vm0, %v112_v0  ;;  %18 = vst.msk [vmem:[#allocation2 + $0x8] sm:$0xff] %vm16_vm0, %v112_v0  ;;  %102 = vmatprep.subr.bf16.mxu0 %v112_v0  ;;  %v110_v1 = vld [vmem:[%s147_s1] sm:$0xff]   ;;  %104 = vmatprep.mubr.msk.bf16.mxu0 %vm113_vm1, %v112_v0 }
   0x2   :  { %v111_v2 = vld [vmem:[%s148_s0] sm:$0xff]   ;;  %103 = vmatpush3.bf16.msra.mxu0 %v110_v1 }
   0x5   :  { %105 = vmatmul.mubr.msk.bf16.vlgmr.msra.gmra.mrb[0].mxu0 %vm36_vm2, %v111_v2 }
   0x8   :  { %v19_v3 = vld [vmem:[#allocation2] sm:$0xff]  ;;  %v20_v5 = vld [vmem:[#allocation2 + $0x8] sm:$0xff] }
  0xd8   :  { %v74_v4 = vpop.f32.mrb[0].mxu0 }
  0xd9   :  { %v81_v6 = vadd.f32 %v74_v4, %v19_v3  ;;  %v106_v7 = vpop.f32.mrb[1].mxu0 }
  0xda   :  { %v77_v8 = vpop.f32.mrb[2].mxu0 }
  0xdb   :  { %84 = vst.msk [vmem:[#allocation2] sm:$0xff] %vm16_vm0, %v81_v6  ;;  %v82_v9 = vadd.f32 %v77_v8, %v20_v5  ;;  %v107_v10 = vpop.f32.mrb[3].mxu0 }
  0xdd   :  { %85 = vst.msk [vmem:[#allocation2 + $0x8] sm:$0xff] %vm16_vm0, %v82_v9 }
  0xe2   :  { %v89_v11 = vld [vmem:[#allocation2] sm:$0xff] }
  0xe3   :  { %91 = vst.msk [vmem:[%s149_s2] sm:$0xff] %vm16_vm0, %v89_v11 }
  0xe4   :  { %v90_v12 = vld [vmem:[#allocation2 + $0x8] sm:$0xff] }
  0xe5   :  { %92 = vst.msk [vmem:[%s149_s2 + $0x8] sm:$0xff] %vm16_vm0, %v90_v12 }

// kernel: _lambda_.55
= control target key start
LH: loop header
LB: loop body
LE: loop exit
PB: predicated region body
PF: predicated region fallthrough
CT: control target
= control target key end

     0   :  { %vm16_vm0 = vcmask 261120   ;;  %vm47_vm1 = vcmask 130048   ;;  %v145_v1 = vmov 0.0   ;;  %s194_s1 = inlined_call_operand.vmem [shape: bf16[16,32], index: 1, kind: input, shape index: {}]   ;;  %s195_s0 = inlined_call_operand.vmem [shape: bf16[32,16], index: 0, kind: input, shape index: {}]   ;;  %s196_s2 = inlined_call_operand.vmem [shape: f32[32,32], index: 2, kind: output, shape index: {}]  }
   0x1   :  { %v142_v0 = vld [vmem:[%s194_s1] sm:$0xff]   ;;  %19 = vst.msk [vmem:[#allocation2 + $0x10] sm:$0xff] %vm16_vm0, %v145_v1  ;;  %17 = vst.msk [vmem:[#allocation2] sm:$0xff] %vm16_vm0, %v145_v1  ;;  %v144_v3 = vld [vmem:[%s195_s0 + $0x8] sm:$0xff]  }
   0x2   :  { %18 = vst.msk [vmem:[#allocation2 + $0x8] sm:$0xff] %vm16_vm0, %v145_v1  ;;  %20 = vst.msk [vmem:[#allocation2 + $0x18] sm:$0xff] %vm16_vm0, %v145_v1  ;;  %v143_v2 = vld [vmem:[%s195_s0] sm:$0xff]   ;;  %135 = vmatprep.subr.bf16.mxu0 %v142_v0 }
   0x3   :  { %136 = vmatpush3.bf16.msra.mxu0 %v142_v0  ;;  %137 = vmatprep.mubr.msk.bf16.mxu0 %vm47_vm1, %v143_v2 }
   0x6   :  { %138 = vmatmul.mubr.msk.bf16.vlgmr.msra.gmra.mrb[0].mxu0 %vm47_vm1, %v144_v3 }
   0x8   :  { %v23_v4 = vld [vmem:[#allocation2 + $0x10] sm:$0xff]  ;;  %v21_v5 = vld [vmem:[#allocation2] sm:$0xff] }
   0x9   :  { %v24_v7 = vld [vmem:[#allocation2 + $0x18] sm:$0xff]  ;;  %v22_v10 = vld [vmem:[#allocation2 + $0x8] sm:$0xff] }
  0xd9   :  { %v139_v6 = vpop.f32.mrb[0].mxu0 }
  0xda   :  { %v105_v8 = vadd.f32 %v139_v6, %v23_v4  ;;  %v88_v9 = vpop.f32.mrb[1].mxu0 }
  0xdb   :  { %v103_v11 = vadd.f32 %v88_v9, %v21_v5  ;;  %v140_v12 = vpop.f32.mrb[2].mxu0 }
  0xdc   :  { %110 = vst.msk [vmem:[#allocation2 + $0x10] sm:$0xff] %vm16_vm0, %v105_v8  ;;  %v106_v13 = vadd.f32 %v140_v12, %v24_v7  ;;  %v91_v14 = vpop.f32.mrb[3].mxu0 }
  0xdd   :  { %108 = vst.msk [vmem:[#allocation2] sm:$0xff] %vm16_vm0, %v103_v11  ;;  %v104_v15 = vadd.f32 %v91_v14, %v22_v10 }
  0xde   :  { %111 = vst.msk [vmem:[#allocation2 + $0x18] sm:$0xff] %vm16_vm0, %v106_v13 }
  0xdf   :  { %109 = vst.msk [vmem:[#allocation2 + $0x8] sm:$0xff] %vm16_vm0, %v104_v15 }
  0xe3   :  { %v117_v16 = vld [vmem:[#allocation2 + $0x10] sm:$0xff] }
  0xe4   :  { %121 = vst.msk [vmem:[%s196_s2 + $0x10] sm:$0xff] %vm16_vm0, %v117_v16  ;;  %v115_v17 = vld [vmem:[#allocation2] sm:$0xff] }
  0xe5   :  { %119 = vst.msk [vmem:[%s196_s2] sm:$0xff] %vm16_vm0, %v115_v17  ;;  %v118_v18 = vld [vmem:[#allocation2 + $0x18] sm:$0xff] }
  0xe6   :  { %122 = vst.msk [vmem:[%s196_s2 + $0x18] sm:$0xff] %vm16_vm0, %v118_v18  ;;  %v116_v19 = vld [vmem:[#allocation2 + $0x8] sm:$0xff] }
  0xe7   :  { %120 = vst.msk [vmem:[%s196_s2 + $0x8] sm:$0xff] %vm16_vm0, %v116_v19 }

// kernel: _lambda_.57
= control target key start
LH: loop header
LB: loop body
LE: loop exit
PB: predicated region body
PF: predicated region fallthrough
CT: control target
= control target key end

     0   :  { %vm75_vm0 = vcmask 1043456   ;;  %vm62_vm1 = vcmask 64512   ;;  %vm16_vm2 = vcmask 31744   ;;  %v216_v1 = vmov 0.0   ;;  %s302_s1 = inlined_call_operand.vmem [shape: bf16[8,4], index: 1, kind: input, shape index: {}]   ;;  %s303_s0 = inlined_call_operand.vmem [shape: bf16[64,8], index: 0, kind: input, shape index: {}]   ;;  %s304_s2 = inlined_call_operand.vmem [shape: f32[64,4], index: 2, kind: output, shape index: {}]  }
   0x1   :  { %v41_v0 = vld [vmem:[%s302_s1] sm:$0xf]  ;;  %19 = vst.msk [vmem:[#allocation2 + $0x10] sm:$0xff] %vm16_vm2, %v216_v1  ;;  %17 = vst.msk [vmem:[#allocation2] sm:$0xff] %vm16_vm2, %v216_v1  ;;  %v213_v4 = vld [vmem:[%s303_s0 + $0x10] sm:$0xff]  }
   0x2   :  { %18 = vst.msk [vmem:[#allocation2 + $0x8] sm:$0xff] %vm16_vm2, %v216_v1  ;;  %20 = vst.msk [vmem:[#allocation2 + $0x18] sm:$0xff] %vm16_vm2, %v216_v1  ;;  %209 = vmatprep.subr.msk.bf16.mxu0 %vm75_vm0, %v41_v0  ;;  %210 = vmatprep.subr.msk.bf16.mxu1 %vm75_vm0, %v41_v0  ;;  %v77_v2 = vsel %vm75_vm0, %v41_v0, 0  ;;  %v212_v3 = vld [vmem:[%s303_s0] sm:$0xff]   ;;  %v214_v5 = vld [vmem:[%s303_s0 + $0x8] sm:$0xff]  }
   0x3   :  { %21 = vst.msk [vmem:[#allocation2 + $0x20] sm:$0xff] %vm16_vm2, %v216_v1  ;;  %22 = vst.msk [vmem:[#allocation2 + $0x28] sm:$0xff] %vm16_vm2, %v216_v1  ;;  %198 = vmatpush3.bf16.msra.mxu0 %v77_v2  ;;  %208 = vmatpush3.bf16.msra.mxu1 %v77_v2  ;;  %v215_v6 = vld [vmem:[%s303_s0 + $0x18] sm:$0xff]  }
   0x4   :  { %23 = vst.msk [vmem:[#allocation2 + $0x30] sm:$0xff] %vm16_vm2, %v216_v1  ;;  %24 = vst.msk [vmem:[#allocation2 + $0x38] sm:$0xff] %vm16_vm2, %v216_v1  ;;  %199 = vmatprep.mubr.msk.bf16.mxu0 %vm62_vm1, %v212_v3  ;;  %203 = vmatprep.mubr.msk.bf16.mxu1 %vm62_vm1, %v213_v4 }
   0x6   :  { %200 = vmatmul.mubr.msk.bf16.vlgmr.msra.gmra.mrb[0].mxu0 %vm62_vm1, %v214_v5  ;;  %204 = vmatmul.mubr.msk.bf16.vlgmr.msra.gmra.mrb[0].mxu1 %vm62_vm1, %v215_v6 }
   0x8   :  { %v27_v7 = vld [vmem:[#allocation2 + $0x10] sm:$0xff]  ;;  %v25_v9 = vld [vmem:[#allocation2] sm:$0xff] }
   0x9   :  { %v28_v12 = vld [vmem:[#allocation2 + $0x18] sm:$0xff]  ;;  %v26_v17 = vld [vmem:[#allocation2 + $0x8] sm:$0xff] }
   0xa   :  { %v29_v11 = vld [vmem:[#allocation2 + $0x20] sm:$0xff]  ;;  %v30_v22 = vld [vmem:[#allocation2 + $0x28] sm:$0xff] }
   0xb   :  { %v31_v8 = vld [vmem:[#allocation2 + $0x30] sm:$0xff]  ;;  %v32_v16 = vld [vmem:[#allocation2 + $0x38] sm:$0xff] }
  0xd9   :  { %v201_v10 = vpop.f32.mrb[0].mxu0  ;;  %v205_v14 = vpop.f32.mrb[0].mxu1 }
  0xda   :  { %v146_v13 = vadd.f32 %v201_v10, %v27_v7  ;;  %v113_v15 = vpop.f32.mrb[1].mxu0  ;;  %v150_v18 = vadd.f32 %v205_v14, %v31_v8  ;;  %v129_v20 = vpop.f32.mrb[1].mxu1 }
  0xdb   :  { %v144_v19 = vadd.f32 %v113_v15, %v25_v9  ;;  %v202_v21 = vpop.f32.mrb[2].mxu0  ;;  %v148_v23 = vadd.f32 %v129_v20, %v29_v11  ;;  %v206_v25 = vpop.f32.mrb[2].mxu1 }
  0xdc   :  { %155 = vst.msk [vmem:[#allocation2 + $0x10] sm:$0xff] %vm16_vm2, %v146_v13  ;;  %v147_v24 = vadd.f32 %v202_v21, %v28_v12  ;;  %v116_v26 = vpop.f32.mrb[3].mxu0  ;;  %159 = vst.msk [vmem:[#allocation2 + $0x30] sm:$0xff] %vm16_vm2, %v150_v18  ;;  %v151_v27 = vadd.f32 %v206_v25, %v32_v16  ;;  %v132_v29 = vpop.f32.mrb[3].mxu1 }
  0xdd   :  { %153 = vst.msk [vmem:[#allocation2] sm:$0xff] %vm16_vm2, %v144_v19  ;;  %v145_v28 = vadd.f32 %v116_v26, %v26_v17  ;;  %157 = vst.msk [vmem:[#allocation2 + $0x20] sm:$0xff] %vm16_vm2, %v148_v23  ;;  %v149_v30 = vadd.f32 %v132_v29, %v30_v22 }
  0xde   :  { %156 = vst.msk [vmem:[#allocation2 + $0x18] sm:$0xff] %vm16_vm2, %v147_v24  ;;  %160 = vst.msk [vmem:[#allocation2 + $0x38] sm:$0xff] %vm16_vm2, %v151_v27 }
  0xdf   :  { %154 = vst.msk [vmem:[#allocation2 + $0x8] sm:$0xff] %vm16_vm2, %v145_v28  ;;  %158 = vst.msk [vmem:[#allocation2 + $0x28] sm:$0xff] %vm16_vm2, %v149_v30 }
  0xe3   :  { %v166_v31 = vld [vmem:[#allocation2 + $0x10] sm:$0xff] }
  0xe4   :  { %174 = vst.msk [vmem:[%s304_s2 + $0x10] sm:$0xff] %vm16_vm2, %v166_v31  ;;  %v170_v32 = vld [vmem:[#allocation2 + $0x30] sm:$0xff]  ;;  %v164_v33 = vld [vmem:[#allocation2] sm:$0xff] }
  0xe5   :  { %178 = vst.msk [vmem:[%s304_s2 + $0x30] sm:$0xff] %vm16_vm2, %v170_v32  ;;  %172 = vst.msk [vmem:[%s304_s2] sm:$0xff] %vm16_vm2, %v164_v33  ;;  %v168_v34 = vld [vmem:[#allocation2 + $0x20] sm:$0xff]  ;;  %v167_v35 = vld [vmem:[#allocation2 + $0x18] sm:$0xff] }
  0xe6   :  { %176 = vst.msk [vmem:[%s304_s2 + $0x20] sm:$0xff] %vm16_vm2, %v168_v34  ;;  %175 = vst.msk [vmem:[%s304_s2 + $0x18] sm:$0xff] %vm16_vm2, %v167_v35  ;;  %v171_v36 = vld [vmem:[#allocation2 + $0x38] sm:$0xff]  ;;  %v165_v37 = vld [vmem:[#allocation2 + $0x8] sm:$0xff] }
  0xe7   :  { %179 = vst.msk [vmem:[%s304_s2 + $0x38] sm:$0xff] %vm16_vm2, %v171_v36  ;;  %173 = vst.msk [vmem:[%s304_s2 + $0x8] sm:$0xff] %vm16_vm2, %v165_v37  ;;  %v169_v38 = vld [vmem:[#allocation2 + $0x28] sm:$0xff] }
  0xe8   :  { %177 = vst.msk [vmem:[%s304_s2 + $0x28] sm:$0xff] %vm16_vm2, %v169_v38 }

</bundles_post_ra>
